<compile_context>
chip_gen: v5e
topology: v5e:2x2
jax: 0.10.0
libtpu: 0.0.40
codegen_flags: <defaults>
</compile_context>

<pallas_src>
import functools

import jax
import jax.numpy as jnp
from jax import lax
from jax.experimental import pallas as pl
from jax.experimental.pallas import tpu as pltpu


def _residual_block_kernel(x_ref, w_ref, b_ref, gamma_ref, beta_ref, mask_ref,
                           gmat_ref, o_ref, patch_ref, y_ref,
                           *, C, D, H, W, groups, eps, narrow_stage):
    DHW = D * H * W
    HW = H * W
    cg = C // groups
    cdtype = patch_ref.dtype

    x = x_ref[0]                                   # (C, DHW), lane-dense, input dtype
    x_f32 = x.astype(jnp.float32)
    # Stage the im2col taps in compute_dtype (bf16 on v5e/v6e/v7x) when possible;
    # otherwise keep roll/mask math in f32 and cast only at the patch store.
    x_stage = x.astype(cdtype) if narrow_stage else x_f32

    # ---- Conv3d(3x3x3, pad=1) via K-split im2col: for each kd-group, 9 lane
    # rolls (XLU) + boundary masks (VPU) into a (9C, DHW) scratch, then one MXU
    # matmul (C, 9C) @ (9C, DHW) accumulated into the f32 y scratch.
    for g, kd in enumerate((-1, 0, 1)):
        k = 0
        for kh in (-1, 0, 1):
            for kw in (-1, 0, 1):
                tap = g * 9 + k
                off = kd * HW + kh * W + kw
                shifted = (x_stage if off == 0
                           else pltpu.roll(x_stage, shift=(-off) % DHW, axis=1))
                val = shifted * mask_ref[tap:tap + 1, :]
                patch_ref[k * C:(k + 1) * C, :] = val.astype(cdtype)
                k += 1
        part = jnp.dot(w_ref[g], patch_ref[...], preferred_element_type=jnp.float32)
        if g == 0:
            y_ref[...] = part
        else:
            y_ref[...] = y_ref[...] + part

    y = y_ref[...] + b_ref[...]                    # conv bias, (C,1) broadcast

    # ---- GroupNorm statistics (per-channel lane reductions, then group combine)
    sum_c = jnp.sum(y, axis=1, keepdims=True)      # (C, 1)
    sumsq_c = jnp.sum(y * y, axis=1, keepdims=True)
    if cg == 1:
        inv_n = 1.0 / DHW
        mean = sum_c * inv_n
        meansq = sumsq_c * inv_n
    else:
        stats = jnp.concatenate([sum_c, sumsq_c], axis=1)            # (C, 2)
        gstats = jnp.dot(gmat_ref[...], stats, preferred_element_type=jnp.float32)
        mean = gstats[:, 0:1]
        meansq = gstats[:, 1:2]
    # TODO(synk): single-pass E[y^2]-E[y]^2 (clamped); switch to a two-pass
    # variance on the resident f32 y if tolerances tighten.
    var = jnp.maximum(meansq - mean * mean, 0.0)
    inv = lax.rsqrt(var + eps)

    # ---- fused affine (gamma_eff/beta_eff already include per-sample scale/shift)
    a = inv * gamma_ref[0]                         # (C, 1)
    b = beta_ref[0] - mean * a
    yn = y * a + b

    # ---- SiLU + residual add (Residual.forward: fn(x) + x)
    out = yn * jax.nn.sigmoid(yn) + x_f32
    o_ref[0] = out.astype(o_ref.dtype)


def _vmem_capacity_bytes():
    try:
        info = pltpu.get_tpu_info()
        cap = getattr(info, "vmem_capacity_bytes", None)
        if cap:
            return int(cap)
    except Exception:
        pass
    return 64 * 1024 * 1024  # conservative fallback (v7x per-TC VMEM)


def residual_block_forward(x_ncdhw, weight_oidhw, bias, gamma, beta, groups,
                           scale=None, shift=None, eps=1e-5,
                           compute_dtype=jnp.float32):
    """x_ncdhw: (N, C, D, H, W). weight_oidhw: (C, C, 3, 3, 3) (PyTorch Conv3d layout)."""
    N, C, D, H, W = x_ncdhw.shape
    Cout, Cin = weight_oidhw.shape[:2]
    assert Cin == C and Cout == C, "Residual requires dim_out == dim"
    assert C % groups == 0
    assert C % 8 == 0       # TODO(synk): pad channels to a multiple of 8 otherwise
    cg = C // groups
    DHW = D * H * W
    assert DHW % 128 == 0   # TODO(synk): support lane-padded spatial sizes

    # lane-dense layout: NCDHW -> (N, C, DHW); spatial on lanes, channels on sublanes
    x_flat = x_ncdhw.reshape(N, C, DHW)

    # conv weight (O,I,kD,kH,kW) -> (3, C, 9*C): grouped by kd; K index within a
    # group is (kh_idx*3 + kw_idx)*C + cin, matching the kernel's patch-row layout.
    w_mat = jnp.transpose(weight_oidhw, (2, 0, 3, 4, 1)).reshape(3, C, 9 * C)
    w_mat = w_mat.astype(compute_dtype)

    # boundary masks for the 27 rolled taps (implements zero padding), stored in
    # compute_dtype so the staging path stays narrow (0/1 exact in bf16).
    dd, hh, ww = jnp.meshgrid(jnp.arange(D), jnp.arange(H), jnp.arange(W),
                              indexing="ij")
    rows = []
    for kd in (-1, 0, 1):
        for kh in (-1, 0, 1):
            for kw in (-1, 0, 1):
                m = ((dd + kd >= 0) & (dd + kd < D) &
                     (hh + kh >= 0) & (hh + kh < H) &
                     (ww + kw >= 0) & (ww + kw < W))
                rows.append(m.reshape(DHW))
    masks = jnp.stack(rows).astype(compute_dtype)            # (27, DHW)

    # group-average matrix (only used when channels_per_group > 1)
    gid = jnp.arange(C) // cg
    gmat = (gid[:, None] == gid[None, :]).astype(jnp.float32) / (cg * DHW)

    # fold per-sample scale/shift into the GroupNorm affine
    if scale is None:
        scale = jnp.zeros((N, C), jnp.float32)
        shift = jnp.zeros((N, C), jnp.float32)
    gamma_eff = (gamma[None, :] * (scale + 1.0)).reshape(N, C, 1)
    beta_eff = (beta[None, :] * (scale + 1.0) + shift).reshape(N, C, 1)
    bias_col = bias.reshape(C, 1).astype(jnp.float32)

    # ---- generation-aware VMEM budget + footprint guard -------------------
    isz = jnp.dtype(compute_dtype).itemsize
    xsz = x_flat.dtype.itemsize
    vmem_cap = _vmem_capacity_bytes()
    vmem_limit = int(max(32 * 1024 * 1024,
                         min(vmem_cap - 8 * 1024 * 1024, 110 * 1024 * 1024)))

    io_bytes = 2 * 2 * C * DHW * xsz            # x + out blocks, double-buffered
    patch_bytes = 9 * C * DHW * isz             # K-split im2col scratch
    yacc_bytes = C * DHW * 4                    # f32 conv accumulator scratch
    temp_bytes = 3 * C * DHW * 4                # staged x / rolled tap / f32 out temps
    inv_bytes = (w_mat.size * isz + masks.size * isz + C * C * 4 + C * 4)
    per_step = io_bytes + patch_bytes + yacc_bytes + temp_bytes + 2 * inv_bytes
    if per_step > vmem_limit:
        # TODO(synk): tile D with a 1-plane halo + two-pass GroupNorm for shapes this large
        raise NotImplementedError(
            f"per-sample footprint {per_step / 2**20:.1f} MiB exceeds VMEM budget "
            f"{vmem_limit / 2**20:.1f} MiB; needs D-tiling")

    cost = pl.CostEstimate(
        flops=2 * N * DHW * 27 * C * C + 12 * N * DHW * C,
        transcendentals=N * DHW * C,
        bytes_accessed=(2 * x_flat.size * xsz + w_mat.size * isz
                        + masks.size * isz + 2 * N * C * 4 + C * 4))

    def _run(single_buffer_invariants, narrow_stage):
        kernel = functools.partial(
            _residual_block_kernel, C=C, D=D, H=H, W=W, groups=groups, eps=eps,
            narrow_stage=narrow_stage)
        inv_kw = ({"pipeline_mode": pl.Buffered(1)}
                  if single_buffer_invariants else {})
        in_specs = [
            pl.BlockSpec((1, C, DHW), lambda n: (n, 0, 0)),              # x (lane-dense)
            pl.BlockSpec((3, C, 9 * C), lambda n: (0, 0, 0), **inv_kw),  # conv weight
            pl.BlockSpec((C, 1), lambda n: (0, 0), **inv_kw),            # conv bias
            pl.BlockSpec((1, C, 1), lambda n: (n, 0, 0)),                # gamma_eff
            pl.BlockSpec((1, C, 1), lambda n: (n, 0, 0)),                # beta_eff
            pl.BlockSpec((27, DHW), lambda n: (0, 0), **inv_kw),         # tap masks
            pl.BlockSpec((C, C), lambda n: (0, 0), **inv_kw),            # group-avg matrix
        ]
        return pl.pallas_call(
            kernel,
            out_shape=jax.ShapeDtypeStruct((N, C, DHW), x_ncdhw.dtype),
            grid_spec=pltpu.PrefetchScalarGridSpec(
                num_scalar_prefetch=0,
                grid=(N,),
                in_specs=in_specs,
                out_specs=pl.BlockSpec((1, C, DHW), lambda n: (n, 0, 0)),
                scratch_shapes=[pltpu.VMEM((9 * C, DHW), compute_dtype),
                                pltpu.VMEM((C, DHW), jnp.float32)]),
            compiler_params=pltpu.CompilerParams(
                dimension_semantics=("parallel",),
                vmem_limit_bytes=vmem_limit),
            cost_estimate=cost,
        )(x_flat, w_mat, bias_col, gamma_eff, beta_eff, masks, gmat)

    # Version-safe fallbacks: (Buffered(1), narrow bf16 staging) -> (default
    # buffering, narrow staging) -> known-good (default buffering, f32 staging).
    out_flat = None
    last_err = None
    for cfg in ((True, True), (False, True), (False, False)):
        try:
            out_flat = _run(*cfg)
            break
        except Exception as e:   # depends on jax/libtpu version
            last_err = e
    if out_flat is None:
        raise last_err

    return out_flat.reshape(N, C, D, H, W)


def residual_block_reference(x, weight, bias, gamma, beta, groups,
                             scale=None, shift=None, eps=1e-5):
    """Pure-JAX NCDHW reference: Conv3d + GroupNorm + scale_shift + SiLU + residual."""
    y = lax.conv_general_dilated(
        x, weight, window_strides=(1, 1, 1), padding="SAME",
        dimension_numbers=("NCDHW", "OIDHW", "NCDHW"))
    y = y + bias[None, :, None, None, None]
    N, C, D, H, W = y.shape
    cg = C // groups
    yg = y.reshape(N, groups, cg * D * H * W)
    mean = yg.mean(-1, keepdims=True)
    var = ((yg - mean) ** 2).mean(-1, keepdims=True)
    yn = ((yg - mean) / jnp.sqrt(var + eps)).reshape(N, C, D, H, W)
    yn = yn * gamma[None, :, None, None, None] + beta[None, :, None, None, None]
    if scale is not None:
        yn = yn * (scale[:, :, None, None, None] + 1.0) + shift[:, :, None, None, None]
    return yn * jax.nn.sigmoid(yn) + x


if __name__ == "__main__":
    def run_case(N, C, groups, D, H, W, compute_dtype, use_scale, rtol, atol, key):
        kx, kw, kb, kg, kbe, ks, ksh = jax.random.split(key, 7)
        x = jax.random.normal(kx, (N, C, D, H, W), jnp.float32)
        weight = jax.random.normal(kw, (C, C, 3, 3, 3), jnp.float32) * 0.1
        bias = jax.random.normal(kb, (C,), jnp.float32) * 0.1
        gamma = 1.0 + 0.1 * jax.random.normal(kg, (C,), jnp.float32)
        beta = 0.1 * jax.random.normal(kbe, (C,), jnp.float32)
        if use_scale:
            scale = 0.5 * jax.random.normal(ks, (N, C), jnp.float32)
            shift = 0.5 * jax.random.normal(ksh, (N, C), jnp.float32)
        else:
            scale = shift = None
        out = jax.block_until_ready(residual_block_forward(
            x, weight, bias, gamma, beta, groups, scale=scale, shift=shift,
            compute_dtype=compute_dtype))
        ref = residual_block_reference(x, weight, bias, gamma, beta, groups,
                                       scale=scale, shift=shift)
        assert out.shape == x.shape
        err = float(jnp.max(jnp.abs(out - ref)))
        assert jnp.allclose(out, ref, rtol=rtol, atol=atol), err

    # case 1: dim=8, groups=8 (cg=1 -> no group-matrix matmul), fp32 MXU, with scale/shift
    run_case(2, 8, 8, 8, 8, 8, jnp.float32, True, 1e-3, 1e-3, jax.random.PRNGKey(0))
    # case 2: same shapes, scale_shift=None path (folded affine -> no extra cost)
    run_case(2, 8, 8, 8, 8, 8, jnp.float32, False, 1e-3, 1e-3, jax.random.PRNGKey(1))
    # case 3: dim=16, groups=4 (cg=4 -> group-matrix path), bf16 MXU operands / fp32 acc
    run_case(2, 16, 4, 8, 8, 8, jnp.bfloat16, True, 3e-2, 8e-2, jax.random.PRNGKey(2))

    print("KERNEL_OK")
</pallas_src>

<mosaic_0001>
module attributes {stable_mosaic.version = 11 : i64} {
  func.func @_residual_block_kernel(%arg0: i32, %arg1: memref<1x8x512xf32, #tpu.memory_space<vmem>>, %arg2: memref<3x8x72xf32, #tpu.memory_space<vmem>>, %arg3: memref<8x1xf32, #tpu.memory_space<vmem>>, %arg4: memref<1x8x1xf32, #tpu.memory_space<vmem>>, %arg5: memref<1x8x1xf32, #tpu.memory_space<vmem>>, %arg6: memref<27x512xf32, #tpu.memory_space<vmem>>, %arg7: memref<8x8xf32, #tpu.memory_space<vmem>>, %arg8: memref<1x8x512xf32, #tpu.memory_space<vmem>>, %arg9: memref<72x512xf32, #tpu.memory_space<vmem>>, %arg10: memref<8x512xf32, #tpu.memory_space<vmem>>) attributes {dimension_semantics = [#tpu.dimension_semantics<parallel>], iteration_bounds = array<i64: 2>, scalar_prefetch = 0 : i64, scratch_operands = 2 : i64, tpu.core_type = #tpu.core_type<tc>, window_params = [{transform_indices = @transform_0, window_bounds = array<i64: 1, 8, 512>}, {pipeline_mode = #tpu.pipeline_mode<synchronous>, transform_indices = @transform_1, window_bounds = array<i64: 3, 8, 72>}, {pipeline_mode = #tpu.pipeline_mode<synchronous>, transform_indices = @transform_2, window_bounds = array<i64: 8, 1>}, {transform_indices = @transform_3, window_bounds = array<i64: 1, 8, 1>}, {transform_indices = @transform_4, window_bounds = array<i64: 1, 8, 1>}, {pipeline_mode = #tpu.pipeline_mode<synchronous>, transform_indices = @transform_5, window_bounds = array<i64: 27, 512>}, {pipeline_mode = #tpu.pipeline_mode<synchronous>, transform_indices = @transform_6, window_bounds = array<i64: 8, 8>}, {transform_indices = @transform_7, window_bounds = array<i64: 1, 8, 512>}]} {
    %c0 = arith.constant 0 : index
    %c0_0 = arith.constant 0 : index
    %c0_1 = arith.constant 0 : index
    %0 = vector.load %arg1[%c0, %c0_0, %c0_1] : memref<1x8x512xf32, #tpu.memory_space<vmem>>, vector<1x8x512xf32>
    %1 = vector.shape_cast %0 : vector<1x8x512xf32> to vector<8x512xf32>
    %c73_i32 = arith.constant 73 : i32
    %2 = tpu.dynamic_rotate %1 by %c73_i32 dim 1 : vector<8x512xf32>, i32 -> vector<8x512xf32>
    %c0_2 = arith.constant 0 : index
    %c0_3 = arith.constant 0 : index
    %3 = vector.load %arg6[%c0_2, %c0_3] : memref<27x512xf32, #tpu.memory_space<vmem>>, vector<1x512xf32>
    %4 = vector.broadcast %3 : vector<1x512xf32> to vector<8x512xf32>
    %5 = arith.mulf %2, %4 : vector<8x512xf32>
    %c0_4 = arith.constant 0 : index
    %c0_5 = arith.constant 0 : index
    %6 = vector.load %arg9[%c0_4, %c0_5] : memref<72x512xf32, #tpu.memory_space<vmem>>, vector<8x512xf32>
    tpu.vector_store %arg9[%c0_4, %c0_5], %5 {strides = array<i32>} : memref<72x512xf32, #tpu.memory_space<vmem>>, vector<8x512xf32>,
    %c72_i32 = arith.constant 72 : i32
    %7 = tpu.dynamic_rotate %1 by %c72_i32 dim 1 : vector<8x512xf32>, i32 -> vector<8x512xf32>
    %c1 = arith.constant 1 : index
    %c0_6 = arith.constant 0 : index
    %8 = vector.load %arg6[%c1, %c0_6] : memref<27x512xf32, #tpu.memory_space<vmem>>, vector<1x512xf32>
    %9 = vector.broadcast %8 : vector<1x512xf32> to vector<8x512xf32>
    %10 = arith.mulf %7, %9 : vector<8x512xf32>
    %c8 = arith.constant 8 : index
    %c0_7 = arith.constant 0 : index
    %11 = vector.load %arg9[%c8, %c0_7] : memref<72x512xf32, #tpu.memory_space<vmem>>, vector<8x512xf32>
    tpu.vector_store %arg9[%c8, %c0_7], %10 {strides = array<i32>} : memref<72x512xf32, #tpu.memory_space<vmem>>, vector<8x512xf32>,
    %c71_i32 = arith.constant 71 : i32
    %12 = tpu.dynamic_rotate %1 by %c71_i32 dim 1 : vector<8x512xf32>, i32 -> vector<8x512xf32>
    %c2 = arith.constant 2 : index
    %c0_8 = arith.constant 0 : index
    %13 = vector.load %arg6[%c2, %c0_8] : memref<27x512xf32, #tpu.memory_space<vmem>>, vector<1x512xf32>
    %14 = vector.broadcast %13 : vector<1x512xf32> to vector<8x512xf32>
    %15 = arith.mulf %12, %14 : vector<8x512xf32>
    %c16 = arith.constant 16 : index
    %c0_9 = arith.constant 0 : index
    %16 = vector.load %arg9[%c16, %c0_9] : memref<72x512xf32, #tpu.memory_space<vmem>>, vector<8x512xf32>
    tpu.vector_store %arg9[%c16, %c0_9], %15 {strides = array<i32>} : memref<72x512xf32, #tpu.memory_space<vmem>>, vector<8x512xf32>,
    %c65_i32 = arith.constant 65 : i32
    %17 = tpu.dynamic_rotate %1 by %c65_i32 dim 1 : vector<8x512xf32>, i32 -> vector<8x512xf32>
    %c3 = arith.constant 3 : index
    %c0_10 = arith.constant 0 : index
    %18 = vector.load %arg6[%c3, %c0_10] : memref<27x512xf32, #tpu.memory_space<vmem>>, vector<1x512xf32>
    %19 = vector.broadcast %18 : vector<1x512xf32> to vector<8x512xf32>
    %20 = arith.mulf %17, %19 : vector<8x512xf32>
    %c24 = arith.constant 24 : index
    %c0_11 = arith.constant 0 : index
    %21 = vector.load %arg9[%c24, %c0_11] : memref<72x512xf32, #tpu.memory_space<vmem>>, vector<8x512xf32>
    tpu.vector_store %arg9[%c24, %c0_11], %20 {strides = array<i32>} : memref<72x512xf32, #tpu.memory_space<vmem>>, vector<8x512xf32>,
    %c64_i32 = arith.constant 64 : i32
    %22 = tpu.dynamic_rotate %1 by %c64_i32 dim 1 : vector<8x512xf32>, i32 -> vector<8x512xf32>
    %c4 = arith.constant 4 : index
    %c0_12 = arith.constant 0 : index
    %23 = vector.load %arg6[%c4, %c0_12] : memref<27x512xf32, #tpu.memory_space<vmem>>, vector<1x512xf32>
    %24 = vector.broadcast %23 : vector<1x512xf32> to vector<8x512xf32>
    %25 = arith.mulf %22, %24 : vector<8x512xf32>
    %c32 = arith.constant 32 : index
    %c0_13 = arith.constant 0 : index
    %26 = vector.load %arg9[%c32, %c0_13] : memref<72x512xf32, #tpu.memory_space<vmem>>, vector<8x512xf32>
    tpu.vector_store %arg9[%c32, %c0_13], %25 {strides = array<i32>} : memref<72x512xf32, #tpu.memory_space<vmem>>, vector<8x512xf32>,
    %c63_i32 = arith.constant 63 : i32
    %27 = tpu.dynamic_rotate %1 by %c63_i32 dim 1 : vector<8x512xf32>, i32 -> vector<8x512xf32>
    %c5 = arith.constant 5 : index
    %c0_14 = arith.constant 0 : index
    %28 = vector.load %arg6[%c5, %c0_14] : memref<27x512xf32, #tpu.memory_space<vmem>>, vector<1x512xf32>
    %29 = vector.broadcast %28 : vector<1x512xf32> to vector<8x512xf32>
    %30 = arith.mulf %27, %29 : vector<8x512xf32>
    %c40 = arith.constant 40 : index
    %c0_15 = arith.constant 0 : index
    %31 = vector.load %arg9[%c40, %c0_15] : memref<72x512xf32, #tpu.memory_space<vmem>>, vector<8x512xf32>
    tpu.vector_store %arg9[%c40, %c0_15], %30 {strides = array<i32>} : memref<72x512xf32, #tpu.memory_space<vmem>>, vector<8x512xf32>,
    %c57_i32 = arith.constant 57 : i32
    %32 = tpu.dynamic_rotate %1 by %c57_i32 dim 1 : vector<8x512xf32>, i32 -> vector<8x512xf32>
    %c6 = arith.constant 6 : index
    %c0_16 = arith.constant 0 : index
    %33 = vector.load %arg6[%c6, %c0_16] : memref<27x512xf32, #tpu.memory_space<vmem>>, vector<1x512xf32>
    %34 = vector.broadcast %33 : vector<1x512xf32> to vector<8x512xf32>
    %35 = arith.mulf %32, %34 : vector<8x512xf32>
    %c48 = arith.constant 48 : index
    %c0_17 = arith.constant 0 : index
    %36 = vector.load %arg9[%c48, %c0_17] : memref<72x512xf32, #tpu.memory_space<vmem>>, vector<8x512xf32>
    tpu.vector_store %arg9[%c48, %c0_17], %35 {strides = array<i32>} : memref<72x512xf32, #tpu.memory_space<vmem>>, vector<8x512xf32>,
    %c56_i32 = arith.constant 56 : i32
    %37 = tpu.dynamic_rotate %1 by %c56_i32 dim 1 : vector<8x512xf32>, i32 -> vector<8x512xf32>
    %c7 = arith.constant 7 : index
    %c0_18 = arith.constant 0 : index
    %38 = vector.load %arg6[%c7, %c0_18] : memref<27x512xf32, #tpu.memory_space<vmem>>, vector<1x512xf32>
    %39 = vector.broadcast %38 : vector<1x512xf32> to vector<8x512xf32>
    %40 = arith.mulf %37, %39 : vector<8x512xf32>
    %c56 = arith.constant 56 : index
    %c0_19 = arith.constant 0 : index
    %41 = vector.load %arg9[%c56, %c0_19] : memref<72x512xf32, #tpu.memory_space<vmem>>, vector<8x512xf32>
    tpu.vector_store %arg9[%c56, %c0_19], %40 {strides = array<i32>} : memref<72x512xf32, #tpu.memory_space<vmem>>, vector<8x512xf32>,
    %c55_i32 = arith.constant 55 : i32
    %42 = tpu.dynamic_rotate %1 by %c55_i32 dim 1 : vector<8x512xf32>, i32 -> vector<8x512xf32>
    %c8_20 = arith.constant 8 : index
    %c0_21 = arith.constant 0 : index
    %43 = vector.load %arg6[%c8_20, %c0_21] : memref<27x512xf32, #tpu.memory_space<vmem>>, vector<1x512xf32>
    %44 = vector.broadcast %43 : vector<1x512xf32> to vector<8x512xf32>
    %45 = arith.mulf %42, %44 : vector<8x512xf32>
    %c64 = arith.constant 64 : index
    %c0_22 = arith.constant 0 : index
    %46 = vector.load %arg9[%c64, %c0_22] : memref<72x512xf32, #tpu.memory_space<vmem>>, vector<8x512xf32>
    tpu.vector_store %arg9[%c64, %c0_22], %45 {strides = array<i32>} : memref<72x512xf32, #tpu.memory_space<vmem>>, vector<8x512xf32>,
    %c0_23 = arith.constant 0 : index
    %c0_24 = arith.constant 0 : index
    %c0_25 = arith.constant 0 : index
    %47 = vector.load %arg2[%c0_23, %c0_24, %c0_25] : memref<3x8x72xf32, #tpu.memory_space<vmem>>, vector<1x8x72xf32>
    %48 = vector.shape_cast %47 : vector<1x8x72xf32> to vector<8x72xf32>
    %c0_26 = arith.constant 0 : index
    %c0_27 = arith.constant 0 : index
    %49 = vector.load %arg9[%c0_26, %c0_27] : memref<72x512xf32, #tpu.memory_space<vmem>>, vector<72x512xf32>
    %cst = arith.constant dense<0.000000e+00> : vector<8x512xf32>
    %50 = tpu.matmul %48, %49, %cst {dimension_numbers = #tpu.dot_dimension_numbers<[1], [0], [0], [1], [0, 0, 1, 1], [], []>} : vector<8x72xf32>, vector<72x512xf32>, vector<8x512xf32> -> vector<8x512xf32>
    %c0_28 = arith.constant 0 : index
    %c0_29 = arith.constant 0 : index
    %51 = vector.load %arg10[%c0_28, %c0_29] : memref<8x512xf32, #tpu.memory_space<vmem>>, vector<8x512xf32>
    tpu.vector_store %arg10[%c0_28, %c0_29], %50 {strides = array<i32>} : memref<8x512xf32, #tpu.memory_space<vmem>>, vector<8x512xf32>,
    %c9_i32 = arith.constant 9 : i32
    %52 = tpu.dynamic_rotate %1 by %c9_i32 dim 1 : vector<8x512xf32>, i32 -> vector<8x512xf32>
    %c9 = arith.constant 9 : index
    %c0_30 = arith.constant 0 : index
    %53 = vector.load %arg6[%c9, %c0_30] : memref<27x512xf32, #tpu.memory_space<vmem>>, vector<1x512xf32>
    %54 = vector.broadcast %53 : vector<1x512xf32> to vector<8x512xf32>
    %55 = arith.mulf %52, %54 : vector<8x512xf32>
    %c0_31 = arith.constant 0 : index
    %c0_32 = arith.constant 0 : index
    %56 = vector.load %arg9[%c0_31, %c0_32] : memref<72x512xf32, #tpu.memory_space<vmem>>, vector<8x512xf32>
    tpu.vector_store %arg9[%c0_31, %c0_32], %55 {strides = array<i32>} : memref<72x512xf32, #tpu.memory_space<vmem>>, vector<8x512xf32>,
    %c8_i32 = arith.constant 8 : i32
    %57 = tpu.dynamic_rotate %1 by %c8_i32 dim 1 : vector<8x512xf32>, i32 -> vector<8x512xf32>
    %c10 = arith.constant 10 : index
    %c0_33 = arith.constant 0 : index
    %58 = vector.load %arg6[%c10, %c0_33] : memref<27x512xf32, #tpu.memory_space<vmem>>, vector<1x512xf32>
    %59 = vector.broadcast %58 : vector<1x512xf32> to vector<8x512xf32>
    %60 = arith.mulf %57, %59 : vector<8x512xf32>
    %c8_34 = arith.constant 8 : index
    %c0_35 = arith.constant 0 : index
    %61 = vector.load %arg9[%c8_34, %c0_35] : memref<72x512xf32, #tpu.memory_space<vmem>>, vector<8x512xf32>
    tpu.vector_store %arg9[%c8_34, %c0_35], %60 {strides = array<i32>} : memref<72x512xf32, #tpu.memory_space<vmem>>, vector<8x512xf32>,
    %c7_i32 = arith.constant 7 : i32
    %62 = tpu.dynamic_rotate %1 by %c7_i32 dim 1 : vector<8x512xf32>, i32 -> vector<8x512xf32>
    %c11 = arith.constant 11 : index
    %c0_36 = arith.constant 0 : index
    %63 = vector.load %arg6[%c11, %c0_36] : memref<27x512xf32, #tpu.memory_space<vmem>>, vector<1x512xf32>
    %64 = vector.broadcast %63 : vector<1x512xf32> to vector<8x512xf32>
    %65 = arith.mulf %62, %64 : vector<8x512xf32>
    %c16_37 = arith.constant 16 : index
    %c0_38 = arith.constant 0 : index
    %66 = vector.load %arg9[%c16_37, %c0_38] : memref<72x512xf32, #tpu.memory_space<vmem>>, vector<8x512xf32>
    tpu.vector_store %arg9[%c16_37, %c0_38], %65 {strides = array<i32>} : memref<72x512xf32, #tpu.memory_space<vmem>>, vector<8x512xf32>,
    %c1_i32 = arith.constant 1 : i32
    %67 = tpu.dynamic_rotate %1 by %c1_i32 dim 1 : vector<8x512xf32>, i32 -> vector<8x512xf32>
    %c12 = arith.constant 12 : index
    %c0_39 = arith.constant 0 : index
    %68 = vector.load %arg6[%c12, %c0_39] : memref<27x512xf32, #tpu.memory_space<vmem>>, vector<1x512xf32>
    %69 = vector.broadcast %68 : vector<1x512xf32> to vector<8x512xf32>
    %70 = arith.mulf %67, %69 : vector<8x512xf32>
    %c24_40 = arith.constant 24 : index
    %c0_41 = arith.constant 0 : index
    %71 = vector.load %arg9[%c24_40, %c0_41] : memref<72x512xf32, #tpu.memory_space<vmem>>, vector<8x512xf32>
    tpu.vector_store %arg9[%c24_40, %c0_41], %70 {strides = array<i32>} : memref<72x512xf32, #tpu.memory_space<vmem>>, vector<8x512xf32>,
    %c13 = arith.constant 13 : index
    %c0_42 = arith.constant 0 : index
    %72 = vector.load %arg6[%c13, %c0_42] : memref<27x512xf32, #tpu.memory_space<vmem>>, vector<1x512xf32>
    %73 = vector.broadcast %72 : vector<1x512xf32> to vector<8x512xf32>
    %74 = arith.mulf %1, %73 : vector<8x512xf32>
    %c32_43 = arith.constant 32 : index
    %c0_44 = arith.constant 0 : index
    %75 = vector.load %arg9[%c32_43, %c0_44] : memref<72x512xf32, #tpu.memory_space<vmem>>, vector<8x512xf32>
    tpu.vector_store %arg9[%c32_43, %c0_44], %74 {strides = array<i32>} : memref<72x512xf32, #tpu.memory_space<vmem>>, vector<8x512xf32>,
    %c511_i32 = arith.constant 511 : i32
    %76 = tpu.dynamic_rotate %1 by %c511_i32 dim 1 : vector<8x512xf32>, i32 -> vector<8x512xf32>
    %c14 = arith.constant 14 : index
    %c0_45 = arith.constant 0 : index
    %77 = vector.load %arg6[%c14, %c0_45] : memref<27x512xf32, #tpu.memory_space<vmem>>, vector<1x512xf32>
    %78 = vector.broadcast %77 : vector<1x512xf32> to vector<8x512xf32>
    %79 = arith.mulf %76, %78 : vector<8x512xf32>
    %c40_46 = arith.constant 40 : index
    %c0_47 = arith.constant 0 : index
    %80 = vector.load %arg9[%c40_46, %c0_47] : memref<72x512xf32, #tpu.memory_space<vmem>>, vector<8x512xf32>
    tpu.vector_store %arg9[%c40_46, %c0_47], %79 {strides = array<i32>} : memref<72x512xf32, #tpu.memory_space<vmem>>, vector<8x512xf32>,
    %c505_i32 = arith.constant 505 : i32
    %81 = tpu.dynamic_rotate %1 by %c505_i32 dim 1 : vector<8x512xf32>, i32 -> vector<8x512xf32>
    %c15 = arith.constant 15 : index
    %c0_48 = arith.constant 0 : index
    %82 = vector.load %arg6[%c15, %c0_48] : memref<27x512xf32, #tpu.memory_space<vmem>>, vector<1x512xf32>
    %83 = vector.broadcast %82 : vector<1x512xf32> to vector<8x512xf32>
    %84 = arith.mulf %81, %83 : vector<8x512xf32>
    %c48_49 = arith.constant 48 : index
    %c0_50 = arith.constant 0 : index
    %85 = vector.load %arg9[%c48_49, %c0_50] : memref<72x512xf32, #tpu.memory_space<vmem>>, vector<8x512xf32>
    tpu.vector_store %arg9[%c48_49, %c0_50], %84 {strides = array<i32>} : memref<72x512xf32, #tpu.memory_space<vmem>>, vector<8x512xf32>,
    %c504_i32 = arith.constant 504 : i32
    %86 = tpu.dynamic_rotate %1 by %c504_i32 dim 1 : vector<8x512xf32>, i32 -> vector<8x512xf32>
    %c16_51 = arith.constant 16 : index
    %c0_52 = arith.constant 0 : index
    %87 = vector.load %arg6[%c16_51, %c0_52] : memref<27x512xf32, #tpu.memory_space<vmem>>, vector<1x512xf32>
    %88 = vector.broadcast %87 : vector<1x512xf32> to vector<8x512xf32>
    %89 = arith.mulf %86, %88 : vector<8x512xf32>
    %c56_53 = arith.constant 56 : index
    %c0_54 = arith.constant 0 : index
    %90 = vector.load %arg9[%c56_53, %c0_54] : memref<72x512xf32, #tpu.memory_space<vmem>>, vector<8x512xf32>
    tpu.vector_store %arg9[%c56_53, %c0_54], %89 {strides = array<i32>} : memref<72x512xf32, #tpu.memory_space<vmem>>, vector<8x512xf32>,
    %c503_i32 = arith.constant 503 : i32
    %91 = tpu.dynamic_rotate %1 by %c503_i32 dim 1 : vector<8x512xf32>, i32 -> vector<8x512xf32>
    %c17 = arith.constant 17 : index
    %c0_55 = arith.constant 0 : index
    %92 = vector.load %arg6[%c17, %c0_55] : memref<27x512xf32, #tpu.memory_space<vmem>>, vector<1x512xf32>
    %93 = vector.broadcast %92 : vector<1x512xf32> to vector<8x512xf32>
    %94 = arith.mulf %91, %93 : vector<8x512xf32>
    %c64_56 = arith.constant 64 : index
    %c0_57 = arith.constant 0 : index
    %95 = vector.load %arg9[%c64_56, %c0_57] : memref<72x512xf32, #tpu.memory_space<vmem>>, vector<8x512xf32>
    tpu.vector_store %arg9[%c64_56, %c0_57], %94 {strides = array<i32>} : memref<72x512xf32, #tpu.memory_space<vmem>>, vector<8x512xf32>,
    %c1_58 = arith.constant 1 : index
    %c0_59 = arith.constant 0 : index
    %c0_60 = arith.constant 0 : index
    %96 = vector.load %arg2[%c1_58, %c0_59, %c0_60] : memref<3x8x72xf32, #tpu.memory_space<vmem>>, vector<1x8x72xf32>
    %97 = vector.shape_cast %96 : vector<1x8x72xf32> to vector<8x72xf32>
    %c0_61 = arith.constant 0 : index
    %c0_62 = arith.constant 0 : index
    %98 = vector.load %arg9[%c0_61, %c0_62] : memref<72x512xf32, #tpu.memory_space<vmem>>, vector<72x512xf32>
    %cst_63 = arith.constant dense<0.000000e+00> : vector<8x512xf32>
    %99 = tpu.matmul %97, %98, %cst_63 {dimension_numbers = #tpu.dot_dimension_numbers<[1], [0], [0], [1], [0, 0, 1, 1], [], []>} : vector<8x72xf32>, vector<72x512xf32>, vector<8x512xf32> -> vector<8x512xf32>
    %c0_64 = arith.constant 0 : index
    %c0_65 = arith.constant 0 : index
    %100 = vector.load %arg10[%c0_64, %c0_65] : memref<8x512xf32, #tpu.memory_space<vmem>>, vector<8x512xf32>
    %101 = arith.addf %100, %99 : vector<8x512xf32>
    %c0_66 = arith.constant 0 : index
    %c0_67 = arith.constant 0 : index
    %102 = vector.load %arg10[%c0_66, %c0_67] : memref<8x512xf32, #tpu.memory_space<vmem>>, vector<8x512xf32>
    tpu.vector_store %arg10[%c0_66, %c0_67], %101 {strides = array<i32>} : memref<8x512xf32, #tpu.memory_space<vmem>>, vector<8x512xf32>,
    %c457_i32 = arith.constant 457 : i32
    %103 = tpu.dynamic_rotate %1 by %c457_i32 dim 1 : vector<8x512xf32>, i32 -> vector<8x512xf32>
    %c18 = arith.constant 18 : index
    %c0_68 = arith.constant 0 : index
    %104 = vector.load %arg6[%c18, %c0_68] : memref<27x512xf32, #tpu.memory_space<vmem>>, vector<1x512xf32>
    %105 = vector.broadcast %104 : vector<1x512xf32> to vector<8x512xf32>
    %106 = arith.mulf %103, %105 : vector<8x512xf32>
    %c0_69 = arith.constant 0 : index
    %c0_70 = arith.constant 0 : index
    %107 = vector.load %arg9[%c0_69, %c0_70] : memref<72x512xf32, #tpu.memory_space<vmem>>, vector<8x512xf32>
    tpu.vector_store %arg9[%c0_69, %c0_70], %106 {strides = array<i32>} : memref<72x512xf32, #tpu.memory_space<vmem>>, vector<8x512xf32>,
    %c456_i32 = arith.constant 456 : i32
    %108 = tpu.dynamic_rotate %1 by %c456_i32 dim 1 : vector<8x512xf32>, i32 -> vector<8x512xf32>
    %c19 = arith.constant 19 : index
    %c0_71 = arith.constant 0 : index
    %109 = vector.load %arg6[%c19, %c0_71] : memref<27x512xf32, #tpu.memory_space<vmem>>, vector<1x512xf32>
    %110 = vector.broadcast %109 : vector<1x512xf32> to vector<8x512xf32>
    %111 = arith.mulf %108, %110 : vector<8x512xf32>
    %c8_72 = arith.constant 8 : index
    %c0_73 = arith.constant 0 : index
    %112 = vector.load %arg9[%c8_72, %c0_73] : memref<72x512xf32, #tpu.memory_space<vmem>>, vector<8x512xf32>
    tpu.vector_store %arg9[%c8_72, %c0_73], %111 {strides = array<i32>} : memref<72x512xf32, #tpu.memory_space<vmem>>, vector<8x512xf32>,
    %c455_i32 = arith.constant 455 : i32
    %113 = tpu.dynamic_rotate %1 by %c455_i32 dim 1 : vector<8x512xf32>, i32 -> vector<8x512xf32>
    %c20 = arith.constant 20 : index
    %c0_74 = arith.constant 0 : index
    %114 = vector.load %arg6[%c20, %c0_74] : memref<27x512xf32, #tpu.memory_space<vmem>>, vector<1x512xf32>
    %115 = vector.broadcast %114 : vector<1x512xf32> to vector<8x512xf32>
    %116 = arith.mulf %113, %115 : vector<8x512xf32>
    %c16_75 = arith.constant 16 : index
    %c0_76 = arith.constant 0 : index
    %117 = vector.load %arg9[%c16_75, %c0_76] : memref<72x512xf32, #tpu.memory_space<vmem>>, vector<8x512xf32>
    tpu.vector_store %arg9[%c16_75, %c0_76], %116 {strides = array<i32>} : memref<72x512xf32, #tpu.memory_space<vmem>>, vector<8x512xf32>,
    %c449_i32 = arith.constant 449 : i32
    %118 = tpu.dynamic_rotate %1 by %c449_i32 dim 1 : vector<8x512xf32>, i32 -> vector<8x512xf32>
    %c21 = arith.constant 21 : index
    %c0_77 = arith.constant 0 : index
    %119 = vector.load %arg6[%c21, %c0_77] : memref<27x512xf32, #tpu.memory_space<vmem>>, vector<1x512xf32>
    %120 = vector.broadcast %119 : vector<1x512xf32> to vector<8x512xf32>
    %121 = arith.mulf %118, %120 : vector<8x512xf32>
    %c24_78 = arith.constant 24 : index
    %c0_79 = arith.constant 0 : index
    %122 = vector.load %arg9[%c24_78, %c0_79] : memref<72x512xf32, #tpu.memory_space<vmem>>, vector<8x512xf32>
    tpu.vector_store %arg9[%c24_78, %c0_79], %121 {strides = array<i32>} : memref<72x512xf32, #tpu.memory_space<vmem>>, vector<8x512xf32>,
    %c448_i32 = arith.constant 448 : i32
    %123 = tpu.dynamic_rotate %1 by %c448_i32 dim 1 : vector<8x512xf32>, i32 -> vector<8x512xf32>
    %c22 = arith.constant 22 : index
    %c0_80 = arith.constant 0 : index
    %124 = vector.load %arg6[%c22, %c0_80] : memref<27x512xf32, #tpu.memory_space<vmem>>, vector<1x512xf32>
    %125 = vector.broadcast %124 : vector<1x512xf32> to vector<8x512xf32>
    %126 = arith.mulf %123, %125 : vector<8x512xf32>
    %c32_81 = arith.constant 32 : index
    %c0_82 = arith.constant 0 : index
    %127 = vector.load %arg9[%c32_81, %c0_82] : memref<72x512xf32, #tpu.memory_space<vmem>>, vector<8x512xf32>
    tpu.vector_store %arg9[%c32_81, %c0_82], %126 {strides = array<i32>} : memref<72x512xf32, #tpu.memory_space<vmem>>, vector<8x512xf32>,
    %c447_i32 = arith.constant 447 : i32
    %128 = tpu.dynamic_rotate %1 by %c447_i32 dim 1 : vector<8x512xf32>, i32 -> vector<8x512xf32>
    %c23 = arith.constant 23 : index
    %c0_83 = arith.constant 0 : index
    %129 = vector.load %arg6[%c23, %c0_83] : memref<27x512xf32, #tpu.memory_space<vmem>>, vector<1x512xf32>
    %130 = vector.broadcast %129 : vector<1x512xf32> to vector<8x512xf32>
    %131 = arith.mulf %128, %130 : vector<8x512xf32>
    %c40_84 = arith.constant 40 : index
    %c0_85 = arith.constant 0 : index
    %132 = vector.load %arg9[%c40_84, %c0_85] : memref<72x512xf32, #tpu.memory_space<vmem>>, vector<8x512xf32>
    tpu.vector_store %arg9[%c40_84, %c0_85], %131 {strides = array<i32>} : memref<72x512xf32, #tpu.memory_space<vmem>>, vector<8x512xf32>,
    %c441_i32 = arith.constant 441 : i32
    %133 = tpu.dynamic_rotate %1 by %c441_i32 dim 1 : vector<8x512xf32>, i32 -> vector<8x512xf32>
    %c24_86 = arith.constant 24 : index
    %c0_87 = arith.constant 0 : index
    %134 = vector.load %arg6[%c24_86, %c0_87] : memref<27x512xf32, #tpu.memory_space<vmem>>, vector<1x512xf32>
    %135 = vector.broadcast %134 : vector<1x512xf32> to vector<8x512xf32>
    %136 = arith.mulf %133, %135 : vector<8x512xf32>
    %c48_88 = arith.constant 48 : index
    %c0_89 = arith.constant 0 : index
    %137 = vector.load %arg9[%c48_88, %c0_89] : memref<72x512xf32, #tpu.memory_space<vmem>>, vector<8x512xf32>
    tpu.vector_store %arg9[%c48_88, %c0_89], %136 {strides = array<i32>} : memref<72x512xf32, #tpu.memory_space<vmem>>, vector<8x512xf32>,
    %c440_i32 = arith.constant 440 : i32
    %138 = tpu.dynamic_rotate %1 by %c440_i32 dim 1 : vector<8x512xf32>, i32 -> vector<8x512xf32>
    %c25 = arith.constant 25 : index
    %c0_90 = arith.constant 0 : index
    %139 = vector.load %arg6[%c25, %c0_90] : memref<27x512xf32, #tpu.memory_space<vmem>>, vector<1x512xf32>
    %140 = vector.broadcast %139 : vector<1x512xf32> to vector<8x512xf32>
    %141 = arith.mulf %138, %140 : vector<8x512xf32>
    %c56_91 = arith.constant 56 : index
    %c0_92 = arith.constant 0 : index
    %142 = vector.load %arg9[%c56_91, %c0_92] : memref<72x512xf32, #tpu.memory_space<vmem>>, vector<8x512xf32>
    tpu.vector_store %arg9[%c56_91, %c0_92], %141 {strides = array<i32>} : memref<72x512xf32, #tpu.memory_space<vmem>>, vector<8x512xf32>,
    %c439_i32 = arith.constant 439 : i32
    %143 = tpu.dynamic_rotate %1 by %c439_i32 dim 1 : vector<8x512xf32>, i32 -> vector<8x512xf32>
    %c26 = arith.constant 26 : index
    %c0_93 = arith.constant 0 : index
    %144 = vector.load %arg6[%c26, %c0_93] : memref<27x512xf32, #tpu.memory_space<vmem>>, vector<1x512xf32>
    %145 = vector.broadcast %144 : vector<1x512xf32> to vector<8x512xf32>
    %146 = arith.mulf %143, %145 : vector<8x512xf32>
    %c64_94 = arith.constant 64 : index
    %c0_95 = arith.constant 0 : index
    %147 = vector.load %arg9[%c64_94, %c0_95] : memref<72x512xf32, #tpu.memory_space<vmem>>, vector<8x512xf32>
    tpu.vector_store %arg9[%c64_94, %c0_95], %146 {strides = array<i32>} : memref<72x512xf32, #tpu.memory_space<vmem>>, vector<8x512xf32>,
    %c2_96 = arith.constant 2 : index
    %c0_97 = arith.constant 0 : index
    %c0_98 = arith.constant 0 : index
    %148 = vector.load %arg2[%c2_96, %c0_97, %c0_98] : memref<3x8x72xf32, #tpu.memory_space<vmem>>, vector<1x8x72xf32>
    %149 = vector.shape_cast %148 : vector<1x8x72xf32> to vector<8x72xf32>
    %c0_99 = arith.constant 0 : index
    %c0_100 = arith.constant 0 : index
    %150 = vector.load %arg9[%c0_99, %c0_100] : memref<72x512xf32, #tpu.memory_space<vmem>>, vector<72x512xf32>
    %cst_101 = arith.constant dense<0.000000e+00> : vector<8x512xf32>
    %151 = tpu.matmul %149, %150, %cst_101 {dimension_numbers = #tpu.dot_dimension_numbers<[1], [0], [0], [1], [0, 0, 1, 1], [], []>} : vector<8x72xf32>, vector<72x512xf32>, vector<8x512xf32> -> vector<8x512xf32>
    %c0_102 = arith.constant 0 : index
    %c0_103 = arith.constant 0 : index
    %152 = vector.load %arg10[%c0_102, %c0_103] : memref<8x512xf32, #tpu.memory_space<vmem>>, vector<8x512xf32>
    %153 = arith.addf %152, %151 : vector<8x512xf32>
    %c0_104 = arith.constant 0 : index
    %c0_105 = arith.constant 0 : index
    %154 = vector.load %arg10[%c0_104, %c0_105] : memref<8x512xf32, #tpu.memory_space<vmem>>, vector<8x512xf32>
    tpu.vector_store %arg10[%c0_104, %c0_105], %153 {strides = array<i32>} : memref<8x512xf32, #tpu.memory_space<vmem>>, vector<8x512xf32>,
    %c0_106 = arith.constant 0 : index
    %c0_107 = arith.constant 0 : index
    %155 = vector.load %arg10[%c0_106, %c0_107] : memref<8x512xf32, #tpu.memory_space<vmem>>, vector<8x512xf32>
    %c0_108 = arith.constant 0 : index
    %c0_109 = arith.constant 0 : index
    %156 = vector.load %arg3[%c0_108, %c0_109] : memref<8x1xf32, #tpu.memory_space<vmem>>, vector<8x1xf32>
    %157 = vector.broadcast %156 : vector<8x1xf32> to vector<8x512xf32>
    %158 = arith.addf %155, %157 : vector<8x512xf32>
    %cst_110 = arith.constant dense<0.000000e+00> : vector<8xf32>
    %159 = vector.multi_reduction <add>, %158, %cst_110 [1] : vector<8x512xf32> to vector<8xf32>
    %160 = vector.shape_cast %159 : vector<8xf32> to vector<8x1xf32>
    %161 = arith.mulf %158, %158 : vector<8x512xf32>
    %cst_111 = arith.constant dense<0.000000e+00> : vector<8xf32>
    %162 = vector.multi_reduction <add>, %161, %cst_111 [1] : vector<8x512xf32> to vector<8xf32>
    %163 = vector.shape_cast %162 : vector<8xf32> to vector<8x1xf32>
    %cst_112 = arith.constant 0.001953125 : f32
    %164 = vector.broadcast %cst_112 : f32 to vector<8x1xf32>
    %165 = arith.mulf %160, %164 : vector<8x1xf32>
    %cst_113 = arith.constant 0.001953125 : f32
    %166 = vector.broadcast %cst_113 : f32 to vector<8x1xf32>
    %167 = arith.mulf %163, %166 : vector<8x1xf32>
    %168 = arith.mulf %165, %165 : vector<8x1xf32>
    %169 = arith.subf %167, %168 : vector<8x1xf32>
    %cst_114 = arith.constant 0.000000e+00 : f32
    %170 = vector.broadcast %cst_114 : f32 to vector<8x1xf32>
    %171 = arith.maximumf %169, %170 : vector<8x1xf32>
    %cst_115 = arith.constant 9.99999974E-6 : f32
    %172 = vector.broadcast %cst_115 : f32 to vector<8x1xf32>
    %173 = arith.addf %171, %172 : vector<8x1xf32>
    %174 = math.rsqrt %173 : vector<8x1xf32>
    %c0_116 = arith.constant 0 : index
    %c0_117 = arith.constant 0 : index
    %c0_118 = arith.constant 0 : index
    %175 = vector.load %arg4[%c0_116, %c0_117, %c0_118] : memref<1x8x1xf32, #tpu.memory_space<vmem>>, vector<1x8x1xf32>
    %176 = vector.shape_cast %175 : vector<1x8x1xf32> to vector<8x1xf32>
    %177 = arith.mulf %174, %176 : vector<8x1xf32>
    %c0_119 = arith.constant 0 : index
    %c0_120 = arith.constant 0 : index
    %c0_121 = arith.constant 0 : index
    %178 = vector.load %arg5[%c0_119, %c0_120, %c0_121] : memref<1x8x1xf32, #tpu.memory_space<vmem>>, vector<1x8x1xf32>
    %179 = vector.shape_cast %178 : vector<1x8x1xf32> to vector<8x1xf32>
    %180 = arith.mulf %165, %177 : vector<8x1xf32>
    %181 = arith.subf %179, %180 : vector<8x1xf32>
    %182 = vector.broadcast %177 : vector<8x1xf32> to vector<8x512xf32>
    %183 = arith.mulf %158, %182 : vector<8x512xf32>
    %184 = vector.broadcast %181 : vector<8x1xf32> to vector<8x512xf32>
    %185 = arith.addf %183, %184 : vector<8x512xf32>
    %186 = arith.negf %185 : vector<8x512xf32>
    %187 = math.exp %186 : vector<8x512xf32>
    %cst_122 = arith.constant 1.000000e+00 : f32
    %188 = vector.broadcast %cst_122 : f32 to vector<8x512xf32>
    %189 = arith.addf %188, %187 : vector<8x512xf32>
    %190 = arith.divf %188, %189 : vector<8x512xf32>
    %191 = arith.mulf %185, %190 : vector<8x512xf32>
    %192 = arith.addf %191, %1 : vector<8x512xf32>
    %c0_123 = arith.constant 0 : index
    %c0_124 = arith.constant 0 : index
    %c0_125 = arith.constant 0 : index
    %193 = vector.load %arg8[%c0_123, %c0_124, %c0_125] : memref<1x8x512xf32, #tpu.memory_space<vmem>>, vector<1x8x512xf32>
    %194 = vector.shape_cast %193 : vector<1x8x512xf32> to vector<8x512xf32>
    %195 = vector.shape_cast %192 : vector<8x512xf32> to vector<1x8x512xf32>
    tpu.vector_store %arg8[%c0_123, %c0_124, %c0_125], %195 {strides = array<i32>} : memref<1x8x512xf32, #tpu.memory_space<vmem>>, vector<1x8x512xf32>,
    return
  }
  func.func @transform_0(%arg0: i32) -> (i32, i32, i32) {
    %c0_i32 = arith.constant 0 : i32
    %c0_i32_0 = arith.constant 0 : i32
    %c0_i32_1 = arith.constant 0 : i32
    return %arg0, %c0_i32, %c0_i32_0 : i32, i32, i32
  }
  func.func @transform_1(%arg0: i32) -> (i32, i32, i32) {
    %c0_i32 = arith.constant 0 : i32
    %c0_i32_0 = arith.constant 0 : i32
    %c0_i32_1 = arith.constant 0 : i32
    %c0_i32_2 = arith.constant 0 : i32
    return %c0_i32, %c0_i32_0, %c0_i32_1 : i32, i32, i32
  }
  func.func @transform_2(%arg0: i32) -> (i32, i32) {
    %c0_i32 = arith.constant 0 : i32
    %c0_i32_0 = arith.constant 0 : i32
    %c0_i32_1 = arith.constant 0 : i32
    return %c0_i32, %c0_i32_0 : i32, i32
  }
  func.func @transform_3(%arg0: i32) -> (i32, i32, i32) {
    %c0_i32 = arith.constant 0 : i32
    %c0_i32_0 = arith.constant 0 : i32
    %c0_i32_1 = arith.constant 0 : i32
    return %arg0, %c0_i32, %c0_i32_0 : i32, i32, i32
  }
  func.func @transform_4(%arg0: i32) -> (i32, i32, i32) {
    %c0_i32 = arith.constant 0 : i32
    %c0_i32_0 = arith.constant 0 : i32
    %c0_i32_1 = arith.constant 0 : i32
    return %arg0, %c0_i32, %c0_i32_0 : i32, i32, i32
  }
  func.func @transform_5(%arg0: i32) -> (i32, i32) {
    %c0_i32 = arith.constant 0 : i32
    %c0_i32_0 = arith.constant 0 : i32
    %c0_i32_1 = arith.constant 0 : i32
    return %c0_i32, %c0_i32_0 : i32, i32
  }
  func.func @transform_6(%arg0: i32) -> (i32, i32) {
    %c0_i32 = arith.constant 0 : i32
    %c0_i32_0 = arith.constant 0 : i32
    %c0_i32_1 = arith.constant 0 : i32
    return %c0_i32, %c0_i32_0 : i32, i32
  }
  func.func @transform_7(%arg0: i32) -> (i32, i32, i32) {
    %c0_i32 = arith.constant 0 : i32
    %c0_i32_0 = arith.constant 0 : i32
    %c0_i32_1 = arith.constant 0 : i32
    return %arg0, %c0_i32, %c0_i32_0 : i32, i32, i32
  }
}

module attributes {stable_mosaic.version = 11 : i64} {
  func.func @_residual_block_kernel(%arg0: i32, %arg1: memref<1x8x512xf32, #tpu.memory_space<vmem>>, %arg2: memref<3x8x72xf32, #tpu.memory_space<vmem>>, %arg3: memref<8x1xf32, #tpu.memory_space<vmem>>, %arg4: memref<1x8x1xf32, #tpu.memory_space<vmem>>, %arg5: memref<1x8x1xf32, #tpu.memory_space<vmem>>, %arg6: memref<27x512xf32, #tpu.memory_space<vmem>>, %arg7: memref<8x8xf32, #tpu.memory_space<vmem>>, %arg8: memref<1x8x512xf32, #tpu.memory_space<vmem>>, %arg9: memref<72x512xf32, #tpu.memory_space<vmem>>, %arg10: memref<8x512xf32, #tpu.memory_space<vmem>>) attributes {dimension_semantics = [#tpu.dimension_semantics<parallel>], iteration_bounds = array<i64: 2>, scalar_prefetch = 0 : i64, scratch_operands = 2 : i64, tpu.core_type = #tpu.core_type<tc>, window_params = [{transform_indices = @transform_0, window_bounds = array<i64: 1, 8, 512>}, {pipeline_mode = #tpu.pipeline_mode<synchronous>, transform_indices = @transform_1, window_bounds = array<i64: 3, 8, 72>}, {pipeline_mode = #tpu.pipeline_mode<synchronous>, transform_indices = @transform_2, window_bounds = array<i64: 8, 1>}, {transform_indices = @transform_3, window_bounds = array<i64: 1, 8, 1>}, {transform_indices = @transform_4, window_bounds = array<i64: 1, 8, 1>}, {pipeline_mode = #tpu.pipeline_mode<synchronous>, transform_indices = @transform_5, window_bounds = array<i64: 27, 512>}, {pipeline_mode = #tpu.pipeline_mode<synchronous>, transform_indices = @transform_6, window_bounds = array<i64: 8, 8>}, {transform_indices = @transform_7, window_bounds = array<i64: 1, 8, 512>}]} {
    %c0 = arith.constant 0 : index
    %c0_0 = arith.constant 0 : index
    %c0_1 = arith.constant 0 : index
    %0 = vector.load %arg1[%c0, %c0_0, %c0_1] : memref<1x8x512xf32, #tpu.memory_space<vmem>>, vector<1x8x512xf32>
    %1 = vector.shape_cast %0 : vector<1x8x512xf32> to vector<8x512xf32>
    %c73_i32 = arith.constant 73 : i32
    %2 = tpu.dynamic_rotate %1 by %c73_i32 dim 1 : vector<8x512xf32>, i32 -> vector<8x512xf32>
    %c0_2 = arith.constant 0 : index
    %c0_3 = arith.constant 0 : index
    %3 = vector.load %arg6[%c0_2, %c0_3] : memref<27x512xf32, #tpu.memory_space<vmem>>, vector<1x512xf32>
    %4 = vector.broadcast %3 : vector<1x512xf32> to vector<8x512xf32>
    %5 = arith.mulf %2, %4 : vector<8x512xf32>
    %c0_4 = arith.constant 0 : index
    %c0_5 = arith.constant 0 : index
    %6 = vector.load %arg9[%c0_4, %c0_5] : memref<72x512xf32, #tpu.memory_space<vmem>>, vector<8x512xf32>
    tpu.vector_store %arg9[%c0_4, %c0_5], %5 {strides = array<i32>} : memref<72x512xf32, #tpu.memory_space<vmem>>, vector<8x512xf32>,
    %c72_i32 = arith.constant 72 : i32
    %7 = tpu.dynamic_rotate %1 by %c72_i32 dim 1 : vector<8x512xf32>, i32 -> vector<8x512xf32>
    %c1 = arith.constant 1 : index
    %c0_6 = arith.constant 0 : index
    %8 = vector.load %arg6[%c1, %c0_6] : memref<27x512xf32, #tpu.memory_space<vmem>>, vector<1x512xf32>
    %9 = vector.broadcast %8 : vector<1x512xf32> to vector<8x512xf32>
    %10 = arith.mulf %7, %9 : vector<8x512xf32>
    %c8 = arith.constant 8 : index
    %c0_7 = arith.constant 0 : index
    %11 = vector.load %arg9[%c8, %c0_7] : memref<72x512xf32, #tpu.memory_space<vmem>>, vector<8x512xf32>
    tpu.vector_store %arg9[%c8, %c0_7], %10 {strides = array<i32>} : memref<72x512xf32, #tpu.memory_space<vmem>>, vector<8x512xf32>,
    %c71_i32 = arith.constant 71 : i32
    %12 = tpu.dynamic_rotate %1 by %c71_i32 dim 1 : vector<8x512xf32>, i32 -> vector<8x512xf32>
    %c2 = arith.constant 2 : index
    %c0_8 = arith.constant 0 : index
    %13 = vector.load %arg6[%c2, %c0_8] : memref<27x512xf32, #tpu.memory_space<vmem>>, vector<1x512xf32>
    %14 = vector.broadcast %13 : vector<1x512xf32> to vector<8x512xf32>
    %15 = arith.mulf %12, %14 : vector<8x512xf32>
    %c16 = arith.constant 16 : index
    %c0_9 = arith.constant 0 : index
    %16 = vector.load %arg9[%c16, %c0_9] : memref<72x512xf32, #tpu.memory_space<vmem>>, vector<8x512xf32>
    tpu.vector_store %arg9[%c16, %c0_9], %15 {strides = array<i32>} : memref<72x512xf32, #tpu.memory_space<vmem>>, vector<8x512xf32>,
    %c65_i32 = arith.constant 65 : i32
    %17 = tpu.dynamic_rotate %1 by %c65_i32 dim 1 : vector<8x512xf32>, i32 -> vector<8x512xf32>
    %c3 = arith.constant 3 : index
    %c0_10 = arith.constant 0 : index
    %18 = vector.load %arg6[%c3, %c0_10] : memref<27x512xf32, #tpu.memory_space<vmem>>, vector<1x512xf32>
    %19 = vector.broadcast %18 : vector<1x512xf32> to vector<8x512xf32>
    %20 = arith.mulf %17, %19 : vector<8x512xf32>
    %c24 = arith.constant 24 : index
    %c0_11 = arith.constant 0 : index
    %21 = vector.load %arg9[%c24, %c0_11] : memref<72x512xf32, #tpu.memory_space<vmem>>, vector<8x512xf32>
    tpu.vector_store %arg9[%c24, %c0_11], %20 {strides = array<i32>} : memref<72x512xf32, #tpu.memory_space<vmem>>, vector<8x512xf32>,
    %c64_i32 = arith.constant 64 : i32
    %22 = tpu.dynamic_rotate %1 by %c64_i32 dim 1 : vector<8x512xf32>, i32 -> vector<8x512xf32>
    %c4 = arith.constant 4 : index
    %c0_12 = arith.constant 0 : index
    %23 = vector.load %arg6[%c4, %c0_12] : memref<27x512xf32, #tpu.memory_space<vmem>>, vector<1x512xf32>
    %24 = vector.broadcast %23 : vector<1x512xf32> to vector<8x512xf32>
    %25 = arith.mulf %22, %24 : vector<8x512xf32>
    %c32 = arith.constant 32 : index
    %c0_13 = arith.constant 0 : index
    %26 = vector.load %arg9[%c32, %c0_13] : memref<72x512xf32, #tpu.memory_space<vmem>>, vector<8x512xf32>
    tpu.vector_store %arg9[%c32, %c0_13], %25 {strides = array<i32>} : memref<72x512xf32, #tpu.memory_space<vmem>>, vector<8x512xf32>,
    %c63_i32 = arith.constant 63 : i32
    %27 = tpu.dynamic_rotate %1 by %c63_i32 dim 1 : vector<8x512xf32>, i32 -> vector<8x512xf32>
    %c5 = arith.constant 5 : index
    %c0_14 = arith.constant 0 : index
    %28 = vector.load %arg6[%c5, %c0_14] : memref<27x512xf32, #tpu.memory_space<vmem>>, vector<1x512xf32>
    %29 = vector.broadcast %28 : vector<1x512xf32> to vector<8x512xf32>
    %30 = arith.mulf %27, %29 : vector<8x512xf32>
    %c40 = arith.constant 40 : index
    %c0_15 = arith.constant 0 : index
    %31 = vector.load %arg9[%c40, %c0_15] : memref<72x512xf32, #tpu.memory_space<vmem>>, vector<8x512xf32>
    tpu.vector_store %arg9[%c40, %c0_15], %30 {strides = array<i32>} : memref<72x512xf32, #tpu.memory_space<vmem>>, vector<8x512xf32>,
    %c57_i32 = arith.constant 57 : i32
    %32 = tpu.dynamic_rotate %1 by %c57_i32 dim 1 : vector<8x512xf32>, i32 -> vector<8x512xf32>
    %c6 = arith.constant 6 : index
    %c0_16 = arith.constant 0 : index
    %33 = vector.load %arg6[%c6, %c0_16] : memref<27x512xf32, #tpu.memory_space<vmem>>, vector<1x512xf32>
    %34 = vector.broadcast %33 : vector<1x512xf32> to vector<8x512xf32>
    %35 = arith.mulf %32, %34 : vector<8x512xf32>
    %c48 = arith.constant 48 : index
    %c0_17 = arith.constant 0 : index
    %36 = vector.load %arg9[%c48, %c0_17] : memref<72x512xf32, #tpu.memory_space<vmem>>, vector<8x512xf32>
    tpu.vector_store %arg9[%c48, %c0_17], %35 {strides = array<i32>} : memref<72x512xf32, #tpu.memory_space<vmem>>, vector<8x512xf32>,
    %c56_i32 = arith.constant 56 : i32
    %37 = tpu.dynamic_rotate %1 by %c56_i32 dim 1 : vector<8x512xf32>, i32 -> vector<8x512xf32>
    %c7 = arith.constant 7 : index
    %c0_18 = arith.constant 0 : index
    %38 = vector.load %arg6[%c7, %c0_18] : memref<27x512xf32, #tpu.memory_space<vmem>>, vector<1x512xf32>
    %39 = vector.broadcast %38 : vector<1x512xf32> to vector<8x512xf32>
    %40 = arith.mulf %37, %39 : vector<8x512xf32>
    %c56 = arith.constant 56 : index
    %c0_19 = arith.constant 0 : index
    %41 = vector.load %arg9[%c56, %c0_19] : memref<72x512xf32, #tpu.memory_space<vmem>>, vector<8x512xf32>
    tpu.vector_store %arg9[%c56, %c0_19], %40 {strides = array<i32>} : memref<72x512xf32, #tpu.memory_space<vmem>>, vector<8x512xf32>,
    %c55_i32 = arith.constant 55 : i32
    %42 = tpu.dynamic_rotate %1 by %c55_i32 dim 1 : vector<8x512xf32>, i32 -> vector<8x512xf32>
    %c8_20 = arith.constant 8 : index
    %c0_21 = arith.constant 0 : index
    %43 = vector.load %arg6[%c8_20, %c0_21] : memref<27x512xf32, #tpu.memory_space<vmem>>, vector<1x512xf32>
    %44 = vector.broadcast %43 : vector<1x512xf32> to vector<8x512xf32>
    %45 = arith.mulf %42, %44 : vector<8x512xf32>
    %c64 = arith.constant 64 : index
    %c0_22 = arith.constant 0 : index
    %46 = vector.load %arg9[%c64, %c0_22] : memref<72x512xf32, #tpu.memory_space<vmem>>, vector<8x512xf32>
    tpu.vector_store %arg9[%c64, %c0_22], %45 {strides = array<i32>} : memref<72x512xf32, #tpu.memory_space<vmem>>, vector<8x512xf32>,
    %c0_23 = arith.constant 0 : index
    %c0_24 = arith.constant 0 : index
    %c0_25 = arith.constant 0 : index
    %47 = vector.load %arg2[%c0_23, %c0_24, %c0_25] : memref<3x8x72xf32, #tpu.memory_space<vmem>>, vector<1x8x72xf32>
    %48 = vector.shape_cast %47 : vector<1x8x72xf32> to vector<8x72xf32>
    %c0_26 = arith.constant 0 : index
    %c0_27 = arith.constant 0 : index
    %49 = vector.load %arg9[%c0_26, %c0_27] : memref<72x512xf32, #tpu.memory_space<vmem>>, vector<72x512xf32>
    %cst = arith.constant dense<0.000000e+00> : vector<8x512xf32>
    %50 = tpu.matmul %48, %49, %cst {dimension_numbers = #tpu.dot_dimension_numbers<[1], [0], [0], [1], [0, 0, 1, 1], [], []>} : vector<8x72xf32>, vector<72x512xf32>, vector<8x512xf32> -> vector<8x512xf32>
    %c0_28 = arith.constant 0 : index
    %c0_29 = arith.constant 0 : index
    %51 = vector.load %arg10[%c0_28, %c0_29] : memref<8x512xf32, #tpu.memory_space<vmem>>, vector<8x512xf32>
    tpu.vector_store %arg10[%c0_28, %c0_29], %50 {strides = array<i32>} : memref<8x512xf32, #tpu.memory_space<vmem>>, vector<8x512xf32>,
    %c9_i32 = arith.constant 9 : i32
    %52 = tpu.dynamic_rotate %1 by %c9_i32 dim 1 : vector<8x512xf32>, i32 -> vector<8x512xf32>
    %c9 = arith.constant 9 : index
    %c0_30 = arith.constant 0 : index
    %53 = vector.load %arg6[%c9, %c0_30] : memref<27x512xf32, #tpu.memory_space<vmem>>, vector<1x512xf32>
    %54 = vector.broadcast %53 : vector<1x512xf32> to vector<8x512xf32>
    %55 = arith.mulf %52, %54 : vector<8x512xf32>
    %c0_31 = arith.constant 0 : index
    %c0_32 = arith.constant 0 : index
    %56 = vector.load %arg9[%c0_31, %c0_32] : memref<72x512xf32, #tpu.memory_space<vmem>>, vector<8x512xf32>
    tpu.vector_store %arg9[%c0_31, %c0_32], %55 {strides = array<i32>} : memref<72x512xf32, #tpu.memory_space<vmem>>, vector<8x512xf32>,
    %c8_i32 = arith.constant 8 : i32
    %57 = tpu.dynamic_rotate %1 by %c8_i32 dim 1 : vector<8x512xf32>, i32 -> vector<8x512xf32>
    %c10 = arith.constant 10 : index
    %c0_33 = arith.constant 0 : index
    %58 = vector.load %arg6[%c10, %c0_33] : memref<27x512xf32, #tpu.memory_space<vmem>>, vector<1x512xf32>
    %59 = vector.broadcast %58 : vector<1x512xf32> to vector<8x512xf32>
    %60 = arith.mulf %57, %59 : vector<8x512xf32>
    %c8_34 = arith.constant 8 : index
    %c0_35 = arith.constant 0 : index
    %61 = vector.load %arg9[%c8_34, %c0_35] : memref<72x512xf32, #tpu.memory_space<vmem>>, vector<8x512xf32>
    tpu.vector_store %arg9[%c8_34, %c0_35], %60 {strides = array<i32>} : memref<72x512xf32, #tpu.memory_space<vmem>>, vector<8x512xf32>,
    %c7_i32 = arith.constant 7 : i32
    %62 = tpu.dynamic_rotate %1 by %c7_i32 dim 1 : vector<8x512xf32>, i32 -> vector<8x512xf32>
    %c11 = arith.constant 11 : index
    %c0_36 = arith.constant 0 : index
    %63 = vector.load %arg6[%c11, %c0_36] : memref<27x512xf32, #tpu.memory_space<vmem>>, vector<1x512xf32>
    %64 = vector.broadcast %63 : vector<1x512xf32> to vector<8x512xf32>
    %65 = arith.mulf %62, %64 : vector<8x512xf32>
    %c16_37 = arith.constant 16 : index
    %c0_38 = arith.constant 0 : index
    %66 = vector.load %arg9[%c16_37, %c0_38] : memref<72x512xf32, #tpu.memory_space<vmem>>, vector<8x512xf32>
    tpu.vector_store %arg9[%c16_37, %c0_38], %65 {strides = array<i32>} : memref<72x512xf32, #tpu.memory_space<vmem>>, vector<8x512xf32>,
    %c1_i32 = arith.constant 1 : i32
    %67 = tpu.dynamic_rotate %1 by %c1_i32 dim 1 : vector<8x512xf32>, i32 -> vector<8x512xf32>
    %c12 = arith.constant 12 : index
    %c0_39 = arith.constant 0 : index
    %68 = vector.load %arg6[%c12, %c0_39] : memref<27x512xf32, #tpu.memory_space<vmem>>, vector<1x512xf32>
    %69 = vector.broadcast %68 : vector<1x512xf32> to vector<8x512xf32>
    %70 = arith.mulf %67, %69 : vector<8x512xf32>
    %c24_40 = arith.constant 24 : index
    %c0_41 = arith.constant 0 : index
    %71 = vector.load %arg9[%c24_40, %c0_41] : memref<72x512xf32, #tpu.memory_space<vmem>>, vector<8x512xf32>
    tpu.vector_store %arg9[%c24_40, %c0_41], %70 {strides = array<i32>} : memref<72x512xf32, #tpu.memory_space<vmem>>, vector<8x512xf32>,
    %c13 = arith.constant 13 : index
    %c0_42 = arith.constant 0 : index
    %72 = vector.load %arg6[%c13, %c0_42] : memref<27x512xf32, #tpu.memory_space<vmem>>, vector<1x512xf32>
    %73 = vector.broadcast %72 : vector<1x512xf32> to vector<8x512xf32>
    %74 = arith.mulf %1, %73 : vector<8x512xf32>
    %c32_43 = arith.constant 32 : index
    %c0_44 = arith.constant 0 : index
    %75 = vector.load %arg9[%c32_43, %c0_44] : memref<72x512xf32, #tpu.memory_space<vmem>>, vector<8x512xf32>
    tpu.vector_store %arg9[%c32_43, %c0_44], %74 {strides = array<i32>} : memref<72x512xf32, #tpu.memory_space<vmem>>, vector<8x512xf32>,
    %c511_i32 = arith.constant 511 : i32
    %76 = tpu.dynamic_rotate %1 by %c511_i32 dim 1 : vector<8x512xf32>, i32 -> vector<8x512xf32>
    %c14 = arith.constant 14 : index
    %c0_45 = arith.constant 0 : index
    %77 = vector.load %arg6[%c14, %c0_45] : memref<27x512xf32, #tpu.memory_space<vmem>>, vector<1x512xf32>
    %78 = vector.broadcast %77 : vector<1x512xf32> to vector<8x512xf32>
    %79 = arith.mulf %76, %78 : vector<8x512xf32>
    %c40_46 = arith.constant 40 : index
    %c0_47 = arith.constant 0 : index
    %80 = vector.load %arg9[%c40_46, %c0_47] : memref<72x512xf32, #tpu.memory_space<vmem>>, vector<8x512xf32>
    tpu.vector_store %arg9[%c40_46, %c0_47], %79 {strides = array<i32>} : memref<72x512xf32, #tpu.memory_space<vmem>>, vector<8x512xf32>,
    %c505_i32 = arith.constant 505 : i32
    %81 = tpu.dynamic_rotate %1 by %c505_i32 dim 1 : vector<8x512xf32>, i32 -> vector<8x512xf32>
    %c15 = arith.constant 15 : index
    %c0_48 = arith.constant 0 : index
    %82 = vector.load %arg6[%c15, %c0_48] : memref<27x512xf32, #tpu.memory_space<vmem>>, vector<1x512xf32>
    %83 = vector.broadcast %82 : vector<1x512xf32> to vector<8x512xf32>
    %84 = arith.mulf %81, %83 : vector<8x512xf32>
    %c48_49 = arith.constant 48 : index
    %c0_50 = arith.constant 0 : index
    %85 = vector.load %arg9[%c48_49, %c0_50] : memref<72x512xf32, #tpu.memory_space<vmem>>, vector<8x512xf32>
    tpu.vector_store %arg9[%c48_49, %c0_50], %84 {strides = array<i32>} : memref<72x512xf32, #tpu.memory_space<vmem>>, vector<8x512xf32>,
    %c504_i32 = arith.constant 504 : i32
    %86 = tpu.dynamic_rotate %1 by %c504_i32 dim 1 : vector<8x512xf32>, i32 -> vector<8x512xf32>
    %c16_51 = arith.constant 16 : index
    %c0_52 = arith.constant 0 : index
    %87 = vector.load %arg6[%c16_51, %c0_52] : memref<27x512xf32, #tpu.memory_space<vmem>>, vector<1x512xf32>
    %88 = vector.broadcast %87 : vector<1x512xf32> to vector<8x512xf32>
    %89 = arith.mulf %86, %88 : vector<8x512xf32>
    %c56_53 = arith.constant 56 : index
    %c0_54 = arith.constant 0 : index
    %90 = vector.load %arg9[%c56_53, %c0_54] : memref<72x512xf32, #tpu.memory_space<vmem>>, vector<8x512xf32>
    tpu.vector_store %arg9[%c56_53, %c0_54], %89 {strides = array<i32>} : memref<72x512xf32, #tpu.memory_space<vmem>>, vector<8x512xf32>,
    %c503_i32 = arith.constant 503 : i32
    %91 = tpu.dynamic_rotate %1 by %c503_i32 dim 1 : vector<8x512xf32>, i32 -> vector<8x512xf32>
    %c17 = arith.constant 17 : index
    %c0_55 = arith.constant 0 : index
    %92 = vector.load %arg6[%c17, %c0_55] : memref<27x512xf32, #tpu.memory_space<vmem>>, vector<1x512xf32>
    %93 = vector.broadcast %92 : vector<1x512xf32> to vector<8x512xf32>
    %94 = arith.mulf %91, %93 : vector<8x512xf32>
    %c64_56 = arith.constant 64 : index
    %c0_57 = arith.constant 0 : index
    %95 = vector.load %arg9[%c64_56, %c0_57] : memref<72x512xf32, #tpu.memory_space<vmem>>, vector<8x512xf32>
    tpu.vector_store %arg9[%c64_56, %c0_57], %94 {strides = array<i32>} : memref<72x512xf32, #tpu.memory_space<vmem>>, vector<8x512xf32>,
    %c1_58 = arith.constant 1 : index
    %c0_59 = arith.constant 0 : index
    %c0_60 = arith.constant 0 : index
    %96 = vector.load %arg2[%c1_58, %c0_59, %c0_60] : memref<3x8x72xf32, #tpu.memory_space<vmem>>, vector<1x8x72xf32>
    %97 = vector.shape_cast %96 : vector<1x8x72xf32> to vector<8x72xf32>
    %c0_61 = arith.constant 0 : index
    %c0_62 = arith.constant 0 : index
    %98 = vector.load %arg9[%c0_61, %c0_62] : memref<72x512xf32, #tpu.memory_space<vmem>>, vector<72x512xf32>
    %cst_63 = arith.constant dense<0.000000e+00> : vector<8x512xf32>
    %99 = tpu.matmul %97, %98, %cst_63 {dimension_numbers = #tpu.dot_dimension_numbers<[1], [0], [0], [1], [0, 0, 1, 1], [], []>} : vector<8x72xf32>, vector<72x512xf32>, vector<8x512xf32> -> vector<8x512xf32>
    %c0_64 = arith.constant 0 : index
    %c0_65 = arith.constant 0 : index
    %100 = vector.load %arg10[%c0_64, %c0_65] : memref<8x512xf32, #tpu.memory_space<vmem>>, vector<8x512xf32>
    %101 = arith.addf %100, %99 : vector<8x512xf32>
    %c0_66 = arith.constant 0 : index
    %c0_67 = arith.constant 0 : index
    %102 = vector.load %arg10[%c0_66, %c0_67] : memref<8x512xf32, #tpu.memory_space<vmem>>, vector<8x512xf32>
    tpu.vector_store %arg10[%c0_66, %c0_67], %101 {strides = array<i32>} : memref<8x512xf32, #tpu.memory_space<vmem>>, vector<8x512xf32>,
    %c457_i32 = arith.constant 457 : i32
    %103 = tpu.dynamic_rotate %1 by %c457_i32 dim 1 : vector<8x512xf32>, i32 -> vector<8x512xf32>
    %c18 = arith.constant 18 : index
    %c0_68 = arith.constant 0 : index
    %104 = vector.load %arg6[%c18, %c0_68] : memref<27x512xf32, #tpu.memory_space<vmem>>, vector<1x512xf32>
    %105 = vector.broadcast %104 : vector<1x512xf32> to vector<8x512xf32>
    %106 = arith.mulf %103, %105 : vector<8x512xf32>
    %c0_69 = arith.constant 0 : index
    %c0_70 = arith.constant 0 : index
    %107 = vector.load %arg9[%c0_69, %c0_70] : memref<72x512xf32, #tpu.memory_space<vmem>>, vector<8x512xf32>
    tpu.vector_store %arg9[%c0_69, %c0_70], %106 {strides = array<i32>} : memref<72x512xf32, #tpu.memory_space<vmem>>, vector<8x512xf32>,
    %c456_i32 = arith.constant 456 : i32
    %108 = tpu.dynamic_rotate %1 by %c456_i32 dim 1 : vector<8x512xf32>, i32 -> vector<8x512xf32>
    %c19 = arith.constant 19 : index
    %c0_71 = arith.constant 0 : index
    %109 = vector.load %arg6[%c19, %c0_71] : memref<27x512xf32, #tpu.memory_space<vmem>>, vector<1x512xf32>
    %110 = vector.broadcast %109 : vector<1x512xf32> to vector<8x512xf32>
    %111 = arith.mulf %108, %110 : vector<8x512xf32>
    %c8_72 = arith.constant 8 : index
    %c0_73 = arith.constant 0 : index
    %112 = vector.load %arg9[%c8_72, %c0_73] : memref<72x512xf32, #tpu.memory_space<vmem>>, vector<8x512xf32>
    tpu.vector_store %arg9[%c8_72, %c0_73], %111 {strides = array<i32>} : memref<72x512xf32, #tpu.memory_space<vmem>>, vector<8x512xf32>,
    %c455_i32 = arith.constant 455 : i32
    %113 = tpu.dynamic_rotate %1 by %c455_i32 dim 1 : vector<8x512xf32>, i32 -> vector<8x512xf32>
    %c20 = arith.constant 20 : index
    %c0_74 = arith.constant 0 : index
    %114 = vector.load %arg6[%c20, %c0_74] : memref<27x512xf32, #tpu.memory_space<vmem>>, vector<1x512xf32>
    %115 = vector.broadcast %114 : vector<1x512xf32> to vector<8x512xf32>
    %116 = arith.mulf %113, %115 : vector<8x512xf32>
    %c16_75 = arith.constant 16 : index
    %c0_76 = arith.constant 0 : index
    %117 = vector.load %arg9[%c16_75, %c0_76] : memref<72x512xf32, #tpu.memory_space<vmem>>, vector<8x512xf32>
    tpu.vector_store %arg9[%c16_75, %c0_76], %116 {strides = array<i32>} : memref<72x512xf32, #tpu.memory_space<vmem>>, vector<8x512xf32>,
    %c449_i32 = arith.constant 449 : i32
    %118 = tpu.dynamic_rotate %1 by %c449_i32 dim 1 : vector<8x512xf32>, i32 -> vector<8x512xf32>
    %c21 = arith.constant 21 : index
    %c0_77 = arith.constant 0 : index
    %119 = vector.load %arg6[%c21, %c0_77] : memref<27x512xf32, #tpu.memory_space<vmem>>, vector<1x512xf32>
    %120 = vector.broadcast %119 : vector<1x512xf32> to vector<8x512xf32>
    %121 = arith.mulf %118, %120 : vector<8x512xf32>
    %c24_78 = arith.constant 24 : index
    %c0_79 = arith.constant 0 : index
    %122 = vector.load %arg9[%c24_78, %c0_79] : memref<72x512xf32, #tpu.memory_space<vmem>>, vector<8x512xf32>
    tpu.vector_store %arg9[%c24_78, %c0_79], %121 {strides = array<i32>} : memref<72x512xf32, #tpu.memory_space<vmem>>, vector<8x512xf32>,
    %c448_i32 = arith.constant 448 : i32
    %123 = tpu.dynamic_rotate %1 by %c448_i32 dim 1 : vector<8x512xf32>, i32 -> vector<8x512xf32>
    %c22 = arith.constant 22 : index
    %c0_80 = arith.constant 0 : index
    %124 = vector.load %arg6[%c22, %c0_80] : memref<27x512xf32, #tpu.memory_space<vmem>>, vector<1x512xf32>
    %125 = vector.broadcast %124 : vector<1x512xf32> to vector<8x512xf32>
    %126 = arith.mulf %123, %125 : vector<8x512xf32>
    %c32_81 = arith.constant 32 : index
    %c0_82 = arith.constant 0 : index
    %127 = vector.load %arg9[%c32_81, %c0_82] : memref<72x512xf32, #tpu.memory_space<vmem>>, vector<8x512xf32>
    tpu.vector_store %arg9[%c32_81, %c0_82], %126 {strides = array<i32>} : memref<72x512xf32, #tpu.memory_space<vmem>>, vector<8x512xf32>,
    %c447_i32 = arith.constant 447 : i32
    %128 = tpu.dynamic_rotate %1 by %c447_i32 dim 1 : vector<8x512xf32>, i32 -> vector<8x512xf32>
    %c23 = arith.constant 23 : index
    %c0_83 = arith.constant 0 : index
    %129 = vector.load %arg6[%c23, %c0_83] : memref<27x512xf32, #tpu.memory_space<vmem>>, vector<1x512xf32>
    %130 = vector.broadcast %129 : vector<1x512xf32> to vector<8x512xf32>
    %131 = arith.mulf %128, %130 : vector<8x512xf32>
    %c40_84 = arith.constant 40 : index
    %c0_85 = arith.constant 0 : index
    %132 = vector.load %arg9[%c40_84, %c0_85] : memref<72x512xf32, #tpu.memory_space<vmem>>, vector<8x512xf32>
    tpu.vector_store %arg9[%c40_84, %c0_85], %131 {strides = array<i32>} : memref<72x512xf32, #tpu.memory_space<vmem>>, vector<8x512xf32>,
    %c441_i32 = arith.constant 441 : i32
    %133 = tpu.dynamic_rotate %1 by %c441_i32 dim 1 : vector<8x512xf32>, i32 -> vector<8x512xf32>
    %c24_86 = arith.constant 24 : index
    %c0_87 = arith.constant 0 : index
    %134 = vector.load %arg6[%c24_86, %c0_87] : memref<27x512xf32, #tpu.memory_space<vmem>>, vector<1x512xf32>
    %135 = vector.broadcast %134 : vector<1x512xf32> to vector<8x512xf32>
    %136 = arith.mulf %133, %135 : vector<8x512xf32>
    %c48_88 = arith.constant 48 : index
    %c0_89 = arith.constant 0 : index
    %137 = vector.load %arg9[%c48_88, %c0_89] : memref<72x512xf32, #tpu.memory_space<vmem>>, vector<8x512xf32>
    tpu.vector_store %arg9[%c48_88, %c0_89], %136 {strides = array<i32>} : memref<72x512xf32, #tpu.memory_space<vmem>>, vector<8x512xf32>,
    %c440_i32 = arith.constant 440 : i32
    %138 = tpu.dynamic_rotate %1 by %c440_i32 dim 1 : vector<8x512xf32>, i32 -> vector<8x512xf32>
    %c25 = arith.constant 25 : index
    %c0_90 = arith.constant 0 : index
    %139 = vector.load %arg6[%c25, %c0_90] : memref<27x512xf32, #tpu.memory_space<vmem>>, vector<1x512xf32>
    %140 = vector.broadcast %139 : vector<1x512xf32> to vector<8x512xf32>
    %141 = arith.mulf %138, %140 : vector<8x512xf32>
    %c56_91 = arith.constant 56 : index
    %c0_92 = arith.constant 0 : index
    %142 = vector.load %arg9[%c56_91, %c0_92] : memref<72x512xf32, #tpu.memory_space<vmem>>, vector<8x512xf32>
    tpu.vector_store %arg9[%c56_91, %c0_92], %141 {strides = array<i32>} : memref<72x512xf32, #tpu.memory_space<vmem>>, vector<8x512xf32>,
    %c439_i32 = arith.constant 439 : i32
    %143 = tpu.dynamic_rotate %1 by %c439_i32 dim 1 : vector<8x512xf32>, i32 -> vector<8x512xf32>
    %c26 = arith.constant 26 : index
    %c0_93 = arith.constant 0 : index
    %144 = vector.load %arg6[%c26, %c0_93] : memref<27x512xf32, #tpu.memory_space<vmem>>, vector<1x512xf32>
    %145 = vector.broadcast %144 : vector<1x512xf32> to vector<8x512xf32>
    %146 = arith.mulf %143, %145 : vector<8x512xf32>
    %c64_94 = arith.constant 64 : index
    %c0_95 = arith.constant 0 : index
    %147 = vector.load %arg9[%c64_94, %c0_95] : memref<72x512xf32, #tpu.memory_space<vmem>>, vector<8x512xf32>
    tpu.vector_store %arg9[%c64_94, %c0_95], %146 {strides = array<i32>} : memref<72x512xf32, #tpu.memory_space<vmem>>, vector<8x512xf32>,
    %c2_96 = arith.constant 2 : index
    %c0_97 = arith.constant 0 : index
    %c0_98 = arith.constant 0 : index
    %148 = vector.load %arg2[%c2_96, %c0_97, %c0_98] : memref<3x8x72xf32, #tpu.memory_space<vmem>>, vector<1x8x72xf32>
    %149 = vector.shape_cast %148 : vector<1x8x72xf32> to vector<8x72xf32>
    %c0_99 = arith.constant 0 : index
    %c0_100 = arith.constant 0 : index
    %150 = vector.load %arg9[%c0_99, %c0_100] : memref<72x512xf32, #tpu.memory_space<vmem>>, vector<72x512xf32>
    %cst_101 = arith.constant dense<0.000000e+00> : vector<8x512xf32>
    %151 = tpu.matmul %149, %150, %cst_101 {dimension_numbers = #tpu.dot_dimension_numbers<[1], [0], [0], [1], [0, 0, 1, 1], [], []>} : vector<8x72xf32>, vector<72x512xf32>, vector<8x512xf32> -> vector<8x512xf32>
    %c0_102 = arith.constant 0 : index
    %c0_103 = arith.constant 0 : index
    %152 = vector.load %arg10[%c0_102, %c0_103] : memref<8x512xf32, #tpu.memory_space<vmem>>, vector<8x512xf32>
    %153 = arith.addf %152, %151 : vector<8x512xf32>
    %c0_104 = arith.constant 0 : index
    %c0_105 = arith.constant 0 : index
    %154 = vector.load %arg10[%c0_104, %c0_105] : memref<8x512xf32, #tpu.memory_space<vmem>>, vector<8x512xf32>
    tpu.vector_store %arg10[%c0_104, %c0_105], %153 {strides = array<i32>} : memref<8x512xf32, #tpu.memory_space<vmem>>, vector<8x512xf32>,
    %c0_106 = arith.constant 0 : index
    %c0_107 = arith.constant 0 : index
    %155 = vector.load %arg10[%c0_106, %c0_107] : memref<8x512xf32, #tpu.memory_space<vmem>>, vector<8x512xf32>
    %c0_108 = arith.constant 0 : index
    %c0_109 = arith.constant 0 : index
    %156 = vector.load %arg3[%c0_108, %c0_109] : memref<8x1xf32, #tpu.memory_space<vmem>>, vector<8x1xf32>
    %157 = vector.broadcast %156 : vector<8x1xf32> to vector<8x512xf32>
    %158 = arith.addf %155, %157 : vector<8x512xf32>
    %cst_110 = arith.constant dense<0.000000e+00> : vector<8xf32>
    %159 = vector.multi_reduction <add>, %158, %cst_110 [1] : vector<8x512xf32> to vector<8xf32>
    %160 = vector.shape_cast %159 : vector<8xf32> to vector<8x1xf32>
    %161 = arith.mulf %158, %158 : vector<8x512xf32>
    %cst_111 = arith.constant dense<0.000000e+00> : vector<8xf32>
    %162 = vector.multi_reduction <add>, %161, %cst_111 [1] : vector<8x512xf32> to vector<8xf32>
    %163 = vector.shape_cast %162 : vector<8xf32> to vector<8x1xf32>
    %cst_112 = arith.constant 0.001953125 : f32
    %164 = vector.broadcast %cst_112 : f32 to vector<8x1xf32>
    %165 = arith.mulf %160, %164 : vector<8x1xf32>
    %cst_113 = arith.constant 0.001953125 : f32
    %166 = vector.broadcast %cst_113 : f32 to vector<8x1xf32>
    %167 = arith.mulf %163, %166 : vector<8x1xf32>
    %168 = arith.mulf %165, %165 : vector<8x1xf32>
    %169 = arith.subf %167, %168 : vector<8x1xf32>
    %cst_114 = arith.constant 0.000000e+00 : f32
    %170 = vector.broadcast %cst_114 : f32 to vector<8x1xf32>
    %171 = arith.maximumf %169, %170 : vector<8x1xf32>
    %cst_115 = arith.constant 9.99999974E-6 : f32
    %172 = vector.broadcast %cst_115 : f32 to vector<8x1xf32>
    %173 = arith.addf %171, %172 : vector<8x1xf32>
    %174 = math.rsqrt %173 : vector<8x1xf32>
    %c0_116 = arith.constant 0 : index
    %c0_117 = arith.constant 0 : index
    %c0_118 = arith.constant 0 : index
    %175 = vector.load %arg4[%c0_116, %c0_117, %c0_118] : memref<1x8x1xf32, #tpu.memory_space<vmem>>, vector<1x8x1xf32>
    %176 = vector.shape_cast %175 : vector<1x8x1xf32> to vector<8x1xf32>
    %177 = arith.mulf %174, %176 : vector<8x1xf32>
    %c0_119 = arith.constant 0 : index
    %c0_120 = arith.constant 0 : index
    %c0_121 = arith.constant 0 : index
    %178 = vector.load %arg5[%c0_119, %c0_120, %c0_121] : memref<1x8x1xf32, #tpu.memory_space<vmem>>, vector<1x8x1xf32>
    %179 = vector.shape_cast %178 : vector<1x8x1xf32> to vector<8x1xf32>
    %180 = arith.mulf %165, %177 : vector<8x1xf32>
    %181 = arith.subf %179, %180 : vector<8x1xf32>
    %182 = vector.broadcast %177 : vector<8x1xf32> to vector<8x512xf32>
    %183 = arith.mulf %158, %182 : vector<8x512xf32>
    %184 = vector.broadcast %181 : vector<8x1xf32> to vector<8x512xf32>
    %185 = arith.addf %183, %184 : vector<8x512xf32>
    %186 = arith.negf %185 : vector<8x512xf32>
    %187 = math.exp %186 : vector<8x512xf32>
    %cst_122 = arith.constant 1.000000e+00 : f32
    %188 = vector.broadcast %cst_122 : f32 to vector<8x512xf32>
    %189 = arith.addf %188, %187 : vector<8x512xf32>
    %190 = arith.divf %188, %189 : vector<8x512xf32>
    %191 = arith.mulf %185, %190 : vector<8x512xf32>
    %192 = arith.addf %191, %1 : vector<8x512xf32>
    %c0_123 = arith.constant 0 : index
    %c0_124 = arith.constant 0 : index
    %c0_125 = arith.constant 0 : index
    %193 = vector.load %arg8[%c0_123, %c0_124, %c0_125] : memref<1x8x512xf32, #tpu.memory_space<vmem>>, vector<1x8x512xf32>
    %194 = vector.shape_cast %193 : vector<1x8x512xf32> to vector<8x512xf32>
    %195 = vector.shape_cast %192 : vector<8x512xf32> to vector<1x8x512xf32>
    tpu.vector_store %arg8[%c0_123, %c0_124, %c0_125], %195 {strides = array<i32>} : memref<1x8x512xf32, #tpu.memory_space<vmem>>, vector<1x8x512xf32>,
    return
  }
  func.func @transform_0(%arg0: i32) -> (i32, i32, i32) {
    %c0_i32 = arith.constant 0 : i32
    %c0_i32_0 = arith.constant 0 : i32
    %c0_i32_1 = arith.constant 0 : i32
    return %arg0, %c0_i32, %c0_i32_0 : i32, i32, i32
  }
  func.func @transform_1(%arg0: i32) -> (i32, i32, i32) {
    %c0_i32 = arith.constant 0 : i32
    %c0_i32_0 = arith.constant 0 : i32
    %c0_i32_1 = arith.constant 0 : i32
    %c0_i32_2 = arith.constant 0 : i32
    return %c0_i32, %c0_i32_0, %c0_i32_1 : i32, i32, i32
  }
  func.func @transform_2(%arg0: i32) -> (i32, i32) {
    %c0_i32 = arith.constant 0 : i32
    %c0_i32_0 = arith.constant 0 : i32
    %c0_i32_1 = arith.constant 0 : i32
    return %c0_i32, %c0_i32_0 : i32, i32
  }
  func.func @transform_3(%arg0: i32) -> (i32, i32, i32) {
    %c0_i32 = arith.constant 0 : i32
    %c0_i32_0 = arith.constant 0 : i32
    %c0_i32_1 = arith.constant 0 : i32
    return %arg0, %c0_i32, %c0_i32_0 : i32, i32, i32
  }
  func.func @transform_4(%arg0: i32) -> (i32, i32, i32) {
    %c0_i32 = arith.constant 0 : i32
    %c0_i32_0 = arith.constant 0 : i32
    %c0_i32_1 = arith.constant 0 : i32
    return %arg0, %c0_i32, %c0_i32_0 : i32, i32, i32
  }
  func.func @transform_5(%arg0: i32) -> (i32, i32) {
    %c0_i32 = arith.constant 0 : i32
    %c0_i32_0 = arith.constant 0 : i32
    %c0_i32_1 = arith.constant 0 : i32
    return %c0_i32, %c0_i32_0 : i32, i32
  }
  func.func @transform_6(%arg0: i32) -> (i32, i32) {
    %c0_i32 = arith.constant 0 : i32
    %c0_i32_0 = arith.constant 0 : i32
    %c0_i32_1 = arith.constant 0 : i32
    return %c0_i32, %c0_i32_0 : i32, i32
  }
  func.func @transform_7(%arg0: i32) -> (i32, i32, i32) {
    %c0_i32 = arith.constant 0 : i32
    %c0_i32_0 = arith.constant 0 : i32
    %c0_i32_1 = arith.constant 0 : i32
    return %arg0, %c0_i32, %c0_i32_0 : i32, i32, i32
  }
}

module attributes {stable_mosaic.version = 11 : i64} {
  func.func @_residual_block_kernel(%arg0: i32, %arg1: memref<1x8x512xf32, #tpu.memory_space<vmem>>, %arg2: memref<3x8x72xf32, #tpu.memory_space<vmem>>, %arg3: memref<8x1xf32, #tpu.memory_space<vmem>>, %arg4: memref<1x8x1xf32, #tpu.memory_space<vmem>>, %arg5: memref<1x8x1xf32, #tpu.memory_space<vmem>>, %arg6: memref<27x512xf32, #tpu.memory_space<vmem>>, %arg7: memref<8x8xf32, #tpu.memory_space<vmem>>, %arg8: memref<1x8x512xf32, #tpu.memory_space<vmem>>, %arg9: memref<72x512xf32, #tpu.memory_space<vmem>>, %arg10: memref<8x512xf32, #tpu.memory_space<vmem>>) attributes {dimension_semantics = [#tpu.dimension_semantics<parallel>], iteration_bounds = array<i64: 2>, scalar_prefetch = 0 : i64, scratch_operands = 2 : i64, tpu.core_type = #tpu.core_type<tc>, window_params = [{transform_indices = @transform_0, window_bounds = array<i64: 1, 8, 512>}, {pipeline_mode = #tpu.pipeline_mode<synchronous>, transform_indices = @transform_1, window_bounds = array<i64: 3, 8, 72>}, {pipeline_mode = #tpu.pipeline_mode<synchronous>, transform_indices = @transform_2, window_bounds = array<i64: 8, 1>}, {transform_indices = @transform_3, window_bounds = array<i64: 1, 8, 1>}, {transform_indices = @transform_4, window_bounds = array<i64: 1, 8, 1>}, {pipeline_mode = #tpu.pipeline_mode<synchronous>, transform_indices = @transform_5, window_bounds = array<i64: 27, 512>}, {pipeline_mode = #tpu.pipeline_mode<synchronous>, transform_indices = @transform_6, window_bounds = array<i64: 8, 8>}, {transform_indices = @transform_7, window_bounds = array<i64: 1, 8, 512>}]} {
    %c0 = arith.constant 0 : index
    %c0_0 = arith.constant 0 : index
    %c0_1 = arith.constant 0 : index
    %0 = vector.load %arg1[%c0, %c0_0, %c0_1] : memref<1x8x512xf32, #tpu.memory_space<vmem>>, vector<1x8x512xf32>
    %1 = vector.shape_cast %0 : vector<1x8x512xf32> to vector<8x512xf32>
    %c73_i32 = arith.constant 73 : i32
    %2 = tpu.dynamic_rotate %1 by %c73_i32 dim 1 : vector<8x512xf32>, i32 -> vector<8x512xf32>
    %c0_2 = arith.constant 0 : index
    %c0_3 = arith.constant 0 : index
    %3 = vector.load %arg6[%c0_2, %c0_3] : memref<27x512xf32, #tpu.memory_space<vmem>>, vector<1x512xf32>
    %4 = vector.broadcast %3 : vector<1x512xf32> to vector<8x512xf32>
    %5 = arith.mulf %2, %4 : vector<8x512xf32>
    %c0_4 = arith.constant 0 : index
    %c0_5 = arith.constant 0 : index
    %6 = vector.load %arg9[%c0_4, %c0_5] : memref<72x512xf32, #tpu.memory_space<vmem>>, vector<8x512xf32>
    tpu.vector_store %arg9[%c0_4, %c0_5], %5 {strides = array<i32>} : memref<72x512xf32, #tpu.memory_space<vmem>>, vector<8x512xf32>,
    %c72_i32 = arith.constant 72 : i32
    %7 = tpu.dynamic_rotate %1 by %c72_i32 dim 1 : vector<8x512xf32>, i32 -> vector<8x512xf32>
    %c1 = arith.constant 1 : index
    %c0_6 = arith.constant 0 : index
    %8 = vector.load %arg6[%c1, %c0_6] : memref<27x512xf32, #tpu.memory_space<vmem>>, vector<1x512xf32>
    %9 = vector.broadcast %8 : vector<1x512xf32> to vector<8x512xf32>
    %10 = arith.mulf %7, %9 : vector<8x512xf32>
    %c8 = arith.constant 8 : index
    %c0_7 = arith.constant 0 : index
    %11 = vector.load %arg9[%c8, %c0_7] : memref<72x512xf32, #tpu.memory_space<vmem>>, vector<8x512xf32>
    tpu.vector_store %arg9[%c8, %c0_7], %10 {strides = array<i32>} : memref<72x512xf32, #tpu.memory_space<vmem>>, vector<8x512xf32>,
    %c71_i32 = arith.constant 71 : i32
    %12 = tpu.dynamic_rotate %1 by %c71_i32 dim 1 : vector<8x512xf32>, i32 -> vector<8x512xf32>
    %c2 = arith.constant 2 : index
    %c0_8 = arith.constant 0 : index
    %13 = vector.load %arg6[%c2, %c0_8] : memref<27x512xf32, #tpu.memory_space<vmem>>, vector<1x512xf32>
    %14 = vector.broadcast %13 : vector<1x512xf32> to vector<8x512xf32>
    %15 = arith.mulf %12, %14 : vector<8x512xf32>
    %c16 = arith.constant 16 : index
    %c0_9 = arith.constant 0 : index
    %16 = vector.load %arg9[%c16, %c0_9] : memref<72x512xf32, #tpu.memory_space<vmem>>, vector<8x512xf32>
    tpu.vector_store %arg9[%c16, %c0_9], %15 {strides = array<i32>} : memref<72x512xf32, #tpu.memory_space<vmem>>, vector<8x512xf32>,
    %c65_i32 = arith.constant 65 : i32
    %17 = tpu.dynamic_rotate %1 by %c65_i32 dim 1 : vector<8x512xf32>, i32 -> vector<8x512xf32>
    %c3 = arith.constant 3 : index
    %c0_10 = arith.constant 0 : index
    %18 = vector.load %arg6[%c3, %c0_10] : memref<27x512xf32, #tpu.memory_space<vmem>>, vector<1x512xf32>
    %19 = vector.broadcast %18 : vector<1x512xf32> to vector<8x512xf32>
    %20 = arith.mulf %17, %19 : vector<8x512xf32>
    %c24 = arith.constant 24 : index
    %c0_11 = arith.constant 0 : index
    %21 = vector.load %arg9[%c24, %c0_11] : memref<72x512xf32, #tpu.memory_space<vmem>>, vector<8x512xf32>
    tpu.vector_store %arg9[%c24, %c0_11], %20 {strides = array<i32>} : memref<72x512xf32, #tpu.memory_space<vmem>>, vector<8x512xf32>,
    %c64_i32 = arith.constant 64 : i32
    %22 = tpu.dynamic_rotate %1 by %c64_i32 dim 1 : vector<8x512xf32>, i32 -> vector<8x512xf32>
    %c4 = arith.constant 4 : index
    %c0_12 = arith.constant 0 : index
    %23 = vector.load %arg6[%c4, %c0_12] : memref<27x512xf32, #tpu.memory_space<vmem>>, vector<1x512xf32>
    %24 = vector.broadcast %23 : vector<1x512xf32> to vector<8x512xf32>
    %25 = arith.mulf %22, %24 : vector<8x512xf32>
    %c32 = arith.constant 32 : index
    %c0_13 = arith.constant 0 : index
    %26 = vector.load %arg9[%c32, %c0_13] : memref<72x512xf32, #tpu.memory_space<vmem>>, vector<8x512xf32>
    tpu.vector_store %arg9[%c32, %c0_13], %25 {strides = array<i32>} : memref<72x512xf32, #tpu.memory_space<vmem>>, vector<8x512xf32>,
    %c63_i32 = arith.constant 63 : i32
    %27 = tpu.dynamic_rotate %1 by %c63_i32 dim 1 : vector<8x512xf32>, i32 -> vector<8x512xf32>
    %c5 = arith.constant 5 : index
    %c0_14 = arith.constant 0 : index
    %28 = vector.load %arg6[%c5, %c0_14] : memref<27x512xf32, #tpu.memory_space<vmem>>, vector<1x512xf32>
    %29 = vector.broadcast %28 : vector<1x512xf32> to vector<8x512xf32>
    %30 = arith.mulf %27, %29 : vector<8x512xf32>
    %c40 = arith.constant 40 : index
    %c0_15 = arith.constant 0 : index
    %31 = vector.load %arg9[%c40, %c0_15] : memref<72x512xf32, #tpu.memory_space<vmem>>, vector<8x512xf32>
    tpu.vector_store %arg9[%c40, %c0_15], %30 {strides = array<i32>} : memref<72x512xf32, #tpu.memory_space<vmem>>, vector<8x512xf32>,
    %c57_i32 = arith.constant 57 : i32
    %32 = tpu.dynamic_rotate %1 by %c57_i32 dim 1 : vector<8x512xf32>, i32 -> vector<8x512xf32>
    %c6 = arith.constant 6 : index
    %c0_16 = arith.constant 0 : index
    %33 = vector.load %arg6[%c6, %c0_16] : memref<27x512xf32, #tpu.memory_space<vmem>>, vector<1x512xf32>
    %34 = vector.broadcast %33 : vector<1x512xf32> to vector<8x512xf32>
    %35 = arith.mulf %32, %34 : vector<8x512xf32>
    %c48 = arith.constant 48 : index
    %c0_17 = arith.constant 0 : index
    %36 = vector.load %arg9[%c48, %c0_17] : memref<72x512xf32, #tpu.memory_space<vmem>>, vector<8x512xf32>
    tpu.vector_store %arg9[%c48, %c0_17], %35 {strides = array<i32>} : memref<72x512xf32, #tpu.memory_space<vmem>>, vector<8x512xf32>,
    %c56_i32 = arith.constant 56 : i32
    %37 = tpu.dynamic_rotate %1 by %c56_i32 dim 1 : vector<8x512xf32>, i32 -> vector<8x512xf32>
    %c7 = arith.constant 7 : index
    %c0_18 = arith.constant 0 : index
    %38 = vector.load %arg6[%c7, %c0_18] : memref<27x512xf32, #tpu.memory_space<vmem>>, vector<1x512xf32>
    %39 = vector.broadcast %38 : vector<1x512xf32> to vector<8x512xf32>
    %40 = arith.mulf %37, %39 : vector<8x512xf32>
    %c56 = arith.constant 56 : index
    %c0_19 = arith.constant 0 : index
    %41 = vector.load %arg9[%c56, %c0_19] : memref<72x512xf32, #tpu.memory_space<vmem>>, vector<8x512xf32>
    tpu.vector_store %arg9[%c56, %c0_19], %40 {strides = array<i32>} : memref<72x512xf32, #tpu.memory_space<vmem>>, vector<8x512xf32>,
    %c55_i32 = arith.constant 55 : i32
    %42 = tpu.dynamic_rotate %1 by %c55_i32 dim 1 : vector<8x512xf32>, i32 -> vector<8x512xf32>
    %c8_20 = arith.constant 8 : index
    %c0_21 = arith.constant 0 : index
    %43 = vector.load %arg6[%c8_20, %c0_21] : memref<27x512xf32, #tpu.memory_space<vmem>>, vector<1x512xf32>
    %44 = vector.broadcast %43 : vector<1x512xf32> to vector<8x512xf32>
    %45 = arith.mulf %42, %44 : vector<8x512xf32>
    %c64 = arith.constant 64 : index
    %c0_22 = arith.constant 0 : index
    %46 = vector.load %arg9[%c64, %c0_22] : memref<72x512xf32, #tpu.memory_space<vmem>>, vector<8x512xf32>
    tpu.vector_store %arg9[%c64, %c0_22], %45 {strides = array<i32>} : memref<72x512xf32, #tpu.memory_space<vmem>>, vector<8x512xf32>,
    %c0_23 = arith.constant 0 : index
    %c0_24 = arith.constant 0 : index
    %c0_25 = arith.constant 0 : index
    %47 = vector.load %arg2[%c0_23, %c0_24, %c0_25] : memref<3x8x72xf32, #tpu.memory_space<vmem>>, vector<1x8x72xf32>
    %48 = vector.shape_cast %47 : vector<1x8x72xf32> to vector<8x72xf32>
    %c0_26 = arith.constant 0 : index
    %c0_27 = arith.constant 0 : index
    %49 = vector.load %arg9[%c0_26, %c0_27] : memref<72x512xf32, #tpu.memory_space<vmem>>, vector<72x512xf32>
    %cst = arith.constant dense<0.000000e+00> : vector<8x512xf32>
    %50 = tpu.matmul %48, %49, %cst {dimension_numbers = #tpu.dot_dimension_numbers<[1], [0], [0], [1], [0, 0, 1, 1], [], []>} : vector<8x72xf32>, vector<72x512xf32>, vector<8x512xf32> -> vector<8x512xf32>
    %c0_28 = arith.constant 0 : index
    %c0_29 = arith.constant 0 : index
    %51 = vector.load %arg10[%c0_28, %c0_29] : memref<8x512xf32, #tpu.memory_space<vmem>>, vector<8x512xf32>
    tpu.vector_store %arg10[%c0_28, %c0_29], %50 {strides = array<i32>} : memref<8x512xf32, #tpu.memory_space<vmem>>, vector<8x512xf32>,
    %c9_i32 = arith.constant 9 : i32
    %52 = tpu.dynamic_rotate %1 by %c9_i32 dim 1 : vector<8x512xf32>, i32 -> vector<8x512xf32>
    %c9 = arith.constant 9 : index
    %c0_30 = arith.constant 0 : index
    %53 = vector.load %arg6[%c9, %c0_30] : memref<27x512xf32, #tpu.memory_space<vmem>>, vector<1x512xf32>
    %54 = vector.broadcast %53 : vector<1x512xf32> to vector<8x512xf32>
    %55 = arith.mulf %52, %54 : vector<8x512xf32>
    %c0_31 = arith.constant 0 : index
    %c0_32 = arith.constant 0 : index
    %56 = vector.load %arg9[%c0_31, %c0_32] : memref<72x512xf32, #tpu.memory_space<vmem>>, vector<8x512xf32>
    tpu.vector_store %arg9[%c0_31, %c0_32], %55 {strides = array<i32>} : memref<72x512xf32, #tpu.memory_space<vmem>>, vector<8x512xf32>,
    %c8_i32 = arith.constant 8 : i32
    %57 = tpu.dynamic_rotate %1 by %c8_i32 dim 1 : vector<8x512xf32>, i32 -> vector<8x512xf32>
    %c10 = arith.constant 10 : index
    %c0_33 = arith.constant 0 : index
    %58 = vector.load %arg6[%c10, %c0_33] : memref<27x512xf32, #tpu.memory_space<vmem>>, vector<1x512xf32>
    %59 = vector.broadcast %58 : vector<1x512xf32> to vector<8x512xf32>
    %60 = arith.mulf %57, %59 : vector<8x512xf32>
    %c8_34 = arith.constant 8 : index
    %c0_35 = arith.constant 0 : index
    %61 = vector.load %arg9[%c8_34, %c0_35] : memref<72x512xf32, #tpu.memory_space<vmem>>, vector<8x512xf32>
    tpu.vector_store %arg9[%c8_34, %c0_35], %60 {strides = array<i32>} : memref<72x512xf32, #tpu.memory_space<vmem>>, vector<8x512xf32>,
    %c7_i32 = arith.constant 7 : i32
    %62 = tpu.dynamic_rotate %1 by %c7_i32 dim 1 : vector<8x512xf32>, i32 -> vector<8x512xf32>
    %c11 = arith.constant 11 : index
    %c0_36 = arith.constant 0 : index
    %63 = vector.load %arg6[%c11, %c0_36] : memref<27x512xf32, #tpu.memory_space<vmem>>, vector<1x512xf32>
    %64 = vector.broadcast %63 : vector<1x512xf32> to vector<8x512xf32>
    %65 = arith.mulf %62, %64 : vector<8x512xf32>
    %c16_37 = arith.constant 16 : index
    %c0_38 = arith.constant 0 : index
    %66 = vector.load %arg9[%c16_37, %c0_38] : memref<72x512xf32, #tpu.memory_space<vmem>>, vector<8x512xf32>
    tpu.vector_store %arg9[%c16_37, %c0_38], %65 {strides = array<i32>} : memref<72x512xf32, #tpu.memory_space<vmem>>, vector<8x512xf32>,
    %c1_i32 = arith.constant 1 : i32
    %67 = tpu.dynamic_rotate %1 by %c1_i32 dim 1 : vector<8x512xf32>, i32 -> vector<8x512xf32>
    %c12 = arith.constant 12 : index
    %c0_39 = arith.constant 0 : index
    %68 = vector.load %arg6[%c12, %c0_39] : memref<27x512xf32, #tpu.memory_space<vmem>>, vector<1x512xf32>
    %69 = vector.broadcast %68 : vector<1x512xf32> to vector<8x512xf32>
    %70 = arith.mulf %67, %69 : vector<8x512xf32>
    %c24_40 = arith.constant 24 : index
    %c0_41 = arith.constant 0 : index
    %71 = vector.load %arg9[%c24_40, %c0_41] : memref<72x512xf32, #tpu.memory_space<vmem>>, vector<8x512xf32>
    tpu.vector_store %arg9[%c24_40, %c0_41], %70 {strides = array<i32>} : memref<72x512xf32, #tpu.memory_space<vmem>>, vector<8x512xf32>,
    %c13 = arith.constant 13 : index
    %c0_42 = arith.constant 0 : index
    %72 = vector.load %arg6[%c13, %c0_42] : memref<27x512xf32, #tpu.memory_space<vmem>>, vector<1x512xf32>
    %73 = vector.broadcast %72 : vector<1x512xf32> to vector<8x512xf32>
    %74 = arith.mulf %1, %73 : vector<8x512xf32>
    %c32_43 = arith.constant 32 : index
    %c0_44 = arith.constant 0 : index
    %75 = vector.load %arg9[%c32_43, %c0_44] : memref<72x512xf32, #tpu.memory_space<vmem>>, vector<8x512xf32>
    tpu.vector_store %arg9[%c32_43, %c0_44], %74 {strides = array<i32>} : memref<72x512xf32, #tpu.memory_space<vmem>>, vector<8x512xf32>,
    %c511_i32 = arith.constant 511 : i32
    %76 = tpu.dynamic_rotate %1 by %c511_i32 dim 1 : vector<8x512xf32>, i32 -> vector<8x512xf32>
    %c14 = arith.constant 14 : index
    %c0_45 = arith.constant 0 : index
    %77 = vector.load %arg6[%c14, %c0_45] : memref<27x512xf32, #tpu.memory_space<vmem>>, vector<1x512xf32>
    %78 = vector.broadcast %77 : vector<1x512xf32> to vector<8x512xf32>
    %79 = arith.mulf %76, %78 : vector<8x512xf32>
    %c40_46 = arith.constant 40 : index
    %c0_47 = arith.constant 0 : index
    %80 = vector.load %arg9[%c40_46, %c0_47] : memref<72x512xf32, #tpu.memory_space<vmem>>, vector<8x512xf32>
    tpu.vector_store %arg9[%c40_46, %c0_47], %79 {strides = array<i32>} : memref<72x512xf32, #tpu.memory_space<vmem>>, vector<8x512xf32>,
    %c505_i32 = arith.constant 505 : i32
    %81 = tpu.dynamic_rotate %1 by %c505_i32 dim 1 : vector<8x512xf32>, i32 -> vector<8x512xf32>
    %c15 = arith.constant 15 : index
    %c0_48 = arith.constant 0 : index
    %82 = vector.load %arg6[%c15, %c0_48] : memref<27x512xf32, #tpu.memory_space<vmem>>, vector<1x512xf32>
    %83 = vector.broadcast %82 : vector<1x512xf32> to vector<8x512xf32>
    %84 = arith.mulf %81, %83 : vector<8x512xf32>
    %c48_49 = arith.constant 48 : index
    %c0_50 = arith.constant 0 : index
    %85 = vector.load %arg9[%c48_49, %c0_50] : memref<72x512xf32, #tpu.memory_space<vmem>>, vector<8x512xf32>
    tpu.vector_store %arg9[%c48_49, %c0_50], %84 {strides = array<i32>} : memref<72x512xf32, #tpu.memory_space<vmem>>, vector<8x512xf32>,
    %c504_i32 = arith.constant 504 : i32
    %86 = tpu.dynamic_rotate %1 by %c504_i32 dim 1 : vector<8x512xf32>, i32 -> vector<8x512xf32>
    %c16_51 = arith.constant 16 : index
    %c0_52 = arith.constant 0 : index
    %87 = vector.load %arg6[%c16_51, %c0_52] : memref<27x512xf32, #tpu.memory_space<vmem>>, vector<1x512xf32>
    %88 = vector.broadcast %87 : vector<1x512xf32> to vector<8x512xf32>
    %89 = arith.mulf %86, %88 : vector<8x512xf32>
    %c56_53 = arith.constant 56 : index
    %c0_54 = arith.constant 0 : index
    %90 = vector.load %arg9[%c56_53, %c0_54] : memref<72x512xf32, #tpu.memory_space<vmem>>, vector<8x512xf32>
    tpu.vector_store %arg9[%c56_53, %c0_54], %89 {strides = array<i32>} : memref<72x512xf32, #tpu.memory_space<vmem>>, vector<8x512xf32>,
    %c503_i32 = arith.constant 503 : i32
    %91 = tpu.dynamic_rotate %1 by %c503_i32 dim 1 : vector<8x512xf32>, i32 -> vector<8x512xf32>
    %c17 = arith.constant 17 : index
    %c0_55 = arith.constant 0 : index
    %92 = vector.load %arg6[%c17, %c0_55] : memref<27x512xf32, #tpu.memory_space<vmem>>, vector<1x512xf32>
    %93 = vector.broadcast %92 : vector<1x512xf32> to vector<8x512xf32>
    %94 = arith.mulf %91, %93 : vector<8x512xf32>
    %c64_56 = arith.constant 64 : index
    %c0_57 = arith.constant 0 : index
    %95 = vector.load %arg9[%c64_56, %c0_57] : memref<72x512xf32, #tpu.memory_space<vmem>>, vector<8x512xf32>
    tpu.vector_store %arg9[%c64_56, %c0_57], %94 {strides = array<i32>} : memref<72x512xf32, #tpu.memory_space<vmem>>, vector<8x512xf32>,
    %c1_58 = arith.constant 1 : index
    %c0_59 = arith.constant 0 : index
    %c0_60 = arith.constant 0 : index
    %96 = vector.load %arg2[%c1_58, %c0_59, %c0_60] : memref<3x8x72xf32, #tpu.memory_space<vmem>>, vector<1x8x72xf32>
    %97 = vector.shape_cast %96 : vector<1x8x72xf32> to vector<8x72xf32>
    %c0_61 = arith.constant 0 : index
    %c0_62 = arith.constant 0 : index
    %98 = vector.load %arg9[%c0_61, %c0_62] : memref<72x512xf32, #tpu.memory_space<vmem>>, vector<72x512xf32>
    %cst_63 = arith.constant dense<0.000000e+00> : vector<8x512xf32>
    %99 = tpu.matmul %97, %98, %cst_63 {dimension_numbers = #tpu.dot_dimension_numbers<[1], [0], [0], [1], [0, 0, 1, 1], [], []>} : vector<8x72xf32>, vector<72x512xf32>, vector<8x512xf32> -> vector<8x512xf32>
    %c0_64 = arith.constant 0 : index
    %c0_65 = arith.constant 0 : index
    %100 = vector.load %arg10[%c0_64, %c0_65] : memref<8x512xf32, #tpu.memory_space<vmem>>, vector<8x512xf32>
    %101 = arith.addf %100, %99 : vector<8x512xf32>
    %c0_66 = arith.constant 0 : index
    %c0_67 = arith.constant 0 : index
    %102 = vector.load %arg10[%c0_66, %c0_67] : memref<8x512xf32, #tpu.memory_space<vmem>>, vector<8x512xf32>
    tpu.vector_store %arg10[%c0_66, %c0_67], %101 {strides = array<i32>} : memref<8x512xf32, #tpu.memory_space<vmem>>, vector<8x512xf32>,
    %c457_i32 = arith.constant 457 : i32
    %103 = tpu.dynamic_rotate %1 by %c457_i32 dim 1 : vector<8x512xf32>, i32 -> vector<8x512xf32>
    %c18 = arith.constant 18 : index
    %c0_68 = arith.constant 0 : index
    %104 = vector.load %arg6[%c18, %c0_68] : memref<27x512xf32, #tpu.memory_space<vmem>>, vector<1x512xf32>
    %105 = vector.broadcast %104 : vector<1x512xf32> to vector<8x512xf32>
    %106 = arith.mulf %103, %105 : vector<8x512xf32>
    %c0_69 = arith.constant 0 : index
    %c0_70 = arith.constant 0 : index
    %107 = vector.load %arg9[%c0_69, %c0_70] : memref<72x512xf32, #tpu.memory_space<vmem>>, vector<8x512xf32>
    tpu.vector_store %arg9[%c0_69, %c0_70], %106 {strides = array<i32>} : memref<72x512xf32, #tpu.memory_space<vmem>>, vector<8x512xf32>,
    %c456_i32 = arith.constant 456 : i32
    %108 = tpu.dynamic_rotate %1 by %c456_i32 dim 1 : vector<8x512xf32>, i32 -> vector<8x512xf32>
    %c19 = arith.constant 19 : index
    %c0_71 = arith.constant 0 : index
    %109 = vector.load %arg6[%c19, %c0_71] : memref<27x512xf32, #tpu.memory_space<vmem>>, vector<1x512xf32>
    %110 = vector.broadcast %109 : vector<1x512xf32> to vector<8x512xf32>
    %111 = arith.mulf %108, %110 : vector<8x512xf32>
    %c8_72 = arith.constant 8 : index
    %c0_73 = arith.constant 0 : index
    %112 = vector.load %arg9[%c8_72, %c0_73] : memref<72x512xf32, #tpu.memory_space<vmem>>, vector<8x512xf32>
    tpu.vector_store %arg9[%c8_72, %c0_73], %111 {strides = array<i32>} : memref<72x512xf32, #tpu.memory_space<vmem>>, vector<8x512xf32>,
    %c455_i32 = arith.constant 455 : i32
    %113 = tpu.dynamic_rotate %1 by %c455_i32 dim 1 : vector<8x512xf32>, i32 -> vector<8x512xf32>
    %c20 = arith.constant 20 : index
    %c0_74 = arith.constant 0 : index
    %114 = vector.load %arg6[%c20, %c0_74] : memref<27x512xf32, #tpu.memory_space<vmem>>, vector<1x512xf32>
    %115 = vector.broadcast %114 : vector<1x512xf32> to vector<8x512xf32>
    %116 = arith.mulf %113, %115 : vector<8x512xf32>
    %c16_75 = arith.constant 16 : index
    %c0_76 = arith.constant 0 : index
    %117 = vector.load %arg9[%c16_75, %c0_76] : memref<72x512xf32, #tpu.memory_space<vmem>>, vector<8x512xf32>
    tpu.vector_store %arg9[%c16_75, %c0_76], %116 {strides = array<i32>} : memref<72x512xf32, #tpu.memory_space<vmem>>, vector<8x512xf32>,
    %c449_i32 = arith.constant 449 : i32
    %118 = tpu.dynamic_rotate %1 by %c449_i32 dim 1 : vector<8x512xf32>, i32 -> vector<8x512xf32>
    %c21 = arith.constant 21 : index
    %c0_77 = arith.constant 0 : index
    %119 = vector.load %arg6[%c21, %c0_77] : memref<27x512xf32, #tpu.memory_space<vmem>>, vector<1x512xf32>
    %120 = vector.broadcast %119 : vector<1x512xf32> to vector<8x512xf32>
    %121 = arith.mulf %118, %120 : vector<8x512xf32>
    %c24_78 = arith.constant 24 : index
    %c0_79 = arith.constant 0 : index
    %122 = vector.load %arg9[%c24_78, %c0_79] : memref<72x512xf32, #tpu.memory_space<vmem>>, vector<8x512xf32>
    tpu.vector_store %arg9[%c24_78, %c0_79], %121 {strides = array<i32>} : memref<72x512xf32, #tpu.memory_space<vmem>>, vector<8x512xf32>,
    %c448_i32 = arith.constant 448 : i32
    %123 = tpu.dynamic_rotate %1 by %c448_i32 dim 1 : vector<8x512xf32>, i32 -> vector<8x512xf32>
    %c22 = arith.constant 22 : index
    %c0_80 = arith.constant 0 : index
    %124 = vector.load %arg6[%c22, %c0_80] : memref<27x512xf32, #tpu.memory_space<vmem>>, vector<1x512xf32>
    %125 = vector.broadcast %124 : vector<1x512xf32> to vector<8x512xf32>
    %126 = arith.mulf %123, %125 : vector<8x512xf32>
    %c32_81 = arith.constant 32 : index
    %c0_82 = arith.constant 0 : index
    %127 = vector.load %arg9[%c32_81, %c0_82] : memref<72x512xf32, #tpu.memory_space<vmem>>, vector<8x512xf32>
    tpu.vector_store %arg9[%c32_81, %c0_82], %126 {strides = array<i32>} : memref<72x512xf32, #tpu.memory_space<vmem>>, vector<8x512xf32>,
    %c447_i32 = arith.constant 447 : i32
    %128 = tpu.dynamic_rotate %1 by %c447_i32 dim 1 : vector<8x512xf32>, i32 -> vector<8x512xf32>
    %c23 = arith.constant 23 : index
    %c0_83 = arith.constant 0 : index
    %129 = vector.load %arg6[%c23, %c0_83] : memref<27x512xf32, #tpu.memory_space<vmem>>, vector<1x512xf32>
    %130 = vector.broadcast %129 : vector<1x512xf32> to vector<8x512xf32>
    %131 = arith.mulf %128, %130 : vector<8x512xf32>
    %c40_84 = arith.constant 40 : index
    %c0_85 = arith.constant 0 : index
    %132 = vector.load %arg9[%c40_84, %c0_85] : memref<72x512xf32, #tpu.memory_space<vmem>>, vector<8x512xf32>
    tpu.vector_store %arg9[%c40_84, %c0_85], %131 {strides = array<i32>} : memref<72x512xf32, #tpu.memory_space<vmem>>, vector<8x512xf32>,
    %c441_i32 = arith.constant 441 : i32
    %133 = tpu.dynamic_rotate %1 by %c441_i32 dim 1 : vector<8x512xf32>, i32 -> vector<8x512xf32>
    %c24_86 = arith.constant 24 : index
    %c0_87 = arith.constant 0 : index
    %134 = vector.load %arg6[%c24_86, %c0_87] : memref<27x512xf32, #tpu.memory_space<vmem>>, vector<1x512xf32>
    %135 = vector.broadcast %134 : vector<1x512xf32> to vector<8x512xf32>
    %136 = arith.mulf %133, %135 : vector<8x512xf32>
    %c48_88 = arith.constant 48 : index
    %c0_89 = arith.constant 0 : index
    %137 = vector.load %arg9[%c48_88, %c0_89] : memref<72x512xf32, #tpu.memory_space<vmem>>, vector<8x512xf32>
    tpu.vector_store %arg9[%c48_88, %c0_89], %136 {strides = array<i32>} : memref<72x512xf32, #tpu.memory_space<vmem>>, vector<8x512xf32>,
    %c440_i32 = arith.constant 440 : i32
    %138 = tpu.dynamic_rotate %1 by %c440_i32 dim 1 : vector<8x512xf32>, i32 -> vector<8x512xf32>
    %c25 = arith.constant 25 : index
    %c0_90 = arith.constant 0 : index
    %139 = vector.load %arg6[%c25, %c0_90] : memref<27x512xf32, #tpu.memory_space<vmem>>, vector<1x512xf32>
    %140 = vector.broadcast %139 : vector<1x512xf32> to vector<8x512xf32>
    %141 = arith.mulf %138, %140 : vector<8x512xf32>
    %c56_91 = arith.constant 56 : index
    %c0_92 = arith.constant 0 : index
    %142 = vector.load %arg9[%c56_91, %c0_92] : memref<72x512xf32, #tpu.memory_space<vmem>>, vector<8x512xf32>
    tpu.vector_store %arg9[%c56_91, %c0_92], %141 {strides = array<i32>} : memref<72x512xf32, #tpu.memory_space<vmem>>, vector<8x512xf32>,
    %c439_i32 = arith.constant 439 : i32
    %143 = tpu.dynamic_rotate %1 by %c439_i32 dim 1 : vector<8x512xf32>, i32 -> vector<8x512xf32>
    %c26 = arith.constant 26 : index
    %c0_93 = arith.constant 0 : index
    %144 = vector.load %arg6[%c26, %c0_93] : memref<27x512xf32, #tpu.memory_space<vmem>>, vector<1x512xf32>
    %145 = vector.broadcast %144 : vector<1x512xf32> to vector<8x512xf32>
    %146 = arith.mulf %143, %145 : vector<8x512xf32>
    %c64_94 = arith.constant 64 : index
    %c0_95 = arith.constant 0 : index
    %147 = vector.load %arg9[%c64_94, %c0_95] : memref<72x512xf32, #tpu.memory_space<vmem>>, vector<8x512xf32>
    tpu.vector_store %arg9[%c64_94, %c0_95], %146 {strides = array<i32>} : memref<72x512xf32, #tpu.memory_space<vmem>>, vector<8x512xf32>,
    %c2_96 = arith.constant 2 : index
    %c0_97 = arith.constant 0 : index
    %c0_98 = arith.constant 0 : index
    %148 = vector.load %arg2[%c2_96, %c0_97, %c0_98] : memref<3x8x72xf32, #tpu.memory_space<vmem>>, vector<1x8x72xf32>
    %149 = vector.shape_cast %148 : vector<1x8x72xf32> to vector<8x72xf32>
    %c0_99 = arith.constant 0 : index
    %c0_100 = arith.constant 0 : index
    %150 = vector.load %arg9[%c0_99, %c0_100] : memref<72x512xf32, #tpu.memory_space<vmem>>, vector<72x512xf32>
    %cst_101 = arith.constant dense<0.000000e+00> : vector<8x512xf32>
    %151 = tpu.matmul %149, %150, %cst_101 {dimension_numbers = #tpu.dot_dimension_numbers<[1], [0], [0], [1], [0, 0, 1, 1], [], []>} : vector<8x72xf32>, vector<72x512xf32>, vector<8x512xf32> -> vector<8x512xf32>
    %c0_102 = arith.constant 0 : index
    %c0_103 = arith.constant 0 : index
    %152 = vector.load %arg10[%c0_102, %c0_103] : memref<8x512xf32, #tpu.memory_space<vmem>>, vector<8x512xf32>
    %153 = arith.addf %152, %151 : vector<8x512xf32>
    %c0_104 = arith.constant 0 : index
    %c0_105 = arith.constant 0 : index
    %154 = vector.load %arg10[%c0_104, %c0_105] : memref<8x512xf32, #tpu.memory_space<vmem>>, vector<8x512xf32>
    tpu.vector_store %arg10[%c0_104, %c0_105], %153 {strides = array<i32>} : memref<8x512xf32, #tpu.memory_space<vmem>>, vector<8x512xf32>,
    %c0_106 = arith.constant 0 : index
    %c0_107 = arith.constant 0 : index
    %155 = vector.load %arg10[%c0_106, %c0_107] : memref<8x512xf32, #tpu.memory_space<vmem>>, vector<8x512xf32>
    %c0_108 = arith.constant 0 : index
    %c0_109 = arith.constant 0 : index
    %156 = vector.load %arg3[%c0_108, %c0_109] : memref<8x1xf32, #tpu.memory_space<vmem>>, vector<8x1xf32>
    %157 = vector.broadcast %156 : vector<8x1xf32> to vector<8x512xf32>
    %158 = arith.addf %155, %157 : vector<8x512xf32>
    %cst_110 = arith.constant dense<0.000000e+00> : vector<8xf32>
    %159 = vector.multi_reduction <add>, %158, %cst_110 [1] : vector<8x512xf32> to vector<8xf32>
    %160 = vector.shape_cast %159 : vector<8xf32> to vector<8x1xf32>
    %161 = arith.mulf %158, %158 : vector<8x512xf32>
    %cst_111 = arith.constant dense<0.000000e+00> : vector<8xf32>
    %162 = vector.multi_reduction <add>, %161, %cst_111 [1] : vector<8x512xf32> to vector<8xf32>
    %163 = vector.shape_cast %162 : vector<8xf32> to vector<8x1xf32>
    %cst_112 = arith.constant 0.001953125 : f32
    %164 = vector.broadcast %cst_112 : f32 to vector<8x1xf32>
    %165 = arith.mulf %160, %164 : vector<8x1xf32>
    %cst_113 = arith.constant 0.001953125 : f32
    %166 = vector.broadcast %cst_113 : f32 to vector<8x1xf32>
    %167 = arith.mulf %163, %166 : vector<8x1xf32>
    %168 = arith.mulf %165, %165 : vector<8x1xf32>
    %169 = arith.subf %167, %168 : vector<8x1xf32>
    %cst_114 = arith.constant 0.000000e+00 : f32
    %170 = vector.broadcast %cst_114 : f32 to vector<8x1xf32>
    %171 = arith.maximumf %169, %170 : vector<8x1xf32>
    %cst_115 = arith.constant 9.99999974E-6 : f32
    %172 = vector.broadcast %cst_115 : f32 to vector<8x1xf32>
    %173 = arith.addf %171, %172 : vector<8x1xf32>
    %174 = math.rsqrt %173 : vector<8x1xf32>
    %c0_116 = arith.constant 0 : index
    %c0_117 = arith.constant 0 : index
    %c0_118 = arith.constant 0 : index
    %175 = vector.load %arg4[%c0_116, %c0_117, %c0_118] : memref<1x8x1xf32, #tpu.memory_space<vmem>>, vector<1x8x1xf32>
    %176 = vector.shape_cast %175 : vector<1x8x1xf32> to vector<8x1xf32>
    %177 = arith.mulf %174, %176 : vector<8x1xf32>
    %c0_119 = arith.constant 0 : index
    %c0_120 = arith.constant 0 : index
    %c0_121 = arith.constant 0 : index
    %178 = vector.load %arg5[%c0_119, %c0_120, %c0_121] : memref<1x8x1xf32, #tpu.memory_space<vmem>>, vector<1x8x1xf32>
    %179 = vector.shape_cast %178 : vector<1x8x1xf32> to vector<8x1xf32>
    %180 = arith.mulf %165, %177 : vector<8x1xf32>
    %181 = arith.subf %179, %180 : vector<8x1xf32>
    %182 = vector.broadcast %177 : vector<8x1xf32> to vector<8x512xf32>
    %183 = arith.mulf %158, %182 : vector<8x512xf32>
    %184 = vector.broadcast %181 : vector<8x1xf32> to vector<8x512xf32>
    %185 = arith.addf %183, %184 : vector<8x512xf32>
    %186 = arith.negf %185 : vector<8x512xf32>
    %187 = math.exp %186 : vector<8x512xf32>
    %cst_122 = arith.constant 1.000000e+00 : f32
    %188 = vector.broadcast %cst_122 : f32 to vector<8x512xf32>
    %189 = arith.addf %188, %187 : vector<8x512xf32>
    %190 = arith.divf %188, %189 : vector<8x512xf32>
    %191 = arith.mulf %185, %190 : vector<8x512xf32>
    %192 = arith.addf %191, %1 : vector<8x512xf32>
    %c0_123 = arith.constant 0 : index
    %c0_124 = arith.constant 0 : index
    %c0_125 = arith.constant 0 : index
    %193 = vector.load %arg8[%c0_123, %c0_124, %c0_125] : memref<1x8x512xf32, #tpu.memory_space<vmem>>, vector<1x8x512xf32>
    %194 = vector.shape_cast %193 : vector<1x8x512xf32> to vector<8x512xf32>
    %195 = vector.shape_cast %192 : vector<8x512xf32> to vector<1x8x512xf32>
    tpu.vector_store %arg8[%c0_123, %c0_124, %c0_125], %195 {strides = array<i32>} : memref<1x8x512xf32, #tpu.memory_space<vmem>>, vector<1x8x512xf32>,
    return
  }
  func.func @transform_0(%arg0: i32) -> (i32, i32, i32) {
    %c0_i32 = arith.constant 0 : i32
    %c0_i32_0 = arith.constant 0 : i32
    %c0_i32_1 = arith.constant 0 : i32
    return %arg0, %c0_i32, %c0_i32_0 : i32, i32, i32
  }
  func.func @transform_1(%arg0: i32) -> (i32, i32, i32) {
    %c0_i32 = arith.constant 0 : i32
    %c0_i32_0 = arith.constant 0 : i32
    %c0_i32_1 = arith.constant 0 : i32
    %c0_i32_2 = arith.constant 0 : i32
    return %c0_i32, %c0_i32_0, %c0_i32_1 : i32, i32, i32
  }
  func.func @transform_2(%arg0: i32) -> (i32, i32) {
    %c0_i32 = arith.constant 0 : i32
    %c0_i32_0 = arith.constant 0 : i32
    %c0_i32_1 = arith.constant 0 : i32
    return %c0_i32, %c0_i32_0 : i32, i32
  }
  func.func @transform_3(%arg0: i32) -> (i32, i32, i32) {
    %c0_i32 = arith.constant 0 : i32
    %c0_i32_0 = arith.constant 0 : i32
    %c0_i32_1 = arith.constant 0 : i32
    return %arg0, %c0_i32, %c0_i32_0 : i32, i32, i32
  }
  func.func @transform_4(%arg0: i32) -> (i32, i32, i32) {
    %c0_i32 = arith.constant 0 : i32
    %c0_i32_0 = arith.constant 0 : i32
    %c0_i32_1 = arith.constant 0 : i32
    return %arg0, %c0_i32, %c0_i32_0 : i32, i32, i32
  }
  func.func @transform_5(%arg0: i32) -> (i32, i32) {
    %c0_i32 = arith.constant 0 : i32
    %c0_i32_0 = arith.constant 0 : i32
    %c0_i32_1 = arith.constant 0 : i32
    return %c0_i32, %c0_i32_0 : i32, i32
  }
  func.func @transform_6(%arg0: i32) -> (i32, i32) {
    %c0_i32 = arith.constant 0 : i32
    %c0_i32_0 = arith.constant 0 : i32
    %c0_i32_1 = arith.constant 0 : i32
    return %c0_i32, %c0_i32_0 : i32, i32
  }
  func.func @transform_7(%arg0: i32) -> (i32, i32, i32) {
    %c0_i32 = arith.constant 0 : i32
    %c0_i32_0 = arith.constant 0 : i32
    %c0_i32_1 = arith.constant 0 : i32
    return %arg0, %c0_i32, %c0_i32_0 : i32, i32, i32
  }
}

</mosaic_0001>

<bundles_post_ra>
// kernel: tpu_custom_call.1
= control target key start
LH: loop header
LB: loop body
LE: loop exit
PB: predicated region body
PF: predicated region fallthrough
CT: control target
= control target key end

     0   :  { %12 = vsyncpa [#allocation5], 0  ;;  %s2965_s0 = inlined_call_operand.hbm [shape: f32[2,8,512], index: 0, kind: input, shape index: {}]   ;;  %s2966_s1 = inlined_call_operand.vmem [shape: f32[3,8,72], index: 1, kind: input, shape index: {}]   ;;  %s2967_s2 = inlined_call_operand.vmem [shape: f32[8,1], index: 2, kind: input, shape index: {}]   ;;  %s2968_s3 = inlined_call_operand.vmem [shape: f32[2,8,1], index: 3, kind: input, shape index: {}]   ;;  %s2969_s4 = inlined_call_operand.vmem [shape: f32[2,8,1], index: 4, kind: input, shape index: {}]   ;;  %s2970_s5 = inlined_call_operand.hbm [shape: f32[27,512], index: 5, kind: input, shape index: {}]   ;;  %s2971_s6 = inlined_call_operand.vmem [shape: f32[8,8], index: 6, kind: input, shape index: {}]   ;;  %s2972_s7 = inlined_call_operand.hbm [shape: f32[2,8,512], index: 7, kind: output, shape index: {}]  }
   0x1   :  { %14 = vsyncpa [#allocation5 + $0x1], 0 }
   0x2   :  { %15 = vsyncpa [#allocation8], 0 }
   0x3   :  { %16 = vsyncpa [#allocation6], 0 }
   0x4   :  { %18 = vsyncpa [#allocation6 + $0x1], 0  ;;  %s2086_s24 = smov 0   ;;  %s2088_s25 = smov 0  }
   0x5   :  { %s2090_s26 = smov 0   ;;  %s2092_s27 = smov 0  }
   0x6 LB: > { %s234_s29 = sshll.u32 %s2970_s5, 4  ;;  %s2110_s30 = sadd.s32 4294967295, %s2023_s27   ;;  %s2023_s27 = sphi %s2092_s27, %s3010_s27   ;;  %s2019_s26 = sphi %s2090_s26, %s3009_s26   ;;  %s2015_s25 = sphi %s2088_s25, %s3008_s25   ;;  %s2011_s24 = sphi %s2086_s24, %s3007_s24   ;;  %s235_s29 = int_to_ptr.hbm [resolvable:$true] %s234_s29 }
   0x7   : > { %p1755_p0 = scmp.ge.s32.totalorder %s2023_s27, 1  ;;  %p45_p1 = scmp.eq.s32.totalorder %s2110_s30, 0 }
   0x8   : > { %p217_p2 = scmp.lt.s32.totalorder %s2023_s27, 3  ;;  %s2025_s9 = smov [#allocation7]  }
   0x9   : > { %s236_s10 = sshll.u32 %s2025_s9, 4  ;;  %s2026_s11 = smov 512   ;;  %s237_s10 = int_to_ptr.vmem [resolvable:$true] %s236_s10 }
   0xa   : > { %p2115_p3 = pnand %p1755_p0, %p217_p2  ;;  %s2027_s12 = smov 32  }
   0xb   : > { %s1754_s13 = sadd.s32 4294967294, %s2023_s27   ;;  %s2126_s14 = sadd.s32 1, %s2023_s27  }
   0xc   : > { %p1800_p4 = pneg %p2115_p3  ;;  %s31_s15 = sadd.s32 1, %s2019_s26 }
   0xd   : > { %s28_s16 = ssub.s32 %s2023_s27, %s2126_s14  ;;  %p38_p7 = scmp.ne.s32.totalorder %s2019_s26, %s2015_s25 }
   0xe   : > { %p1801_p6 = pnand %p1800_p4, %p45_p1  ;;  %p29_p8 = scmp.eq.s32.totalorder %s28_s16, 0 }
   0xf   : > { %p39_p9 = scmp.eq.s32.totalorder %s2023_s27, 0  ;;  %p44_p10 = scmp.ne.s32.totalorder %s2015_s25, %s2011_s24 }
  0x10   : > { %1803 = dma.hbm_to_vmem [thread:$0]  (!%p1801_p6), %s235_s29, 2048, %s237_s10, [#allocation8], %s2026_s11, %s2026_s11, %s2027_s12  }
  0x11   : > { %p204_p11 = scmp.eq.s32.totalorder %s2110_s30, 1  ;;  %p2142_p12 = por %p45_p1, %p44_p10 }
  0x12   : > { %s2138_s17 = scalar_select %p29_p8, %s2019_s26, %s31_s15  }
  0x13   : > { %p2146_p13 = por %p204_p11, %p38_p7  ;;  %p210_p0 = scmp.eq.s32.totalorder %s1754_s13, 1 }
  0x14   : > { %p40_p2 = por %p39_p9, %p38_p7  ;;  %s253_s20 = sand.u32 1, %s2019_s26  }
  0x15   : > { %p2151_p4 = por %p210_p0, %p44_p10  ;;  %p1813_p6 = scmp.lt.s32.totalorder %s2023_s27, 2 }
  0x16   : > { %s1758_s22 = sshll.u32 %s253_s20, 5  ;;  %s1790_s23 = sshll.u32 %s2023_s27, 5 }
  0x17   : > { %s262_s29 = scalar_lea.hbm %s2965_s0, %s1790_s23  ;;  %s257_s10 = scalar_lea.vmem [#allocation4], %s1758_s22 }
  0x18   : > { %s264_s9 = sshll.u32 %s262_s29, 4  ;;  %s266_s11 = sshll.u32 %s257_s10, 4  ;;  %s265_s9 = int_to_ptr.hbm [resolvable:$true] %s264_s9  ;;  %s267_s11 = int_to_ptr.vmem [resolvable:$true] %s266_s11 }
  0x19   : > { %p2160_p8 = pnand %p1813_p6, %p40_p2  ;;  %s254_s13 = scalar_lea.sflag [#allocation5], %s253_s20 }
  0x1a   : > { %s1923_s15 = sshra.s32 %s265_s9, 4  ;;  %s1930_s22 = scalar_lea.hbm %s2965_s0, 64  ;;  %s1924_s15 = int_to_ptr.hbm [resolvable:$true] %s1923_s15 }
  0x1b   : > { %s1925_s16 = scalar_lea.hbm %s1924_s15, 32  ;;  %p1927_p9 = pneg %p2160_p8 }
  0x1c   : > { %p1926_p7 = scmp.ne.s32.totalorder %s1924_s15, %s1925_s16  ;;  %p1931_p0 = scmp.lt.s32.totalorder %s1924_s15, %s2965_s0 }
  0x1d   : > { %p1932_p2 = scmp.lt.s32.totalorder %s1930_s22, %s1925_s16 }
  0x1e   : > { %p1928_p10 = pnand %p1927_p9, %p1926_p7 }
  0x1f   : > { %p1933_p6 = por %p1932_p2, %p1931_p0 }
  0x20   : > { %p1929_p11 = pneg %p1928_p10 }
  0x22   : > { %p1934_p5 = pnand %p1933_p6, %p1929_p11 }
  0x24   : > { %1937 = shalt.err (!%p1934_p5)
}
  0x25   : > { %1807 = dma.hbm_to_vmem [thread:$0]  (!%p2160_p8), %s265_s9, 512, %s267_s11, %s254_s13  }
  0x26   : > { %289 = sbr.rel (%p2115_p3) target bundleno = 789 (0x315), region = 48 }
  0x2b   : > { %s2177_s20 = sand.u32 1, %s2015_s25  }
  0x2c   : > { %s1762_s10 = sshll.u32 %s2177_s20, 5  ;;  %s292_s23 = scalar_lea.sflag [#allocation5], %s2177_s20 }
  0x2d   : > { %s2183_s15 = scalar_lea.vmem [#allocation4], %s1762_s10 }
  0x2e   : > { %1998 = dma.done.wait (%p2142_p12), %s292_s23, 512  }
  0x2f   : > { %2000 = vsyncadd (%p2142_p12), %s292_s23, 4294966784 }
  0x30   : > { %2002 = dma.done.wait (%p45_p1), [#allocation8], 2048  }
  0x31   : > { %2004 = vsyncadd (%p45_p1), [#allocation8], 4294965248  ;;  %v2194_v0 = vld [vmem:[%s2183_s15 + $0x18] sm:$0xff]  ;;  %v2197_v1 = vld [vmem:[%s2183_s15 + $0x8] sm:$0xff]  ;;  %s2028_s8 = smov 55   ;;  %s2029_s9 = smov 56   ;;  %v360_v6 = vlaneseq }
  0x32   : > { %615 = vrot.lane.b32.xlu2 %v2194_v0, %s2028_s8  ;;  %579 = vrot.lane.b32.xlu1 %v2197_v1, %s2029_s9  ;;  %v2203_v2 = vld [vmem:[%s2183_s15 + $0x10] sm:$0xff]  ;;  %s2030_s18 = smov 57   ;;  %v2209_v3 = vld [vmem:[%s2183_s15] sm:$0xff]  ;;  %s2031_s11 = smov 63   ;;  %vm678_vm13 = vcmask 588800  }
  0x33   : > { %611 = vrot.lane.b32.xlu0 %v2197_v1, %s2028_s8  ;;  %s2032_s12 = smov 64   ;;  %s2033_s13 = smov 65   ;;  %v2254_v7 = vand.u32 127, %v360_v6  ;;  %v623_v8 = vld [vmem:[#allocation7 + $0x20] ss:$8 sm:$0xf] }
  0x34   : > { %s2034_s16 = smov 119   ;;  %s2035_s6 = smov 71   ;;  %v625_v9 = vperm.slane %v623_v8, 0  ;;  %v626_v13 = vperm.slane %v623_v8, 1  ;;  %v627_v20 = vperm.slane %v623_v8, 2  ;;  %v628_v21 = vperm.slane %v623_v8, 3 }
  0x35   : > { %s2036_s22 = smov 120   ;;  %s2037_s28 = smov 72   ;;  %vm617_vm0 = vcmp.lt.s32.totalorder %v2254_v7, 55  ;;  %v2286_v19 = vld [vmem:[#allocation7 + $0x7] ss:$8 sm:$0xf] }
  0x36   : > { %s2038_s29 = smov 121   ;;  %s2039_s23 = smov 73   ;;  %vm585_vm1 = vcmp.lt.s32.totalorder %v2254_v7, 56  ;;  %v595_v25 = vperm.slane %v2286_v19, 2  ;;  %v596_v33 = vperm.slane %v2286_v19, 3  ;;  %vm553_vm2 = vcmp.lt.s32.totalorder %v2254_v7, 57 }
  0x37   : > { %v2309_v31 = vld [vmem:[#allocation7 + $0x6] ss:$8 sm:$0xf]  ;;  %v2340_v44 = vld [vmem:[#allocation7 + $0x5] ss:$8 sm:$0xf] }
  0x38   : > { %v563_v34 = vperm.slane %v2309_v31, 2  ;;  %v564_v39 = vperm.slane %v2309_v31, 3  ;;  %vm521_vm3 = vcmp.lt.s32.totalorder %v2254_v7, 63  ;;  %v531_v46 = vperm.slane %v2340_v44, 2  ;;  %p340_p1 = scmp.lt.s32.totalorder %s2110_s30, 1 }
  0x39   : > { %v2356_v52 = vld [vmem:[#allocation7 + $0x4] ss:$8 sm:$0xf]  ;;  %vm489_vm4 = vcmp.lt.s32.totalorder %v2254_v7, 64  ;;  %v593_v54 = vperm.slane %v2286_v19, 0  ;;  %v594_v55 = vperm.slane %v2286_v19, 1 }
  0x3a   : > { %547 = vrot.lane.b32.xlu2 %v2197_v1, %s2030_s18  ;;  %581 = vrot.lane.b32.xlu1 %v2203_v2, %s2029_s9  ;;  %v499_v53 = vperm.slane %v2356_v52, 2  ;;  %v561_v6 = vperm.slane %v2309_v31, 0  ;;  %v529_v19 = vperm.slane %v2340_v44, 0  ;;  %vm457_vm5 = vcmp.lt.s32.totalorder %v2254_v7, 65 }
  0x3b   : > { %613 = vrot.lane.b32.xlu0 %v2203_v2, %s2028_s8  ;;  %vm1017_vm6 = vcmp.lt.s32.totalorder %v2254_v7, 119  ;;  %vm425_vm7 = vcmp.lt.s32.totalorder %v2254_v7, 71  ;;  %vm393_vm8 = vcmp.lt.s32.totalorder %v2254_v7, 72  ;;  %vm362_vm9 = vcmp.lt.s32.totalorder %v2254_v7, 73 }
  0x3c   : > { %vm985_vm10 = vcmp.lt.s32.totalorder %v2254_v7, 120  ;;  %vm953_vm11 = vcmp.lt.s32.totalorder %v2254_v7, 121  ;;  %vm921_vm12 = vcmp.lt.s32.totalorder %v2254_v7, 127  ;;  %vm870_vm14 = vcmp.lt.s32.totalorder %v2254_v7, 1 }
  0x3d   : > { %vm838_vm15 = vcmp.lt.s32.totalorder %v2254_v7, 7 }
  0x42   : > { %583 = vrot.lane.b32.xlu1 %v2194_v0, %s2029_s9  ;;  %609 = vrot.lane.b32.xlu2 %v2209_v3, %s2028_s8  ;;  %s2040_s8 = smov 127  }
  0x43   : > { %549 = vrot.lane.b32.xlu0 %v2203_v2, %s2030_s18 }
  0x4a   : > { %517 = vrot.lane.b32.xlu1 %v2203_v2, %s2031_s11  ;;  %551 = vrot.lane.b32.xlu2 %v2194_v0, %s2030_s18 }
  0x4b   : > { %515 = vrot.lane.b32.xlu0 %v2197_v1, %s2031_s11 }
  0x52   : > { %483 = vrot.lane.b32.xlu1 %v2197_v1, %s2032_s12  ;;  %485 = vrot.lane.b32.xlu2 %v2203_v2, %s2032_s12 }
  0x53   : > { %577 = vrot.lane.b32.xlu0 %v2209_v3, %s2029_s9  ;;  %s2041_s9 = smov 1  }
  0x5a   : > { %545 = vrot.lane.b32.xlu1 %v2209_v3, %s2030_s18  ;;  %451 = vrot.lane.b32.xlu2 %v2197_v1, %s2033_s13  ;;  %s2042_s18 = smov 7  }
  0x5b   : > { %519 = vrot.lane.b32.xlu0 %v2194_v0, %s2031_s11 }
  0x62   : > { %487 = vrot.lane.b32.xlu1 %v2194_v0, %s2032_s12  ;;  %513 = vrot.lane.b32.xlu2 %v2209_v3, %s2031_s11  ;;  %s2043_s11 = smov 8  }
  0x63   : > { %453 = vrot.lane.b32.xlu0 %v2203_v2, %s2033_s13 }
  0x6a   : > { %1015 = vrot.lane.b32.xlu1 %v2194_v0, %s2034_s16  ;;  %419 = vrot.lane.b32.xlu2 %v2197_v1, %s2035_s6 }
  0x6b   : > { %1013 = vrot.lane.b32.xlu0 %v2203_v2, %s2034_s16 }
  0x72   : > { %455 = vrot.lane.b32.xlu1 %v2194_v0, %s2033_s13  ;;  %481 = vrot.lane.b32.xlu2 %v2209_v3, %s2032_s12  ;;  %s2044_s12 = smov 9  }
  0x73   : > { %421 = vrot.lane.b32.xlu0 %v2203_v2, %s2035_s6 }
  0x7a   : > { %983 = vrot.lane.b32.xlu1 %v2194_v0, %s2036_s22  ;;  %1009 = vrot.lane.b32.xlu2 %v2209_v3, %s2034_s16 }
  0x7b   : > { %981 = vrot.lane.b32.xlu0 %v2203_v2, %s2036_s22 }
  0x82   : > { %389 = vrot.lane.b32.xlu1 %v2203_v2, %s2037_s28  ;;  %423 = vrot.lane.b32.xlu2 %v2194_v0, %s2035_s6 }
  0x83   : > { %387 = vrot.lane.b32.xlu0 %v2197_v1, %s2037_s28 }
  0x8a   : > { %949 = vrot.lane.b32.xlu1 %v2203_v2, %s2038_s29  ;;  %951 = vrot.lane.b32.xlu2 %v2194_v0, %s2038_s29 }
  0x8b   : > { %449 = vrot.lane.b32.xlu0 %v2209_v3, %s2033_s13 }
  0x8c   : > { %v616_v4 = vpop.permute.xlu2 %615 }
  0x92   : > { %1011 = vrot.lane.b32.xlu1 %v2197_v1, %s2034_s16  ;;  %354 = vrot.lane.b32.xlu2 %v2197_v1, %s2039_s23 }
  0x93   : > { %977 = vrot.lane.b32.xlu0 %v2209_v3, %s2036_s22 }
  0x94   : > { %v2252_v5 = vpop.permute.xlu2 %547 }
  0x9a   : > { %391 = vrot.lane.b32.xlu1 %v2194_v0, %s2037_s28  ;;  %417 = vrot.lane.b32.xlu2 %v2209_v3, %s2035_s6  ;;  %s1973_s6 = scalar_lea.hbm %s2972_s7, 64 }
  0x9b   : > { %356 = vrot.lane.b32.xlu0 %v2203_v2, %s2039_s23 }
  0x9c   : > { %v610_v10 = vpop.permute.xlu2 %609 }
  0x9d   : > { %v2264_v11 = vsel %vm617_vm0, %v616_v4, %v610_v10 }
  0x9e   : > { %v633_v12 = vmul.f32 %v625_v9, %v2264_v11 }
  0xa0   : > { %689 = vmatpush.msra.mxu0 %v633_v12  ;;  %v532_v12 = vperm.slane %v2340_v44, 3 }
  0xa2   : > { %919 = vrot.lane.b32.xlu1 %v2194_v0, %s2040_s8  ;;  %945 = vrot.lane.b32.xlu2 %v2209_v3, %s2038_s29 }
  0xa3   : > { %917 = vrot.lane.b32.xlu0 %v2203_v2, %s2040_s8 }
  0xa4   : > { %v2273_v14 = vpop.permute.xlu1 %579  ;;  %v2275_v15 = vpop.permute.xlu2 %551 }
  0xa5   : > { %v612_v16 = vpop.permute.xlu0 %611 }
  0xa6   : > { %v2279_v17 = vsel %vm617_vm0, %v610_v10, %v612_v16  ;;  %v562_v10 = vperm.slane %v2309_v31, 1 }
  0xa7   : > { %v634_v18 = vmul.f32 %v626_v13, %v2279_v17 }
  0xa9   : > { %709 = vmatpush.msra.mxu1 %v634_v18 }
  0xaa   : > { %358 = vrot.lane.b32.xlu1 %v2194_v0, %s2039_s23  ;;  %385 = vrot.lane.b32.xlu2 %v2209_v3, %s2037_s28  ;;  %s1791_s28 = sshll.u32 %s2110_s30, 5 }
  0xab   : > { %979 = vrot.lane.b32.xlu0 %v2197_v1, %s2036_s22 }
  0xac   : > { %v582_v22 = vpop.permute.xlu1 %581  ;;  %v2291_v23 = vpop.permute.xlu2 %485 }
  0xad   : > { %v614_v24 = vpop.permute.xlu0 %613  ;;  %v2297_v26 = vsel %vm585_vm1, %v2273_v14, %v582_v22 }
  0xae   : > { %v2301_v27 = vsel %vm617_vm0, %v612_v16, %v614_v24  ;;  %v2305_v28 = vsel %vm617_vm0, %v614_v24, %v616_v4  ;;  %v603_v32 = vmul.f32 %v595_v25, %v2297_v26  ;;  %v498_v25 = vperm.slane %v2356_v52, 1 }
  0xaf   : > { %v635_v29 = vmul.f32 %v627_v20, %v2301_v27  ;;  %v636_v30 = vmul.f32 %v628_v21, %v2305_v28  ;;  %v530_v20 = vperm.slane %v2340_v44, 1  ;;  %vm806_vm0 = vcmp.lt.s32.totalorder %v2254_v7, 8 }
  0xb1   : > { %729 = vmatpush.msra.mxu2 %v635_v29  ;;  %749 = vmatpush.msra.mxu3 %v636_v30  ;;  %v2424_v29 = vld [vmem:[#allocation7 + $0x3] ss:$8 sm:$0xf] }
  0xb2   : > { %947 = vrot.lane.b32.xlu1 %v2197_v1, %s2038_s29  ;;  %352 = vrot.lane.b32.xlu2 %v2209_v3, %s2039_s23  ;;  %s1645_s23 = scalar_lea.hbm %s2972_s7, %s1791_s28 }
  0xb3   : > { %730 = vmatpush.msra.mxu2 %v603_v32  ;;  %913 = vrot.lane.b32.xlu0 %v2209_v3, %s2040_s8 }
  0xb4   : > { %v584_v35 = vpop.permute.xlu1 %583  ;;  %v2321_v36 = vpop.permute.xlu2 %451 }
  0xb5   : > { %v2325_v37 = vsel %vm585_vm1, %v582_v22, %v584_v35  ;;  %v550_v38 = vpop.permute.xlu0 %549 }
  0xb6   : > { %v2331_v40 = vsel %vm553_vm2, %v550_v38, %v2275_v15  ;;  %v2336_v41 = vsel %vm553_vm2, %v2252_v5, %v550_v38  ;;  %v604_v42 = vmul.f32 %v596_v33, %v2325_v37  ;;  %v500_v33 = vperm.slane %v2356_v52, 3 }
  0xb7   : > { %v571_v43 = vmul.f32 %v563_v34, %v2336_v41  ;;  %v572_v45 = vmul.f32 %v564_v39, %v2331_v40  ;;  %v467_v34 = vperm.slane %v2424_v29, 2 }
  0xb8   : > { %750 = vmatpush.msra.mxu3 %v604_v42 }
  0xb9   : > { %731 = vmatpush.msra.mxu2 %v571_v43 }
  0xba   : > { %866 = vrot.lane.b32.xlu1 %v2203_v2, %s2041_s9  ;;  %915 = vrot.lane.b32.xlu2 %v2197_v1, %s2040_s8  ;;  %s339_s8 = scalar_lea.vmem [#allocation9], %s1762_s10 }
  0xbb   : > { %864 = vrot.lane.b32.xlu0 %v2197_v1, %s2041_s9  ;;  %751 = vmatpush.msra.mxu3 %v572_v45 }
  0xbc   : > { %v518_v47 = vpop.permute.xlu1 %517  ;;  %v514_v48 = vpop.permute.xlu2 %513 }
  0xbd   : > { %v516_v49 = vpop.permute.xlu0 %515 }
  0xbe   : > { %v2353_v50 = vsel %vm521_vm3, %v516_v49, %v518_v47  ;;  %v2414_v21 = vsel %vm521_vm3, %v514_v48, %v516_v49 }
  0xbf   : > { %v539_v51 = vmul.f32 %v531_v46, %v2353_v50  ;;  %v538_v32 = vmul.f32 %v530_v20, %v2414_v21 }
  0xc1   : > { %732 = vmatpush.msra.mxu2 %v539_v51 }
  0xc2   : > { %834 = vrot.lane.b32.xlu1 %v2203_v2, %s2042_s18  ;;  %868 = vrot.lane.b32.xlu2 %v2194_v0, %s2041_s9 }
  0xc3   : > { %832 = vrot.lane.b32.xlu0 %v2197_v1, %s2042_s18 }
  0xc4   : > { %v484_v56 = vpop.permute.xlu1 %483  ;;  %v2368_v57 = vpop.permute.xlu2 %419 }
  0xc5   : > { %v2373_v58 = vsel %vm489_vm4, %v484_v56, %v2291_v23  ;;  %v578_v59 = vpop.permute.xlu0 %577 }
  0xc6   : > { %2986 = vst [vmem:[#allocation13_spill] sm:$0xff] %v2373_v58  ;;  %v2378_v60 = vsel %vm585_vm1, %v578_v59, %v2273_v14  ;;  %v2382_v61 = vsel %vm585_vm1, %v584_v35, %v578_v59  ;;  %v507_v62 = vmul.f32 %v499_v53, %v2373_v58  ;;  %v497_v35 = vperm.slane %v2356_v52, 0  ;;  %v2606_v58 = vld [vmem:[#allocation7 + $0x25] ss:$8 sm:$0xf] }
  0xc7   : > { %v601_v63 = vmul.f32 %v593_v54, %v2382_v61  ;;  %v602_v4 = vmul.f32 %v594_v55, %v2378_v60  ;;  %v431_v54 = vld [vmem:[#allocation7 + $0x2] ss:$8 sm:$0xf]  ;;  %v468_v55 = vperm.slane %v2424_v29, 3  ;;  %vm774_vm1 = vcmp.lt.s32.totalorder %v2254_v7, 9 }
  0xc8   : > { %733 = vmatpush.msra.mxu2 %v507_v62 }
  0xc9   : > { %690 = vmatpush.msra.mxu0 %v601_v63  ;;  %710 = vmatpush.msra.mxu1 %v602_v4  ;;  %v436_v63 = vperm.slane %v431_v54, 3 }
  0xca   : > { %802 = vrot.lane.b32.xlu1 %v2203_v2, %s2043_s11  ;;  %836 = vrot.lane.b32.xlu2 %v2194_v0, %s2042_s18 }
  0xcb   : > { %800 = vrot.lane.b32.xlu0 %v2197_v1, %s2043_s11 }
  0xcc   : > { %v546_v8 = vpop.permute.xlu1 %545  ;;  %v482_v9 = vpop.permute.xlu2 %481 }
  0xcd   : > { %v2399_v13 = vsel %vm553_vm2, %v546_v8, %v2252_v5  ;;  %v2404_v14 = vsel %vm553_vm2, %v2275_v15, %v546_v8  ;;  %v520_v16 = vpop.permute.xlu0 %519  ;;  %v2428_v30 = vsel %vm489_vm4, %v482_v9, %v484_v56  ;;  %v435_v56 = vperm.slane %v431_v54, 2 }
  0xce   : > { %v2408_v18 = vsel %vm521_vm3, %v518_v47, %v520_v16  ;;  %v2418_v5 = vsel %vm521_vm3, %v520_v16, %v514_v48  ;;  %v569_v15 = vmul.f32 %v561_v6, %v2404_v14  ;;  %v570_v22 = vmul.f32 %v562_v10, %v2399_v13  ;;  %2987 = vst [vmem:[#allocation14_spill] sm:$0xff] %v2428_v30 }
  0xcf   : > { %v540_v24 = vmul.f32 %v532_v12, %v2408_v18  ;;  %v537_v31 = vmul.f32 %v529_v19, %v2418_v5  ;;  %v506_v39 = vmul.f32 %v498_v25, %v2428_v30 }
  0xd0   : > { %691 = vmatpush.msra.mxu0 %v569_v15  ;;  %711 = vmatpush.msra.mxu1 %v570_v22  ;;  %v2507_v22 = vld [vmem:[#allocation7 + $0x1] ss:$8 sm:$0xf] }
  0xd1   : > { %752 = vmatpush.msra.mxu3 %v540_v24  ;;  %v403_v24 = vperm.slane %v2507_v22, 2 }
  0xd2   : > { %768 = vrot.lane.b32.xlu1 %v2197_v1, %s2044_s12  ;;  %692 = vmatpush.msra.mxu0 %v537_v31 }
  0xd3   : > { %862 = vrot.lane.b32.xlu0 %v2209_v3, %s2041_s9  ;;  %712 = vmatpush.msra.mxu1 %v538_v32  ;;  %s341_s9 = scalar_select %p340_p1, %s2110_s30, 1 }
  0xd4   : > { %v488_v38 = vpop.permute.xlu1 %487  ;;  %v2441_v42 = vpop.permute.xlu2 %1009  ;;  %770 = vrot.lane.b32.xlu2 %v2203_v2, %s2044_s12 }
  0xd5   : > { %v2446_v43 = vsel %vm489_vm4, %v2291_v23, %v488_v38  ;;  %v2450_v44 = vsel %vm489_vm4, %v488_v38, %v482_v9  ;;  %v454_v45 = vpop.permute.xlu0 %453  ;;  %713 = vmatpush.msra.mxu1 %v506_v39  ;;  %v466_v38 = vperm.slane %v2424_v29, 1 }
  0xd6   : > { %v2457_v46 = vsel %vm457_vm5, %v2321_v36, %v454_v45  ;;  %v508_v47 = vmul.f32 %v500_v33, %v2446_v43  ;;  %v505_v23 = vmul.f32 %v497_v35, %v2450_v44  ;;  %v465_v35 = vperm.slane %v2424_v29, 0 }
  0xd7   : > { %2988 = vst [vmem:[#allocation15_spill] sm:$0xff] %v2457_v46  ;;  %v475_v48 = vmul.f32 %v467_v34, %v2457_v46 }
  0xd8   : > { %753 = vmatpush.msra.mxu3 %v508_v47  ;;  %693 = vmatpush.msra.mxu0 %v505_v23  ;;  %v434_v23 = vperm.slane %v431_v54, 1 }
  0xd9   : > { %734 = vmatpush.msra.mxu2 %v475_v48  ;;  %v433_v48 = vperm.slane %v431_v54, 0 }
  0xda   : > { %830 = vrot.lane.b32.xlu1 %v2209_v3, %s2042_s18  ;;  %s1765_s18 = sshll.u32 %s341_s9, 3  ;;  %s1647_s9 = sshll.u32 %s339_s8, 4  ;;  %s1648_s9 = int_to_ptr.vmem [resolvable:$true] %s1647_s9 }
  0xdb   : > { %804 = vrot.lane.b32.xlu0 %v2194_v0, %s2043_s11  ;;  %s343_s13 = scalar_lea.vmem %s2968_s3, %s1765_s18  ;;  %s347_s22 = scalar_lea.vmem %s2969_s4, %s1765_s18 }
  0xdc   : > { %v2467_v49 = vpop.permute.xlu1 %1015  ;;  %v424_v51 = vpop.permute.xlu2 %423  ;;  %772 = vrot.lane.b32.xlu2 %v2194_v0, %s2044_s12  ;;  %s1649_s18 = sshll.u32 %s1645_s23, 4  ;;  %s1650_s18 = int_to_ptr.hbm [resolvable:$true] %s1649_s18 }
  0xdd   : > { %v2473_v52 = vsel %vm1017_vm6, %v2467_v49, %v2441_v42  ;;  %v2475_v53 = vpop.permute.xlu0 %1013 }
  0xe2   : > { %766 = vrot.lane.b32.xlu1 %v2209_v3, %s2044_s12  ;;  %s1967_s12 = sshra.s32 %s1650_s18, 4  ;;  %s1968_s12 = int_to_ptr.hbm [resolvable:$true] %s1967_s12 }
  0xe3   : > { %798 = vrot.lane.b32.xlu0 %v2209_v3, %s2043_s11  ;;  %s1634_s11 = scalar_lea.sflag [#allocation6], %s2177_s20  ;;  %p1974_p8 = scmp.lt.s32.totalorder %s1968_s12, %s2972_s7 }
  0xe4   : > { %v456_v59 = vpop.permute.xlu1 %455  ;;  %v2485_v62 = vpop.permute.xlu2 %951 }
  0xe5   : > { %v2489_v4 = vsel %vm457_vm5, %v454_v45, %v456_v59  ;;  %v422_v6 = vpop.permute.xlu0 %421 }
  0xe6   : > { %v2493_v8 = vsel %vm425_vm7, %v422_v6, %v424_v51  ;;  %v2498_v9 = vsel %vm425_vm7, %v2368_v57, %v422_v6  ;;  %v476_v10 = vmul.f32 %v468_v55, %v2489_v4 }
  0xe7   : > { %2989 = vst [vmem:[#allocation16_spill] sm:$0xff] %v2498_v9  ;;  %v443_v12 = vmul.f32 %v435_v56, %v2498_v9  ;;  %v444_v16 = vmul.f32 %v436_v63, %v2493_v8 }
  0xe8   : > { %754 = vmatpush.msra.mxu3 %v476_v10  ;;  %v402_v10 = vperm.slane %v2507_v22, 1 }
  0xe9   : > { %735 = vmatpush.msra.mxu2 %v443_v12 }
  0xea   : > { %755 = vmatpush.msra.mxu3 %v444_v16 }
  0xec   : > { %v2503_v19 = vpop.permute.xlu1 %983  ;;  %v355_v20 = vpop.permute.xlu2 %354 }
  0xed   : > { %v2505_v15 = vpop.permute.xlu0 %981 }
  0xf4   : > { %v390_v25 = vpop.permute.xlu1 %389  ;;  %v418_v31 = vpop.permute.xlu2 %417 }
  0xf5   : > { %v388_v32 = vpop.permute.xlu0 %387  ;;  %v2525_v55 = vsel %vm425_vm7, %v418_v31, %v2368_v57  ;;  %v2529_v56 = vsel %vm425_vm7, %v424_v51, %v418_v31  ;;  %v2554_v31 = vld [vmem:[#allocation7] ss:$8 sm:$0xf] }
  0xf6   : > { %v2513_v33 = vsel %vm393_vm8, %v388_v32, %v390_v25  ;;  %2991 = vst [vmem:[#allocation18_spill] sm:$0xff] %v2525_v55  ;;  %v441_v57 = vmul.f32 %v433_v48, %v2529_v56  ;;  %v442_v51 = vmul.f32 %v434_v23, %v2525_v55  ;;  %v2562_v48 = vld [vmem:[#allocation7 + $0x40] ss:$8 sm:$0xf] }
  0xf7   : > { %2990 = vst [vmem:[#allocation17_spill] sm:$0xff] %v2513_v33  ;;  %v411_v34 = vmul.f32 %v403_v24, %v2513_v33  ;;  %v2593_v55 = vld [vmem:[#allocation7 + $0x27] ss:$8 sm:$0xf] }
  0xf9   : > { %736 = vmatpush.msra.mxu2 %v411_v34  ;;  %v2556_v34 = vld [vmem:[#allocation7 + $0x41] ss:$8 sm:$0xf] }
  0xfc   : > { %v2518_v39 = vpop.permute.xlu1 %949  ;;  %v2520_v45 = vpop.permute.xlu2 %945 }
  0xfd   : > { %v450_v47 = vpop.permute.xlu0 %449 }
  0xfe   : > { %v2534_v29 = vsel %vm457_vm5, %v450_v47, %v2321_v36  ;;  %v2538_v63 = vsel %vm457_vm5, %v456_v59, %v450_v47  ;;  %v404_v47 = vperm.slane %v2507_v22, 3 }
  0xff   : > { %2992 = vst [vmem:[#allocation19_spill] sm:$0xff] %v2534_v29  ;;  %v473_v54 = vmul.f32 %v465_v35, %v2538_v63  ;;  %v474_v6 = vmul.f32 %v466_v38, %v2534_v29  ;;  %v370_v35 = vperm.slane %v2554_v31, 1  ;;  %v371_v38 = vperm.slane %v2554_v31, 2  ;;  %v2604_v29 = vld [vmem:[#allocation7 + $0x26] ss:$8 sm:$0xf] }
 0x101   : > { %694 = vmatpush.msra.mxu0 %v473_v54  ;;  %714 = vmatpush.msra.mxu1 %v474_v6  ;;  %v1026_v54 = vperm.slane %v2556_v34, 1  ;;  %v1027_v6 = vperm.slane %v2556_v34, 2 }
 0x103   : > { %695 = vmatpush.msra.mxu0 %v441_v57  ;;  %715 = vmatpush.msra.mxu1 %v442_v51  ;;  %v401_v57 = vperm.slane %v2507_v22, 0  ;;  %v1018_v22 = vsel %vm1017_vm6, %v2475_v53, %v2467_v49  ;;  %v986_v49 = vsel %vm985_vm10, %v2505_v15, %v2503_v19 }
 0x104   : > { %v2545_v36 = vpop.permute.xlu1 %1011  ;;  %v386_v12 = vpop.permute.xlu2 %385  ;;  %v1035_v30 = vmul.f32 %v1027_v6, %v1018_v22 }
 0x105   : > { %v2547_v16 = vpop.permute.xlu0 %977  ;;  %v2551_v59 = vsel %vm393_vm8, %v386_v12, %v388_v32  ;;  %v1019_v51 = vsel %vm1017_vm6, %v2545_v36, %v2475_v53 }
 0x106   : > { %2993 = vst [vmem:[#allocation20_spill] sm:$0xff] %v2551_v59  ;;  %v410_v24 = vmul.f32 %v402_v10, %v2551_v59  ;;  %v1034_v53 = vmul.f32 %v1026_v54, %v1019_v51  ;;  %v931_v54 = vperm.slane %v2604_v29, 2 }
 0x108   : > { %716 = vmatpush.msra.mxu1 %v410_v24 }
 0x10c   : > { %v392_v32 = vpop.permute.xlu1 %391  ;;  %v353_v23 = vpop.permute.xlu2 %352 }
 0x10d   : > { %v2574_v10 = vsel %vm393_vm8, %v390_v25, %v392_v32  ;;  %v2578_v24 = vsel %vm393_vm8, %v392_v32, %v386_v12  ;;  %v357_v33 = vpop.permute.xlu0 %356  ;;  %v2582_v59 = vsel %vm362_vm9, %v353_v23, %v355_v20  ;;  %v995_v25 = vperm.slane %v2562_v48, 2 }
 0x10e   : > { %v2590_v9 = vsel %vm362_vm9, %v355_v20, %v357_v33  ;;  %v378_v12 = vmul.f32 %v370_v35, %v2582_v59  ;;  %v412_v46 = vmul.f32 %v404_v47, %v2574_v10  ;;  %v409_v20 = vmul.f32 %v401_v57, %v2578_v24 }
 0x10f   : > { %v379_v32 = vmul.f32 %v371_v38, %v2590_v9  ;;  %v963_v35 = vperm.slane %v2593_v55, 2  ;;  %v954_v38 = vsel %vm953_vm11, %v2518_v39, %v2485_v62  ;;  %v1003_v47 = vmul.f32 %v995_v25, %v986_v49 }
 0x110   : > { %717 = vmatpush.msra.mxu1 %v378_v12  ;;  %756 = vmatpush.msra.mxu3 %v412_v46  ;;  %v899_v57 = vperm.slane %v2606_v58, 2  ;;  %v372_v25 = vperm.slane %v2554_v31, 3  ;;  %v994_v49 = vperm.slane %v2562_v48, 1 }
 0x111   : > { %737 = vmatpush.msra.mxu2 %v379_v32  ;;  %696 = vmatpush.msra.mxu0 %v409_v20  ;;  %v971_v22 = vmul.f32 %v963_v35, %v954_v38  ;;  %v1025_v20 = vperm.slane %v2556_v34, 0  ;;  %v1020_v35 = vsel %vm1017_vm6, %v2441_v42, %v2545_v36 }
 0x112   : > { %1109 = vmatpush.msrb.mxu1 %v1034_v53  ;;  %v907_v46 = vmul.f32 %v899_v57, %v2203_v2  ;;  %v993_v57 = vperm.slane %v2562_v48, 0 }
 0x113   : > { %1129 = vmatpush.msrb.mxu2 %v1035_v30  ;;  %v369_v30 = vperm.slane %v2554_v31, 0 }
 0x114   : > { %v920_v51 = vpop.permute.xlu1 %919 }
 0x115   : > { %1130 = vmatpush.msrb.mxu2 %v1003_v47  ;;  %v918_v6 = vpop.permute.xlu0 %917  ;;  %v1028_v47 = vperm.slane %v2556_v34, 3  ;;  %v989_v34 = vsel %vm985_vm10, %v2503_v19, %v2547_v16  ;;  %v962_v19 = vperm.slane %v2593_v55, 1 }
 0x116   : > { %v922_v12 = vsel %vm921_vm12, %v918_v6, %v920_v51 }
 0x117   : > { %1131 = vmatpush.msrb.mxu2 %v971_v22  ;;  %v939_v32 = vmul.f32 %v931_v54, %v922_v12  ;;  %v996_v22 = vperm.slane %v2562_v48, 3  ;;  %v916_v12 = vpop.permute.xlu2 %915  ;;  %v1036_v48 = vmul.f32 %v1028_v47, %v2473_v52  ;;  %v930_v52 = vperm.slane %v2604_v29, 1 }
 0x118   : > { %v898_v47 = vperm.slane %v2606_v58, 1 }
 0x119   : > { %1132 = vmatpush.msrb.mxu2 %v939_v32  ;;  %v964_v32 = vperm.slane %v2593_v55, 3 }
 0x11b   : > { %1133 = vmatpush.msrb.mxu2 %v907_v46  ;;  %v957_v46 = vsel %vm953_vm11, %v2485_v62, %v2520_v45 }
 0x11c   : > { %v359_v53 = vpop.permute.xlu1 %358 }
 0x11d   : > { %v2629_v38 = vsel %vm362_vm9, %v357_v33, %v359_v53  ;;  %v2633_v2 = vsel %vm362_vm9, %v359_v53, %v353_v23  ;;  %v980_v31 = vpop.permute.xlu0 %979  ;;  %v900_v53 = vperm.slane %v2606_v58, 3 }
 0x11e   : > { %v987_v54 = vsel %vm985_vm10, %v980_v31, %v2505_v15  ;;  %v988_v42 = vsel %vm985_vm10, %v2547_v16, %v980_v31  ;;  %v377_v33 = vmul.f32 %v369_v30, %v2633_v2  ;;  %v380_v36 = vmul.f32 %v372_v25, %v2629_v38 }
 0x11f   : > { %v1002_v23 = vmul.f32 %v994_v49, %v987_v54  ;;  %v1033_v15 = vmul.f32 %v1025_v20, %v1020_v35  ;;  %v1001_v30 = vmul.f32 %v993_v57, %v988_v42  ;;  %v961_v25 = vperm.slane %v2593_v55, 0 }
 0x120   : > { %697 = vmatpush.msra.mxu0 %v377_v33  ;;  %757 = vmatpush.msra.mxu3 %v380_v36  ;;  %v1004_v16 = vmul.f32 %v996_v22, %v989_v34  ;;  %v932_v49 = vperm.slane %v2604_v29, 3  ;;  %v923_v20 = vsel %vm921_vm12, %v916_v12, %v918_v6  ;;  %v929_v35 = vperm.slane %v2604_v29, 0  ;;  %v869_v34 = vpop.permute.xlu2 %868 }
 0x121   : > { %1110 = vmatpush.msrb.mxu1 %v1002_v23  ;;  %v897_v31 = vperm.slane %v2606_v58, 0  ;;  %v972_v22 = vmul.f32 %v964_v32, %v957_v46  ;;  %v938_v36 = vmul.f32 %v930_v52, %v923_v20  ;;  %v908_v23 = vmul.f32 %v900_v53, %v2194_v0 }
 0x122   : > { %1089 = vmatpush.msrb.mxu0 %v1033_v15  ;;  %1149 = vmatpush.msrb.mxu3 %v1036_v48  ;;  %v641_v48 = vld [vmem:[%s2966_s1] sm:$0xff] }
 0x123   : > { %v905_v15 = vmul.f32 %v897_v31, %v2209_v3  ;;  %1769 = vmatmul.msk.f32.vlgmr.msra.gmra.mxu2 %vm678_vm13, %v641_v48  ;;  %1770 = vmatmul.msk.f32.vlgmr.msra.gmra.mxu3 %vm678_vm13, %v641_v48 }
 0x124   : > { %1090 = vmatpush.msrb.mxu0 %v1001_v30  ;;  %v948_v62 = vpop.permute.xlu1 %947  ;;  %1150 = vmatpush.msrb.mxu3 %v1004_v16 }
 0x125   : > { %v955_v55 = vsel %vm953_vm11, %v948_v62, %v2518_v39  ;;  %v956_v54 = vsel %vm953_vm11, %v2520_v45, %v948_v62  ;;  %v914_v57 = vpop.permute.xlu0 %913  ;;  %v2677_v45 = vld [vmem:[#allocation7 + $0x24] ss:$8 sm:$0xf]  ;;  %1767 = vmatmul.msk.f32.vlgmr.msra.gmra.mxu0 %vm678_vm13, %v641_v48  ;;  %1768 = vmatmul.msk.f32.vlgmr.msra.gmra.mxu1 %vm678_vm13, %v641_v48  ;;  %v2727_v48 = vld [vmem:[#allocation7 + $0x61] ss:$8 sm:$0xf] }
 0x126   : > { %v924_v6 = vsel %vm921_vm12, %v914_v57, %v916_v12  ;;  %v925_v29 = vsel %vm921_vm12, %v920_v51, %v914_v57  ;;  %v969_v42 = vmul.f32 %v961_v25, %v956_v54  ;;  %v970_v33 = vmul.f32 %v962_v19, %v955_v55  ;;  %1151 = vmatpush.msrb.mxu3 %v972_v22  ;;  %v2695_v19 = vld [vmem:[#allocation7 + $0x23] ss:$8 sm:$0xf]  ;;  %v2707_v55 = vld [vmem:[#allocation7 + $0x22] ss:$8 sm:$0xf] }
 0x127   : > { %v940_v58 = vmul.f32 %v932_v49, %v925_v29  ;;  %v937_v39 = vmul.f32 %v929_v35, %v924_v6  ;;  %v906_v12 = vmul.f32 %v898_v47, %v2197_v1  ;;  %v881_v51 = vperm.slane %v2677_v45, 3 }
 0x128   : > { %1091 = vmatpush.msrb.mxu0 %v969_v42  ;;  %1111 = vmatpush.msrb.mxu1 %v970_v33  ;;  %v880_v0 = vperm.slane %v2677_v45, 2  ;;  %v2697_v16 = vpop.permute.xlu2 %836  ;;  %v849_v49 = vperm.slane %v2695_v19, 3  ;;  %v848_v52 = vperm.slane %v2695_v19, 2  ;;  %v816_v54 = vperm.slane %v2707_v55, 2 }
 0x129   : > { %1152 = vmatpush.msrb.mxu3 %v940_v58  ;;  %v2716_v42 = vld [vmem:[#allocation7 + $0x21] ss:$8 sm:$0xf]  ;;  %v878_v58 = vperm.slane %v2677_v45, 0  ;;  %v1310_v7 = vperm.slane %v2727_v48, 0 }
 0x12a   : > { %1092 = vmatpush.msrb.mxu0 %v937_v39  ;;  %1112 = vmatpush.msrb.mxu1 %v938_v36  ;;  %v879_v36 = vperm.slane %v2677_v45, 1  ;;  %v2722_v39 = vld [vmem:[#allocation7 + $0x62] ss:$8 sm:$0xf] }
 0x12b   : > { %1153 = vmatpush.msrb.mxu3 %v908_v23  ;;  %v784_v23 = vperm.slane %v2716_v42, 2 }
 0x12c   : > { %v867_v3 = vpop.permute.xlu1 %866  ;;  %1093 = vmatpush.msrb.mxu0 %v905_v15  ;;  %1113 = vmatpush.msrb.mxu1 %v906_v12  ;;  %v1331_v15 = vperm.slane %v2722_v39, 2 }
 0x12d   : > { %v865_v1 = vpop.permute.xlu0 %864  ;;  %v871_v32 = vsel %vm870_vm14, %v867_v3, %v869_v34 }
 0x12e   : > { %v872_v46 = vsel %vm870_vm14, %v865_v1, %v867_v3  ;;  %v889_v30 = vmul.f32 %v881_v51, %v871_v32 }
 0x12f   : > { %v888_v25 = vmul.f32 %v880_v0, %v872_v46  ;;  %v2729_v0 = vld [vmem:[#allocation7 + $0x60] ss:$8 sm:$0xf]  ;;  %v1312_v46 = vperm.slane %v2727_v48, 2 }
 0x130   : > { %1154 = vmatpush.msrb.mxu3 %v889_v30  ;;  %v771_v33 = vpop.permute.xlu2 %770 }
 0x131   : > { %1134 = vmatpush.msrb.mxu2 %v888_v25 }
 0x134   : > { %v835_v53 = vpop.permute.xlu1 %834 }
 0x135   : > { %v833_v20 = vpop.permute.xlu0 %832  ;;  %v839_v62 = vsel %vm838_vm15, %v835_v53, %v2697_v16 }
 0x136   : > { %v840_v35 = vsel %vm838_vm15, %v833_v20, %v835_v53  ;;  %v857_v31 = vmul.f32 %v849_v49, %v839_v62  ;;  %v1339_v53 = vmul.f32 %v1331_v15, %v2305_v28  ;;  %v1293_v62 = vperm.slane %v2729_v0, 2 }
 0x137   : > { %v856_v47 = vmul.f32 %v848_v52, %v840_v35  ;;  %v2739_v52 = vld [vmem:[#allocation7 + $0x47] ss:$8 sm:$0xf]  ;;  %v1332_v35 = vperm.slane %v2722_v39, 3  ;;  %v847_v28 = vperm.slane %v2695_v19, 1 }
 0x138   : > { %1155 = vmatpush.msrb.mxu3 %v857_v31  ;;  %v1320_v31 = vmul.f32 %v1312_v46, %v2325_v37 }
 0x139   : > { %1135 = vmatpush.msrb.mxu2 %v856_v47  ;;  %v846_v47 = vperm.slane %v2695_v19, 0 }
 0x13c   : > { %v803_v57 = vpop.permute.xlu1 %802 }
 0x13d   : > { %v2711_v22 = vpop.permute.xlu0 %800 }
 0x13e   : > { %v808_v6 = vsel %vm806_vm0, %v2711_v22, %v803_v57 }
 0x13f   : > { %v824_v29 = vmul.f32 %v816_v54, %v808_v6  ;;  %v817_v54 = vperm.slane %v2707_v55, 3  ;;  %v2754_v6 = vld [vmem:[#allocation7 + $0x46] ss:$8 sm:$0xf] }
 0x140   : > { %v1255_v37 = vperm.slane %v2754_v6, 2 }
 0x141   : > { %1136 = vmatpush.msrb.mxu2 %v824_v29  ;;  %v2756_v29 = vld [vmem:[#allocation7 + $0x45] ss:$8 sm:$0xf] }
 0x142   : > { %v1236_v15 = vperm.slane %v2756_v29, 2 }
 0x144   : > { %v2725_v12 = vpop.permute.xlu1 %768 }
 0x145   : > { %v863_v51 = vpop.permute.xlu0 %862  ;;  %v776_v45 = vsel %vm774_vm1, %v2725_v12, %v771_v33 }
 0x146   : > { %v873_v3 = vsel %vm870_vm14, %v863_v51, %v865_v1  ;;  %v874_v32 = vsel %vm870_vm14, %v869_v34, %v863_v51  ;;  %v792_v49 = vmul.f32 %v784_v23, %v776_v45  ;;  %v1274_v1 = vperm.slane %v2739_v52, 2  ;;  %v2747_v34 = vld [vmem:[%s2966_s1 + $0x8] sm:$0xff] }
 0x147   : > { %v886_v30 = vmul.f32 %v878_v58, %v874_v32  ;;  %v887_v25 = vmul.f32 %v879_v36, %v873_v3  ;;  %v773_v58 = vpop.permute.xlu2 %772  ;;  %v1301_v36 = vmul.f32 %v1293_v62, %v2331_v40  ;;  %v2764_v3 = vld [vmem:[#allocation7 + $0x44] ss:$8 sm:$0xf]  ;;  %v2778_v62 = vld [vmem:[#allocation7 + $0x43] ss:$8 sm:$0xf] }
 0x148   : > { %1137 = vmatpush.msrb.mxu2 %v792_v49  ;;  %v1282_v23 = vmul.f32 %v1274_v1, %v2408_v18  ;;  %v785_v18 = vperm.slane %v2716_v42, 3  ;;  %v775_v46 = vsel %vm774_vm1, %v771_v33, %v773_v58  ;;  %v1217_v1 = vperm.slane %v2764_v3, 2  ;;  %v1482_v33 = vld [vmem:[%s2967_s2] sm:$0xff] }
 0x149   : > { %1094 = vmatpush.msrb.mxu0 %v886_v30  ;;  %1114 = vmatpush.msrb.mxu1 %v887_v25 }
 0x14a   : > { %1433 = vmatpush.msra.mxu2 %v1339_v53  ;;  %v1313_v53 = vperm.slane %v2727_v48, 3 }
 0x14b   : > { %1774 = vmatmul.msk.f32.vlgmr.msrb.gmra.mxu2 %vm678_vm13, %v2747_v34 }
 0x14c   : > { %1434 = vmatpush.msra.mxu2 %v1320_v31  ;;  %v831_v19 = vpop.permute.xlu1 %830  ;;  %v793_v31 = vmul.f32 %v785_v18, %v775_v46 }
 0x14d   : > { %v805_v51 = vpop.permute.xlu0 %804  ;;  %v841_v32 = vsel %vm838_vm15, %v831_v19, %v833_v20  ;;  %v842_v45 = vsel %vm838_vm15, %v2697_v16, %v831_v19  ;;  %v1294_v20 = vperm.slane %v2729_v0, 3  ;;  %v1263_v16 = vmul.f32 %v1255_v37, %v2446_v43 }
 0x14e   : > { %v807_v40 = vsel %vm806_vm0, %v803_v57, %v805_v51  ;;  %1435 = vmatpush.msra.mxu2 %v1301_v36  ;;  %v854_v30 = vmul.f32 %v846_v47, %v842_v45  ;;  %v855_v25 = vmul.f32 %v847_v28, %v841_v32  ;;  %v1198_v57 = vperm.slane %v2778_v62, 2  ;;  %v2793_v32 = vld [vmem:[#allocation7 + $0x42] ss:$8 sm:$0xf] }
 0x14f   : > { %v825_v49 = vmul.f32 %v817_v54, %v807_v40  ;;  %v1340_v47 = vmul.f32 %v1332_v35, %v2264_v11  ;;  %v1244_v28 = vmul.f32 %v1236_v15, %v2489_v4  ;;  %v814_v43 = vperm.slane %v2707_v55, 0 }
 0x150   : > { %1436 = vmatpush.msra.mxu2 %v1282_v23  ;;  %1095 = vmatpush.msrb.mxu0 %v854_v30  ;;  %v815_v54 = vperm.slane %v2707_v55, 1  ;;  %v2045_v36 = vmov 0   ;;  %v1321_v23 = vmul.f32 %v1313_v53, %v2382_v61  ;;  %v1302_v37 = vmul.f32 %v1294_v20, %v2404_v14 }
 0x151   : > { %1115 = vmatpush.msrb.mxu1 %v855_v25  ;;  %1156 = vmatpush.msrb.mxu3 %v825_v49  ;;  %v1275_v19 = vperm.slane %v2739_v52, 3  ;;  %v1225_v11 = vmul.f32 %v1217_v1, %v2493_v8  ;;  %v1206_v4 = vmul.f32 %v1198_v57, %v2574_v10  ;;  %v1179_v35 = vperm.slane %v2793_v32, 2  ;;  %v2821_v49 = vld [vmem:[%s2966_s1 + $0x10] sm:$0xff] }
 0x152   : > { %1437 = vmatpush.msra.mxu2 %v1263_v16  ;;  %1869 = vset.pattern.permute.xlu2 %v2045_v36  ;;  %v782_v61 = vperm.slane %v2716_v42, 0  ;;  %v783_v10 = vperm.slane %v2716_v42, 1  ;;  %v1291_v53 = vperm.slane %v2729_v0, 0  ;;  %v1292_v16 = vperm.slane %v2729_v0, 1 }
 0x153   : > { %1157 = vmatpush.msrb.mxu3 %v793_v31  ;;  %1485 = vperm.xlu2 %1869, %v1482_v33   ;;  %v1283_v30 = vmul.f32 %v1275_v19, %v2418_v5  ;;  %v1187_v25 = vmul.f32 %v1179_v35, %v2629_v38  ;;  %v1237_v5 = vperm.slane %v2756_v29, 3  ;;  %v1218_v57 = vperm.slane %v2764_v3, 3  ;;  %v2998_v35 = vld [vmem:[#allocation18_spill] sm:$0xff] }
 0x154   : > { %1438 = vmatpush.msra.mxu2 %v1244_v28  ;;  %v767_v55 = vpop.permute.xlu1 %766  ;;  %1775 = vmatmul.msk.f32.vlgmr.msrb.gmra.mxu3 %vm678_vm13, %v2747_v34  ;;  %v1199_v33 = vperm.slane %v2778_v62, 3  ;;  %v1299_v31 = vmul.f32 %v1291_v53, %v2399_v13 }
 0x155   : > { %1453 = vmatpush.msra.mxu3 %v1340_v47  ;;  %v799_v15 = vpop.permute.xlu0 %798  ;;  %v777_v14 = vsel %vm774_vm1, %v767_v55, %v2725_v12  ;;  %v778_v40 = vsel %vm774_vm1, %v773_v58, %v767_v55  ;;  %v1329_v12 = vperm.slane %v2722_v39, 0  ;;  %1870 = vset.pattern.permute.xlu0 %v2045_v36  ;;  %v1245_v0 = vmul.f32 %v1237_v5, %v2538_v63  ;;  %v2995_v36 = vld [vmem:[#allocation13_spill] sm:$0xff] }
 0x156   : > { %v809_v45 = vsel %vm806_vm0, %v799_v15, %v2711_v22  ;;  %v810_v8 = vsel %vm806_vm0, %v805_v51, %v799_v15  ;;  %1439 = vmatpush.msra.mxu2 %v1225_v11  ;;  %v1330_v22 = vperm.slane %v2722_v39, 1  ;;  %v1256_v51 = vperm.slane %v2754_v6, 3 }
 0x157   : > { %1454 = vmatpush.msra.mxu3 %v1321_v23  ;;  %v822_v18 = vmul.f32 %v814_v43, %v810_v8  ;;  %v823_v46 = vmul.f32 %v815_v54, %v809_v45  ;;  %v790_v42 = vmul.f32 %v782_v61, %v778_v40  ;;  %v791_v58 = vmul.f32 %v783_v10, %v777_v14  ;;  %v3000_v14 = vld [vmem:[#allocation20_spill] sm:$0xff]  ;;  %v3001_v8 = vld [vmem:[#allocation17_spill] sm:$0xff] }
 0x158   : > { %1440 = vmatpush.msra.mxu2 %v1206_v4  ;;  %v1311_v39 = vperm.slane %v2727_v48, 1  ;;  %v1337_v38 = vmul.f32 %v1329_v12, %v2279_v17  ;;  %v1338_v20 = vmul.f32 %v1330_v22, %v2301_v27  ;;  %v1264_v1 = vmul.f32 %v1256_v51, %v2450_v44 }
 0x159   : > { %1455 = vmatpush.msra.mxu3 %v1302_v37  ;;  %1096 = vmatpush.msrb.mxu0 %v822_v18  ;;  %v1272_v17 = vperm.slane %v2739_v52, 0  ;;  %v1318_v48 = vmul.f32 %v1310_v7, %v2378_v60  ;;  %v1273_v44 = vperm.slane %v2739_v52, 1  ;;  %v1253_v47 = vperm.slane %v2754_v6, 0 }
 0x15a   : > { %1116 = vmatpush.msrb.mxu1 %v823_v46  ;;  %1441 = vmatpush.msra.mxu2 %v1187_v25  ;;  %v1319_v27 = vmul.f32 %v1311_v39, %v2297_v26  ;;  %v1300_v60 = vmul.f32 %v1292_v16, %v2336_v41  ;;  %v1226_v28 = vmul.f32 %v1218_v57, %v2529_v56  ;;  %v1180_v26 = vperm.slane %v2793_v32, 3  ;;  %v2994_v41 = vld [vmem:[#allocation14_spill] sm:$0xff] }
 0x15b   : > { %1456 = vmatpush.msra.mxu3 %v1283_v30  ;;  %1097 = vmatpush.msrb.mxu0 %v790_v42  ;;  %v1280_v63 = vmul.f32 %v1272_v17, %v2414_v21  ;;  %v1234_v52 = vperm.slane %v2756_v29, 0  ;;  %v1281_v13 = vmul.f32 %v1273_v44, %v2353_v50  ;;  %v1235_v43 = vperm.slane %v2756_v29, 1  ;;  %v2996_v50 = vld [vmem:[#allocation19_spill] sm:$0xff] }
 0x15c   : > { %1117 = vmatpush.msrb.mxu1 %v791_v58  ;;  %1779 = vmatmul.msk.f32.vlgmr.msra.gmra.mxu2 %vm678_vm13, %v2821_v49  ;;  %v1207_v54 = vmul.f32 %v1199_v33, %v2578_v24  ;;  %v1215_v56 = vperm.slane %v2764_v3, 0  ;;  %v1216_v21 = vperm.slane %v2764_v3, 1  ;;  %v1188_v37 = vmul.f32 %v1180_v26, %v2633_v2  ;;  %v2997_v24 = vld [vmem:[#allocation15_spill] sm:$0xff]  ;;  %v2999_v2 = vld [vmem:[#allocation16_spill] sm:$0xff] }
 0x15d   : > { %1772 = vmatmul.msk.f32.vlgmr.msrb.gmra.mxu0 %vm678_vm13, %v2747_v34  ;;  %1773 = vmatmul.msk.f32.vlgmr.msrb.gmra.mxu1 %vm678_vm13, %v2747_v34  ;;  %v1254_v34 = vperm.slane %v2754_v6, 1  ;;  %v1261_v6 = vmul.f32 %v1253_v47, %v2994_v41  ;;  %v1242_v19 = vmul.f32 %v1234_v52, %v2996_v50  ;;  %v1196_v29 = vperm.slane %v2778_v62, 0 }
 0x15e   : > { %1393 = vmatpush.msra.mxu0 %v1337_v38  ;;  %1413 = vmatpush.msra.mxu1 %v1338_v20  ;;  %v1243_v11 = vmul.f32 %v1235_v43, %v2997_v24  ;;  %v1197_v4 = vperm.slane %v2778_v62, 1  ;;  %v1223_v55 = vmul.f32 %v1215_v56, %v2998_v35  ;;  %v1177_v15 = vperm.slane %v2793_v32, 0  ;;  %v1522_v24 = vld [vmem:[%s343_s13] sm:$0xff]  ;;  %s1969_s13 = scalar_lea.hbm %s1968_s12, 32 }
 0x15f   : > { %1457 = vmatpush.msra.mxu3 %v1264_v1  ;;  %v1262_v23 = vmul.f32 %v1254_v34, %v2995_v36  ;;  %v1224_v3 = vmul.f32 %v1216_v21, %v2999_v2  ;;  %v1178_v61 = vperm.slane %v2793_v32, 1  ;;  %v1204_v45 = vmul.f32 %v1196_v29, %v3000_v14  ;;  %p1970_p3 = scmp.ne.s32.totalorder %s1968_s12, %s1969_s13  ;;  %p1975_p7 = scmp.lt.s32.totalorder %s1973_s6, %s1969_s13 }
 0x160   : > { %1394 = vmatpush.msra.mxu0 %v1318_v48  ;;  %1414 = vmatpush.msra.mxu1 %v1319_v27  ;;  %v1205_v62 = vmul.f32 %v1197_v4, %v3001_v8  ;;  %v1185_v10 = vmul.f32 %v1177_v15, %v2582_v59 }
 0x161   : > { %1458 = vmatpush.msra.mxu3 %v1245_v0  ;;  %v1186_v40 = vmul.f32 %v1178_v61, %v2590_v9  ;;  %p1971_p5 = pnand %p1970_p3, %p2146_p13  ;;  %p1976_p9 = por %p1975_p7, %p1974_p8 }
 0x162   : > { %1395 = vmatpush.msra.mxu0 %v1299_v31  ;;  %1415 = vmatpush.msra.mxu1 %v1300_v60 }
 0x163   : > { %1459 = vmatpush.msra.mxu3 %v1226_v28  ;;  %p1972_p12 = pneg %p1971_p5 }
 0x164   : > { %1396 = vmatpush.msra.mxu0 %v1280_v63  ;;  %1416 = vmatpush.msra.mxu1 %v1281_v13 }
 0x165   : > { %1460 = vmatpush.msra.mxu3 %v1207_v54  ;;  %p1977_p10 = pnand %p1976_p9, %p1972_p12 }
 0x166   : > { %1397 = vmatpush.msra.mxu0 %v1261_v6  ;;  %1417 = vmatpush.msra.mxu1 %v1262_v23 }
 0x167   : > { %1461 = vmatpush.msra.mxu3 %v1188_v37 }
 0x168   : > { %1780 = vmatmul.msk.f32.vlgmr.msra.gmra.mxu3 %vm678_vm13, %v2821_v49  ;;  %1398 = vmatpush.msra.mxu0 %v1242_v19 }
 0x169   : > { %1418 = vmatpush.msra.mxu1 %v1243_v11 }
 0x16a   : > { %1399 = vmatpush.msra.mxu0 %v1223_v55  ;;  %v1524_v55 = vld [vmem:[%s347_s22] sm:$0xff] }
 0x16b   : > { %1419 = vmatpush.msra.mxu1 %v1224_v3 }
 0x16c   : > { %1400 = vmatpush.msra.mxu0 %v1204_v45 }
 0x16d   : > { %1420 = vmatpush.msra.mxu1 %v1205_v62 }
 0x16e   : > { %1401 = vmatpush.msra.mxu0 %v1185_v10 }
 0x16f   : > { %1421 = vmatpush.msra.mxu1 %v1186_v40  ;;  %1777 = vmatmul.msk.f32.vlgmr.msra.gmra.mxu0 %vm678_vm13, %v2821_v49 }
 0x170   : > { %1778 = vmatmul.msk.f32.vlgmr.msra.gmra.mxu1 %vm678_vm13, %v2821_v49 }
 0x1a2   : > { %v699_v46 = vpop.f32.mrf.mxu0  ;;  %v719_v12 = vpop.f32.mrf.mxu1 }
 0x1a6   : > { %v739_v32 = vpop.f32.mrf.mxu2  ;;  %v759_v18 = vpop.f32.mrf.mxu3 }
 0x1ad   : > { %v1486_v53 = vpop.permute.xlu2 %1485 }
 0x1ce   : > { %v1139_v22 = vpop.f32.mrf.mxu2 }
 0x1cf   : > { %v1168_v25 = vadd.f32 %v1139_v22, %v739_v32 }
 0x1d7   : > { %v1159_v30 = vpop.f32.mrf.mxu3 }
 0x1d8   : > { %v1169_v39 = vadd.f32 %v1159_v30, %v759_v18 }
 0x1da   : > { %v1099_v51 = vpop.f32.mrf.mxu0  ;;  %v1119_v59 = vpop.f32.mrf.mxu1 }
 0x1db   : > { %v1166_v9 = vadd.f32 %v1099_v51, %v699_v46  ;;  %v1167_v58 = vadd.f32 %v1119_v59, %v719_v12 }
 0x1df   : > { %v1443_v7 = vpop.f32.mrf.mxu2 }
 0x1e0   : > { %v1472_v5 = vadd.f32 %v1443_v7, %v1168_v25 }
 0x1e2   : > { %v1490_v17 = vadd.f32 %v1486_v53, %v1472_v5 }
 0x1e4   : > { %v1499_v47 = vmul.f32 %v1490_v17, %v1490_v17 }
 0x1eb   : > { %v1463_v42 = vpop.f32.mrf.mxu3 }
 0x1ec   : > { %v1403_v38 = vpop.f32.mrf.mxu0  ;;  %v1473_v49 = vadd.f32 %v1463_v42, %v1169_v39 }
 0x1ed   : > { %v1470_v20 = vadd.f32 %v1403_v38, %v1166_v9  ;;  %v1423_v16 = vpop.f32.mrf.mxu1 }
 0x1ee   : > { %v1471_v1 = vadd.f32 %v1423_v16, %v1167_v58  ;;  %v1491_v44 = vadd.f32 %v1486_v53, %v1473_v49 }
 0x1ef   : > { %v1488_v57 = vadd.f32 %v1486_v53, %v1470_v20 }
 0x1f0   : > { %v1489_v48 = vadd.f32 %v1486_v53, %v1471_v1  ;;  %v1500_v28 = vmul.f32 %v1491_v44, %v1491_v44 }
 0x1f1   : > { %v1497_v27 = vmul.f32 %v1488_v57, %v1488_v57 }
 0x1f2   : > { %v1498_v0 = vmul.f32 %v1489_v48, %v1489_v48  ;;  %v1492_v33 = vadd.f32 %v1489_v48, %v1488_v57 }
 0x1f4   : > { %v1493_v31 = vadd.f32 %v1492_v33, %v1490_v17  ;;  %v1501_v60 = vadd.f32 %v1498_v0, %v1497_v27 }
 0x1f6   : > { %v1494_v34 = vadd.f32 %v1493_v31, %v1491_v44  ;;  %v1502_v26 = vadd.f32 %v1501_v60, %v1499_v47 }
 0x1f8   : > { %1495 = vadd.xlane.f32.xlu0 %v1494_v34  ;;  %v1503_v63 = vadd.f32 %v1502_v26, %v1500_v28 }
 0x1fa   : > { %1504 = vadd.xlane.f32.xlu1 %v1503_v63 }
 0x26b   : > { %v1496_v52 = vpop.xlane.xlu0 %1495 }
 0x26c   : > { %v1506_v13 = vmul.f32 0.001953125, %v1496_v52 }
 0x26d   : > { %v1505_v43 = vpop.xlane.xlu1 %1504 }
 0x26e   : > { %v1508_v54 = vmul.f32 %v1506_v13, %v1506_v13  ;;  %v1507_v41 = vmul.f32 0.001953125, %v1505_v43 }
 0x270   : > { %v1509_v6 = vsub.f32 %v1507_v41, %v1508_v54 }
 0x272   : > { %v1510_v56 = vmax.f32 %v1509_v6, 0.0 }
 0x274   : > { %v1511_v36 = vadd.f32 1e-05, %v1510_v56 }
 0x276   : > { %1871 = vrsqrt.f32 %v1511_v36  ;;  %vm1518_vm3 = vweird.f32 %v1511_v36 }
 0x27c   : > { %v1872_v23 = vpop.eup %1871 }
 0x27d   : > { %v1513_v21 = vmul.f32 %v1872_v23, %v1511_v36  ;;  %vm1519_vm2 = vweird.f32 %v1872_v23 }
 0x27e   : > { %vm1520_vm4 = vmor %vm1518_vm3, %vm1519_vm2 }
 0x27f   : > { %v1514_v37 = vmul.f32 %v1872_v23, %v1513_v21 }
 0x281   : > { %v1515_v50 = vmul.f32 0.5, %v1514_v37 }
 0x283   : > { %v1516_v19 = vsub.f32 1.5, %v1515_v50 }
 0x285   : > { %v1517_v29 = vmul.f32 %v1872_v23, %v1516_v19 }
 0x287   : > { %v1521_v11 = vsel %vm1520_vm4, %v1872_v23, %v1517_v29 }
 0x288   : > { %v1523_v4 = vmul.f32 %v1522_v24, %v1521_v11 }
 0x28a   : > { %1529 = vperm.xlu2 %1869, %v1523_v4   ;;  %v1525_v35 = vmul.f32 %v1523_v4, %v1506_v13 }
 0x28c   : > { %v1526_v15 = vsub.f32 %v1524_v55, %v1525_v35 }
 0x292   : > { %1538 = vperm.xlu2 %1869, %v1526_v15  }
 0x2e4   : > { %v1530_v2 = vpop.permute.xlu2 %1529 }
 0x2e5   : > { %v1532_v3 = vmul.f32 %v1530_v2, %v1488_v57  ;;  %v1533_v61 = vmul.f32 %v1530_v2, %v1489_v48  ;;  %v1534_v14 = vmul.f32 %v1530_v2, %v1490_v17  ;;  %v1535_v45 = vmul.f32 %v1530_v2, %v1491_v44 }
 0x2ec   : > { %v1539_v8 = vpop.permute.xlu2 %1538 }
 0x2ed   : > { %v2885_v62 = vadd.f32 %v1539_v8, %v1532_v3  ;;  %v2887_v10 = vadd.f32 %v1539_v8, %v1533_v61  ;;  %v2889_v40 = vadd.f32 %v1539_v8, %v1534_v14  ;;  %v2891_v32 = vadd.f32 %v1539_v8, %v1535_v45  ;;  %v1889_v61 = vld [vmem:[%s2183_s15] sm:$0xff]  ;;  %v1890_v8 = vld [vmem:[%s2183_s15 + $0x8] sm:$0xff] }
 0x2ef   : > { %v1781_v18 = vmul.f32 -1.442695, %v2885_v62  ;;  %v1782_v46 = vmul.f32 -1.442695, %v2887_v10  ;;  %v1783_v12 = vmul.f32 -1.442695, %v2889_v40 }
 0x2f0   : > { %v1784_v22 = vmul.f32 -1.442695, %v2891_v32 }
 0x2f1   : > { %1873 = vpow2.f32 %v1781_v18 }
 0x2f2   : > { %1875 = vpow2.f32 %v1782_v46  ;;  %v1891_v46 = vld [vmem:[%s2183_s15 + $0x10] sm:$0xff] }
 0x2f3   : > { %1877 = vpow2.f32 %v1783_v12  ;;  %v1892_v12 = vld [vmem:[%s2183_s15 + $0x18] sm:$0xff] }
 0x2f4   : > { %1879 = vpow2.f32 %v1784_v22 }
 0x2f7   : > { %v1874_v30 = vpop.eup %1873 }
 0x2f8   : > { %v1876_v51 = vpop.eup %1875  ;;  %v1557_v59 = vadd.f32 1.0, %v1874_v30 }
 0x2f9   : > { %v1878_v25 = vpop.eup %1877  ;;  %v1558_v7 = vadd.f32 1.0, %v1876_v51 }
 0x2fa   : > { %v1880_v9 = vpop.eup %1879  ;;  %v1559_v42 = vadd.f32 1.0, %v1878_v25  ;;  %1881 = vrcp.f32 %v1557_v59  ;;  %v1570_v39 = vand.u32 2147483647, %v1557_v59  ;;  %v1572_v5 = vand.u32 2147483648, %v1557_v59 }
 0x2fb   : > { %v2897_v58 = vadd.f32 1.0, %v1880_v9  ;;  %1883 = vrcp.f32 %v1558_v7  ;;  %vm1566_vm5 = vweird.f32 %v1557_v59  ;;  %vm1581_vm6 = vweird.f32 %v1558_v7 }
 0x2fc   : > { %1885 = vrcp.f32 %v1559_v42  ;;  %v1585_v1 = vand.u32 2147483647, %v1558_v7  ;;  %v1587_v57 = vand.u32 2147483648, %v1558_v7  ;;  %vm2900_vm7 = vcmp.eq.f32.partialorder %v1570_v39, 8.507059e+37 }
 0x2fd   : > { %1887 = vrcp.f32 %v2897_v58  ;;  %v1573_v27 = vor.u32 1.1754944e-38, %v1572_v5  ;;  %vm1596_vm8 = vweird.f32 %v1559_v42  ;;  %v1600_v31 = vand.u32 2147483647, %v1559_v42 }
 0x2fe   : > { %v1602_v47 = vand.u32 2147483648, %v1559_v42  ;;  %vm2905_vm11 = vcmp.eq.f32.partialorder %v1585_v1, 8.507059e+37  ;;  %v1588_v52 = vor.u32 1.1754944e-38, %v1587_v57  ;;  %vm1611_vm14 = vweird.f32 %v2897_v58 }
 0x2ff   : > { %v1615_v6 = vand.u32 2147483647, %v2897_v58  ;;  %v1617_v56 = vand.u32 2147483648, %v2897_v58  ;;  %vm1601_vm2 = vcmp.eq.f32.partialorder %v1600_v31, 8.507059e+37 }
 0x300   : > { %v1882_v38 = vpop.eup %1881  ;;  %v1603_v19 = vor.u32 1.1754944e-38, %v1602_v47 }
 0x301   : > { %v1884_v53 = vpop.eup %1883  ;;  %v1562_v20 = vmul.f32 %v1882_v38, %v1557_v59  ;;  %vm1567_vm9 = vweird.f32 %v1882_v38  ;;  %v1618_v55 = vor.u32 1.1754944e-38, %v1617_v56  ;;  %vm1616_vm4 = vcmp.eq.f32.partialorder %v1615_v6, 8.507059e+37 }
 0x302   : > { %v1886_v16 = vpop.eup %1885  ;;  %v1577_v49 = vmul.f32 %v1884_v53, %v1558_v7  ;;  %vm1582_vm10 = vweird.f32 %v1884_v53  ;;  %vm1568_vm13 = vmor %vm1566_vm5, %vm1567_vm9 }
 0x303   : > { %v1563_v17 = vsub.f32 1.0, %v1562_v20  ;;  %v1592_v44 = vmul.f32 %v1886_v16, %v1559_v42  ;;  %v1888_v0 = vpop.eup %1887  ;;  %vm1597_vm12 = vweird.f32 %v1886_v16  ;;  %vm1583_vm15 = vmor %vm1581_vm6, %vm1582_vm10 }
 0x304   : > { %v1578_v33 = vsub.f32 1.0, %v1577_v49  ;;  %v1607_v28 = vmul.f32 %v1888_v0, %v2897_v58  ;;  %vm1612_vm0 = vweird.f32 %v1888_v0  ;;  %vm1598_vm1 = vmor %vm1596_vm8, %vm1597_vm12 }
 0x305   : > { %v1564_v60 = vmul.f32 %v1882_v38, %v1563_v17  ;;  %v1593_v34 = vsub.f32 1.0, %v1592_v44  ;;  %vm1613_vm3 = vmor %vm1611_vm14, %vm1612_vm0 }
 0x306   : > { %v1579_v26 = vmul.f32 %v1884_v53, %v1578_v33  ;;  %v1608_v54 = vsub.f32 1.0, %v1607_v28 }
 0x307   : > { %v1565_v13 = vadd.f32 %v1882_v38, %v1564_v60  ;;  %v1594_v43 = vmul.f32 %v1886_v16, %v1593_v34 }
 0x308   : > { %v1580_v41 = vadd.f32 %v1884_v53, %v1579_v26  ;;  %v1609_v21 = vmul.f32 %v1888_v0, %v1608_v54 }
 0x309   : > { %v1569_v36 = vsel %vm1568_vm13, %v1882_v38, %v1565_v13  ;;  %v1595_v23 = vadd.f32 %v1886_v16, %v1594_v43 }
 0x30a   : > { %v1574_v37 = vsel %vm2900_vm7, %v1573_v27, %v1569_v36  ;;  %v1584_v50 = vsel %vm1583_vm15, %v1884_v53, %v1580_v41  ;;  %v1610_v11 = vadd.f32 %v1888_v0, %v1609_v21 }
 0x30b   : > { %v1589_v29 = vsel %vm2905_vm11, %v1588_v52, %v1584_v50  ;;  %v1599_v24 = vsel %vm1598_vm1, %v1886_v16, %v1595_v23  ;;  %v1621_v4 = vmul.f32 %v1574_v37, %v2885_v62 }
 0x30c   : > { %v1604_v35 = vsel %vm1601_vm2, %v1603_v19, %v1599_v24  ;;  %v1622_v15 = vmul.f32 %v1589_v29, %v2887_v10  ;;  %v1614_v2 = vsel %vm1613_vm3, %v1888_v0, %v1610_v11 }
 0x30d   : > { %v1623_v3 = vmul.f32 %v1604_v35, %v2889_v40  ;;  %v1625_v14 = vadd.f32 %v1889_v61, %v1621_v4  ;;  %v1619_v45 = vsel %vm1616_vm4, %v1618_v55, %v1614_v2 }
 0x30e   : > { %v1626_v62 = vadd.f32 %v1890_v8, %v1622_v15  ;;  %v1624_v18 = vmul.f32 %v1619_v45, %v2891_v32 }
 0x30f   : > { %v1627_v10 = vadd.f32 %v1891_v46, %v1623_v3  ;;  %1629 = vst [vmem:[%s339_s8] sm:$0xff] %v1625_v14 }
 0x310   : > { %1630 = vst [vmem:[%s339_s8 + $0x8] sm:$0xff] %v1626_v62  ;;  %v1628_v22 = vadd.f32 %v1892_v12, %v1624_v18 }
 0x311   : > { %1631 = vst [vmem:[%s339_s8 + $0x10] sm:$0xff] %v1627_v10 }
 0x312   : > { %1632 = vst [vmem:[%s339_s8 + $0x18] sm:$0xff] %v1628_v22 }
 0x313   : > { %1980 = shalt.err (!%p1977_p10)
}
 0x314   : > { %1798 = dma.vmem_to_hbm [thread:$0]  (%p2146_p13), %s1648_s9, 512, %s1650_s18, %s1634_s11  }
 0x315 PF: > { %s1661_s20 = sand.u32 1, %s2011_s24   ;;  %p3006_p11 = scmp.ge.s32.totalorder %s2023_s27, 2 }
 0x316   : > { %s1662_s15 = scalar_lea.sflag [#allocation6], %s1661_s20 }
 0x317   : > { %p1809_p0 = pnand %p3006_p11, %p2151_p4 }
 0x319   : > { %p1810_p2 = pneg %p1809_p0 }
 0x31b   : > { %2006 = dma.done.wait (%p1810_p2), %s1662_s15, 512  }
 0x31c   : > { %2008 = vsyncadd (%p1810_p2), %s1662_s15, 4294966784  ;;  %p21_p6 = scmp.ge.s32.totalorder %s2126_s14, 4   ;;  %s3007_s24 = smov %s2015_s25 }
 0x31d   : > { %s3008_s25 = smov %s2019_s26  ;;  %s3009_s26 = smov %s2138_s17 }
 0x31e   : > { %s3010_s27 = smov %s2126_s14  ;;  %23 = sbr.rel (!%p21_p6) target bundleno = 6 (0x6), region = 131 }
 0x323   :  { %1668 = vsyncpa [#allocation5], 1 }
 0x324   :  { %1670 = vsyncpa [#allocation5 + $0x1], 1 }
 0x325   :  { %1671 = vsyncpa [#allocation8], 1 }
 0x326   :  { %1672 = vsyncpa [#allocation6], 1 }
 0x327   :  { %1674 = vsyncpa [#allocation6 + $0x1], 1 }

// kernel: tpu_custom_call.1
= control target key start
LH: loop header
LB: loop body
LE: loop exit
PB: predicated region body
PF: predicated region fallthrough
CT: control target
= control target key end

     0   :  { %12 = vsyncpa [#allocation5], 0  ;;  %s2965_s0 = inlined_call_operand.hbm [shape: f32[2,8,512], index: 0, kind: input, shape index: {}]   ;;  %s2966_s1 = inlined_call_operand.vmem [shape: f32[3,8,72], index: 1, kind: input, shape index: {}]   ;;  %s2967_s2 = inlined_call_operand.vmem [shape: f32[8,1], index: 2, kind: input, shape index: {}]   ;;  %s2968_s3 = inlined_call_operand.vmem [shape: f32[2,8,1], index: 3, kind: input, shape index: {}]   ;;  %s2969_s4 = inlined_call_operand.vmem [shape: f32[2,8,1], index: 4, kind: input, shape index: {}]   ;;  %s2970_s5 = inlined_call_operand.hbm [shape: f32[27,512], index: 5, kind: input, shape index: {}]   ;;  %s2971_s6 = inlined_call_operand.vmem [shape: f32[8,8], index: 6, kind: input, shape index: {}]   ;;  %s2972_s7 = inlined_call_operand.hbm [shape: f32[2,8,512], index: 7, kind: output, shape index: {}]  }
   0x1   :  { %14 = vsyncpa [#allocation5 + $0x1], 0 }
   0x2   :  { %15 = vsyncpa [#allocation8], 0 }
   0x3   :  { %16 = vsyncpa [#allocation6], 0 }
   0x4   :  { %18 = vsyncpa [#allocation6 + $0x1], 0  ;;  %s2086_s24 = smov 0   ;;  %s2088_s25 = smov 0  }
   0x5   :  { %s2090_s26 = smov 0   ;;  %s2092_s27 = smov 0  }
   0x6 LB: > { %s234_s29 = sshll.u32 %s2970_s5, 4  ;;  %s2110_s30 = sadd.s32 4294967295, %s2023_s27   ;;  %s2023_s27 = sphi %s2092_s27, %s3010_s27   ;;  %s2019_s26 = sphi %s2090_s26, %s3009_s26   ;;  %s2015_s25 = sphi %s2088_s25, %s3008_s25   ;;  %s2011_s24 = sphi %s2086_s24, %s3007_s24   ;;  %s235_s29 = int_to_ptr.hbm [resolvable:$true] %s234_s29 }
   0x7   : > { %p1755_p0 = scmp.ge.s32.totalorder %s2023_s27, 1  ;;  %p45_p1 = scmp.eq.s32.totalorder %s2110_s30, 0 }
   0x8   : > { %p217_p2 = scmp.lt.s32.totalorder %s2023_s27, 3  ;;  %s2025_s9 = smov [#allocation7]  }
   0x9   : > { %s236_s10 = sshll.u32 %s2025_s9, 4  ;;  %s2026_s11 = smov 512   ;;  %s237_s10 = int_to_ptr.vmem [resolvable:$true] %s236_s10 }
   0xa   : > { %p2115_p3 = pnand %p1755_p0, %p217_p2  ;;  %s2027_s12 = smov 32  }
   0xb   : > { %s1754_s13 = sadd.s32 4294967294, %s2023_s27   ;;  %s2126_s14 = sadd.s32 1, %s2023_s27  }
   0xc   : > { %p1800_p4 = pneg %p2115_p3  ;;  %s31_s15 = sadd.s32 1, %s2019_s26 }
   0xd   : > { %s28_s16 = ssub.s32 %s2023_s27, %s2126_s14  ;;  %p38_p7 = scmp.ne.s32.totalorder %s2019_s26, %s2015_s25 }
   0xe   : > { %p1801_p6 = pnand %p1800_p4, %p45_p1  ;;  %p29_p8 = scmp.eq.s32.totalorder %s28_s16, 0 }
   0xf   : > { %p39_p9 = scmp.eq.s32.totalorder %s2023_s27, 0  ;;  %p44_p10 = scmp.ne.s32.totalorder %s2015_s25, %s2011_s24 }
  0x10   : > { %1803 = dma.hbm_to_vmem [thread:$0]  (!%p1801_p6), %s235_s29, 2048, %s237_s10, [#allocation8], %s2026_s11, %s2026_s11, %s2027_s12  }
  0x11   : > { %p204_p11 = scmp.eq.s32.totalorder %s2110_s30, 1  ;;  %p2142_p12 = por %p45_p1, %p44_p10 }
  0x12   : > { %s2138_s17 = scalar_select %p29_p8, %s2019_s26, %s31_s15  }
  0x13   : > { %p2146_p13 = por %p204_p11, %p38_p7  ;;  %p210_p0 = scmp.eq.s32.totalorder %s1754_s13, 1 }
  0x14   : > { %p40_p2 = por %p39_p9, %p38_p7  ;;  %s253_s20 = sand.u32 1, %s2019_s26  }
  0x15   : > { %p2151_p4 = por %p210_p0, %p44_p10  ;;  %p1813_p6 = scmp.lt.s32.totalorder %s2023_s27, 2 }
  0x16   : > { %s1758_s22 = sshll.u32 %s253_s20, 5  ;;  %s1790_s23 = sshll.u32 %s2023_s27, 5 }
  0x17   : > { %s262_s29 = scalar_lea.hbm %s2965_s0, %s1790_s23  ;;  %s257_s10 = scalar_lea.vmem [#allocation4], %s1758_s22 }
  0x18   : > { %s264_s9 = sshll.u32 %s262_s29, 4  ;;  %s266_s11 = sshll.u32 %s257_s10, 4  ;;  %s265_s9 = int_to_ptr.hbm [resolvable:$true] %s264_s9  ;;  %s267_s11 = int_to_ptr.vmem [resolvable:$true] %s266_s11 }
  0x19   : > { %p2160_p8 = pnand %p1813_p6, %p40_p2  ;;  %s254_s13 = scalar_lea.sflag [#allocation5], %s253_s20 }
  0x1a   : > { %s1923_s15 = sshra.s32 %s265_s9, 4  ;;  %s1930_s22 = scalar_lea.hbm %s2965_s0, 64  ;;  %s1924_s15 = int_to_ptr.hbm [resolvable:$true] %s1923_s15 }
  0x1b   : > { %s1925_s16 = scalar_lea.hbm %s1924_s15, 32  ;;  %p1927_p9 = pneg %p2160_p8 }
  0x1c   : > { %p1926_p7 = scmp.ne.s32.totalorder %s1924_s15, %s1925_s16  ;;  %p1931_p0 = scmp.lt.s32.totalorder %s1924_s15, %s2965_s0 }
  0x1d   : > { %p1932_p2 = scmp.lt.s32.totalorder %s1930_s22, %s1925_s16 }
  0x1e   : > { %p1928_p10 = pnand %p1927_p9, %p1926_p7 }
  0x1f   : > { %p1933_p6 = por %p1932_p2, %p1931_p0 }
  0x20   : > { %p1929_p11 = pneg %p1928_p10 }
  0x22   : > { %p1934_p5 = pnand %p1933_p6, %p1929_p11 }
  0x24   : > { %1937 = shalt.err (!%p1934_p5)
}
  0x25   : > { %1807 = dma.hbm_to_vmem [thread:$0]  (!%p2160_p8), %s265_s9, 512, %s267_s11, %s254_s13  }
  0x26   : > { %289 = sbr.rel (%p2115_p3) target bundleno = 789 (0x315), region = 48 }
  0x2b   : > { %s2177_s20 = sand.u32 1, %s2015_s25  }
  0x2c   : > { %s1762_s10 = sshll.u32 %s2177_s20, 5  ;;  %s292_s23 = scalar_lea.sflag [#allocation5], %s2177_s20 }
  0x2d   : > { %s2183_s15 = scalar_lea.vmem [#allocation4], %s1762_s10 }
  0x2e   : > { %1998 = dma.done.wait (%p2142_p12), %s292_s23, 512  }
  0x2f   : > { %2000 = vsyncadd (%p2142_p12), %s292_s23, 4294966784 }
  0x30   : > { %2002 = dma.done.wait (%p45_p1), [#allocation8], 2048  }
  0x31   : > { %2004 = vsyncadd (%p45_p1), [#allocation8], 4294965248  ;;  %v2194_v0 = vld [vmem:[%s2183_s15 + $0x18] sm:$0xff]  ;;  %v2197_v1 = vld [vmem:[%s2183_s15 + $0x8] sm:$0xff]  ;;  %s2028_s8 = smov 55   ;;  %s2029_s9 = smov 56   ;;  %v360_v6 = vlaneseq }
  0x32   : > { %615 = vrot.lane.b32.xlu2 %v2194_v0, %s2028_s8  ;;  %579 = vrot.lane.b32.xlu1 %v2197_v1, %s2029_s9  ;;  %v2203_v2 = vld [vmem:[%s2183_s15 + $0x10] sm:$0xff]  ;;  %s2030_s18 = smov 57   ;;  %v2209_v3 = vld [vmem:[%s2183_s15] sm:$0xff]  ;;  %s2031_s11 = smov 63   ;;  %vm678_vm13 = vcmask 588800  }
  0x33   : > { %611 = vrot.lane.b32.xlu0 %v2197_v1, %s2028_s8  ;;  %s2032_s12 = smov 64   ;;  %s2033_s13 = smov 65   ;;  %v2254_v7 = vand.u32 127, %v360_v6  ;;  %v623_v8 = vld [vmem:[#allocation7 + $0x20] ss:$8 sm:$0xf] }
  0x34   : > { %s2034_s16 = smov 119   ;;  %s2035_s6 = smov 71   ;;  %v625_v9 = vperm.slane %v623_v8, 0  ;;  %v626_v13 = vperm.slane %v623_v8, 1  ;;  %v627_v20 = vperm.slane %v623_v8, 2  ;;  %v628_v21 = vperm.slane %v623_v8, 3 }
  0x35   : > { %s2036_s22 = smov 120   ;;  %s2037_s28 = smov 72   ;;  %vm617_vm0 = vcmp.lt.s32.totalorder %v2254_v7, 55  ;;  %v2286_v19 = vld [vmem:[#allocation7 + $0x7] ss:$8 sm:$0xf] }
  0x36   : > { %s2038_s29 = smov 121   ;;  %s2039_s23 = smov 73   ;;  %vm585_vm1 = vcmp.lt.s32.totalorder %v2254_v7, 56  ;;  %v595_v25 = vperm.slane %v2286_v19, 2  ;;  %v596_v33 = vperm.slane %v2286_v19, 3  ;;  %vm553_vm2 = vcmp.lt.s32.totalorder %v2254_v7, 57 }
  0x37   : > { %v2309_v31 = vld [vmem:[#allocation7 + $0x6] ss:$8 sm:$0xf]  ;;  %v2340_v44 = vld [vmem:[#allocation7 + $0x5] ss:$8 sm:$0xf] }
  0x38   : > { %v563_v34 = vperm.slane %v2309_v31, 2  ;;  %v564_v39 = vperm.slane %v2309_v31, 3  ;;  %vm521_vm3 = vcmp.lt.s32.totalorder %v2254_v7, 63  ;;  %v531_v46 = vperm.slane %v2340_v44, 2  ;;  %p340_p1 = scmp.lt.s32.totalorder %s2110_s30, 1 }
  0x39   : > { %v2356_v52 = vld [vmem:[#allocation7 + $0x4] ss:$8 sm:$0xf]  ;;  %vm489_vm4 = vcmp.lt.s32.totalorder %v2254_v7, 64  ;;  %v593_v54 = vperm.slane %v2286_v19, 0  ;;  %v594_v55 = vperm.slane %v2286_v19, 1 }
  0x3a   : > { %547 = vrot.lane.b32.xlu2 %v2197_v1, %s2030_s18  ;;  %581 = vrot.lane.b32.xlu1 %v2203_v2, %s2029_s9  ;;  %v499_v53 = vperm.slane %v2356_v52, 2  ;;  %v561_v6 = vperm.slane %v2309_v31, 0  ;;  %v529_v19 = vperm.slane %v2340_v44, 0  ;;  %vm457_vm5 = vcmp.lt.s32.totalorder %v2254_v7, 65 }
  0x3b   : > { %613 = vrot.lane.b32.xlu0 %v2203_v2, %s2028_s8  ;;  %vm1017_vm6 = vcmp.lt.s32.totalorder %v2254_v7, 119  ;;  %vm425_vm7 = vcmp.lt.s32.totalorder %v2254_v7, 71  ;;  %vm393_vm8 = vcmp.lt.s32.totalorder %v2254_v7, 72  ;;  %vm362_vm9 = vcmp.lt.s32.totalorder %v2254_v7, 73 }
  0x3c   : > { %vm985_vm10 = vcmp.lt.s32.totalorder %v2254_v7, 120  ;;  %vm953_vm11 = vcmp.lt.s32.totalorder %v2254_v7, 121  ;;  %vm921_vm12 = vcmp.lt.s32.totalorder %v2254_v7, 127  ;;  %vm870_vm14 = vcmp.lt.s32.totalorder %v2254_v7, 1 }
  0x3d   : > { %vm838_vm15 = vcmp.lt.s32.totalorder %v2254_v7, 7 }
  0x42   : > { %583 = vrot.lane.b32.xlu1 %v2194_v0, %s2029_s9  ;;  %609 = vrot.lane.b32.xlu2 %v2209_v3, %s2028_s8  ;;  %s2040_s8 = smov 127  }
  0x43   : > { %549 = vrot.lane.b32.xlu0 %v2203_v2, %s2030_s18 }
  0x4a   : > { %517 = vrot.lane.b32.xlu1 %v2203_v2, %s2031_s11  ;;  %551 = vrot.lane.b32.xlu2 %v2194_v0, %s2030_s18 }
  0x4b   : > { %515 = vrot.lane.b32.xlu0 %v2197_v1, %s2031_s11 }
  0x52   : > { %483 = vrot.lane.b32.xlu1 %v2197_v1, %s2032_s12  ;;  %485 = vrot.lane.b32.xlu2 %v2203_v2, %s2032_s12 }
  0x53   : > { %577 = vrot.lane.b32.xlu0 %v2209_v3, %s2029_s9  ;;  %s2041_s9 = smov 1  }
  0x5a   : > { %545 = vrot.lane.b32.xlu1 %v2209_v3, %s2030_s18  ;;  %451 = vrot.lane.b32.xlu2 %v2197_v1, %s2033_s13  ;;  %s2042_s18 = smov 7  }
  0x5b   : > { %519 = vrot.lane.b32.xlu0 %v2194_v0, %s2031_s11 }
  0x62   : > { %487 = vrot.lane.b32.xlu1 %v2194_v0, %s2032_s12  ;;  %513 = vrot.lane.b32.xlu2 %v2209_v3, %s2031_s11  ;;  %s2043_s11 = smov 8  }
  0x63   : > { %453 = vrot.lane.b32.xlu0 %v2203_v2, %s2033_s13 }
  0x6a   : > { %1015 = vrot.lane.b32.xlu1 %v2194_v0, %s2034_s16  ;;  %419 = vrot.lane.b32.xlu2 %v2197_v1, %s2035_s6 }
  0x6b   : > { %1013 = vrot.lane.b32.xlu0 %v2203_v2, %s2034_s16 }
  0x72   : > { %455 = vrot.lane.b32.xlu1 %v2194_v0, %s2033_s13  ;;  %481 = vrot.lane.b32.xlu2 %v2209_v3, %s2032_s12  ;;  %s2044_s12 = smov 9  }
  0x73   : > { %421 = vrot.lane.b32.xlu0 %v2203_v2, %s2035_s6 }
  0x7a   : > { %983 = vrot.lane.b32.xlu1 %v2194_v0, %s2036_s22  ;;  %1009 = vrot.lane.b32.xlu2 %v2209_v3, %s2034_s16 }
  0x7b   : > { %981 = vrot.lane.b32.xlu0 %v2203_v2, %s2036_s22 }
  0x82   : > { %389 = vrot.lane.b32.xlu1 %v2203_v2, %s2037_s28  ;;  %423 = vrot.lane.b32.xlu2 %v2194_v0, %s2035_s6 }
  0x83   : > { %387 = vrot.lane.b32.xlu0 %v2197_v1, %s2037_s28 }
  0x8a   : > { %949 = vrot.lane.b32.xlu1 %v2203_v2, %s2038_s29  ;;  %951 = vrot.lane.b32.xlu2 %v2194_v0, %s2038_s29 }
  0x8b   : > { %449 = vrot.lane.b32.xlu0 %v2209_v3, %s2033_s13 }
  0x8c   : > { %v616_v4 = vpop.permute.xlu2 %615 }
  0x92   : > { %1011 = vrot.lane.b32.xlu1 %v2197_v1, %s2034_s16  ;;  %354 = vrot.lane.b32.xlu2 %v2197_v1, %s2039_s23 }
  0x93   : > { %977 = vrot.lane.b32.xlu0 %v2209_v3, %s2036_s22 }
  0x94   : > { %v2252_v5 = vpop.permute.xlu2 %547 }
  0x9a   : > { %391 = vrot.lane.b32.xlu1 %v2194_v0, %s2037_s28  ;;  %417 = vrot.lane.b32.xlu2 %v2209_v3, %s2035_s6  ;;  %s1973_s6 = scalar_lea.hbm %s2972_s7, 64 }
  0x9b   : > { %356 = vrot.lane.b32.xlu0 %v2203_v2, %s2039_s23 }
  0x9c   : > { %v610_v10 = vpop.permute.xlu2 %609 }
  0x9d   : > { %v2264_v11 = vsel %vm617_vm0, %v616_v4, %v610_v10 }
  0x9e   : > { %v633_v12 = vmul.f32 %v625_v9, %v2264_v11 }
  0xa0   : > { %689 = vmatpush.msra.mxu0 %v633_v12  ;;  %v532_v12 = vperm.slane %v2340_v44, 3 }
  0xa2   : > { %919 = vrot.lane.b32.xlu1 %v2194_v0, %s2040_s8  ;;  %945 = vrot.lane.b32.xlu2 %v2209_v3, %s2038_s29 }
  0xa3   : > { %917 = vrot.lane.b32.xlu0 %v2203_v2, %s2040_s8 }
  0xa4   : > { %v2273_v14 = vpop.permute.xlu1 %579  ;;  %v2275_v15 = vpop.permute.xlu2 %551 }
  0xa5   : > { %v612_v16 = vpop.permute.xlu0 %611 }
  0xa6   : > { %v2279_v17 = vsel %vm617_vm0, %v610_v10, %v612_v16  ;;  %v562_v10 = vperm.slane %v2309_v31, 1 }
  0xa7   : > { %v634_v18 = vmul.f32 %v626_v13, %v2279_v17 }
  0xa9   : > { %709 = vmatpush.msra.mxu1 %v634_v18 }
  0xaa   : > { %358 = vrot.lane.b32.xlu1 %v2194_v0, %s2039_s23  ;;  %385 = vrot.lane.b32.xlu2 %v2209_v3, %s2037_s28  ;;  %s1791_s28 = sshll.u32 %s2110_s30, 5 }
  0xab   : > { %979 = vrot.lane.b32.xlu0 %v2197_v1, %s2036_s22 }
  0xac   : > { %v582_v22 = vpop.permute.xlu1 %581  ;;  %v2291_v23 = vpop.permute.xlu2 %485 }
  0xad   : > { %v614_v24 = vpop.permute.xlu0 %613  ;;  %v2297_v26 = vsel %vm585_vm1, %v2273_v14, %v582_v22 }
  0xae   : > { %v2301_v27 = vsel %vm617_vm0, %v612_v16, %v614_v24  ;;  %v2305_v28 = vsel %vm617_vm0, %v614_v24, %v616_v4  ;;  %v603_v32 = vmul.f32 %v595_v25, %v2297_v26  ;;  %v498_v25 = vperm.slane %v2356_v52, 1 }
  0xaf   : > { %v635_v29 = vmul.f32 %v627_v20, %v2301_v27  ;;  %v636_v30 = vmul.f32 %v628_v21, %v2305_v28  ;;  %v530_v20 = vperm.slane %v2340_v44, 1  ;;  %vm806_vm0 = vcmp.lt.s32.totalorder %v2254_v7, 8 }
  0xb1   : > { %729 = vmatpush.msra.mxu2 %v635_v29  ;;  %749 = vmatpush.msra.mxu3 %v636_v30  ;;  %v2424_v29 = vld [vmem:[#allocation7 + $0x3] ss:$8 sm:$0xf] }
  0xb2   : > { %947 = vrot.lane.b32.xlu1 %v2197_v1, %s2038_s29  ;;  %352 = vrot.lane.b32.xlu2 %v2209_v3, %s2039_s23  ;;  %s1645_s23 = scalar_lea.hbm %s2972_s7, %s1791_s28 }
  0xb3   : > { %730 = vmatpush.msra.mxu2 %v603_v32  ;;  %913 = vrot.lane.b32.xlu0 %v2209_v3, %s2040_s8 }
  0xb4   : > { %v584_v35 = vpop.permute.xlu1 %583  ;;  %v2321_v36 = vpop.permute.xlu2 %451 }
  0xb5   : > { %v2325_v37 = vsel %vm585_vm1, %v582_v22, %v584_v35  ;;  %v550_v38 = vpop.permute.xlu0 %549 }
  0xb6   : > { %v2331_v40 = vsel %vm553_vm2, %v550_v38, %v2275_v15  ;;  %v2336_v41 = vsel %vm553_vm2, %v2252_v5, %v550_v38  ;;  %v604_v42 = vmul.f32 %v596_v33, %v2325_v37  ;;  %v500_v33 = vperm.slane %v2356_v52, 3 }
  0xb7   : > { %v571_v43 = vmul.f32 %v563_v34, %v2336_v41  ;;  %v572_v45 = vmul.f32 %v564_v39, %v2331_v40  ;;  %v467_v34 = vperm.slane %v2424_v29, 2 }
  0xb8   : > { %750 = vmatpush.msra.mxu3 %v604_v42 }
  0xb9   : > { %731 = vmatpush.msra.mxu2 %v571_v43 }
  0xba   : > { %866 = vrot.lane.b32.xlu1 %v2203_v2, %s2041_s9  ;;  %915 = vrot.lane.b32.xlu2 %v2197_v1, %s2040_s8  ;;  %s339_s8 = scalar_lea.vmem [#allocation9], %s1762_s10 }
  0xbb   : > { %864 = vrot.lane.b32.xlu0 %v2197_v1, %s2041_s9  ;;  %751 = vmatpush.msra.mxu3 %v572_v45 }
  0xbc   : > { %v518_v47 = vpop.permute.xlu1 %517  ;;  %v514_v48 = vpop.permute.xlu2 %513 }
  0xbd   : > { %v516_v49 = vpop.permute.xlu0 %515 }
  0xbe   : > { %v2353_v50 = vsel %vm521_vm3, %v516_v49, %v518_v47  ;;  %v2414_v21 = vsel %vm521_vm3, %v514_v48, %v516_v49 }
  0xbf   : > { %v539_v51 = vmul.f32 %v531_v46, %v2353_v50  ;;  %v538_v32 = vmul.f32 %v530_v20, %v2414_v21 }
  0xc1   : > { %732 = vmatpush.msra.mxu2 %v539_v51 }
  0xc2   : > { %834 = vrot.lane.b32.xlu1 %v2203_v2, %s2042_s18  ;;  %868 = vrot.lane.b32.xlu2 %v2194_v0, %s2041_s9 }
  0xc3   : > { %832 = vrot.lane.b32.xlu0 %v2197_v1, %s2042_s18 }
  0xc4   : > { %v484_v56 = vpop.permute.xlu1 %483  ;;  %v2368_v57 = vpop.permute.xlu2 %419 }
  0xc5   : > { %v2373_v58 = vsel %vm489_vm4, %v484_v56, %v2291_v23  ;;  %v578_v59 = vpop.permute.xlu0 %577 }
  0xc6   : > { %2986 = vst [vmem:[#allocation13_spill] sm:$0xff] %v2373_v58  ;;  %v2378_v60 = vsel %vm585_vm1, %v578_v59, %v2273_v14  ;;  %v2382_v61 = vsel %vm585_vm1, %v584_v35, %v578_v59  ;;  %v507_v62 = vmul.f32 %v499_v53, %v2373_v58  ;;  %v497_v35 = vperm.slane %v2356_v52, 0  ;;  %v2606_v58 = vld [vmem:[#allocation7 + $0x25] ss:$8 sm:$0xf] }
  0xc7   : > { %v601_v63 = vmul.f32 %v593_v54, %v2382_v61  ;;  %v602_v4 = vmul.f32 %v594_v55, %v2378_v60  ;;  %v431_v54 = vld [vmem:[#allocation7 + $0x2] ss:$8 sm:$0xf]  ;;  %v468_v55 = vperm.slane %v2424_v29, 3  ;;  %vm774_vm1 = vcmp.lt.s32.totalorder %v2254_v7, 9 }
  0xc8   : > { %733 = vmatpush.msra.mxu2 %v507_v62 }
  0xc9   : > { %690 = vmatpush.msra.mxu0 %v601_v63  ;;  %710 = vmatpush.msra.mxu1 %v602_v4  ;;  %v436_v63 = vperm.slane %v431_v54, 3 }
  0xca   : > { %802 = vrot.lane.b32.xlu1 %v2203_v2, %s2043_s11  ;;  %836 = vrot.lane.b32.xlu2 %v2194_v0, %s2042_s18 }
  0xcb   : > { %800 = vrot.lane.b32.xlu0 %v2197_v1, %s2043_s11 }
  0xcc   : > { %v546_v8 = vpop.permute.xlu1 %545  ;;  %v482_v9 = vpop.permute.xlu2 %481 }
  0xcd   : > { %v2399_v13 = vsel %vm553_vm2, %v546_v8, %v2252_v5  ;;  %v2404_v14 = vsel %vm553_vm2, %v2275_v15, %v546_v8  ;;  %v520_v16 = vpop.permute.xlu0 %519  ;;  %v2428_v30 = vsel %vm489_vm4, %v482_v9, %v484_v56  ;;  %v435_v56 = vperm.slane %v431_v54, 2 }
  0xce   : > { %v2408_v18 = vsel %vm521_vm3, %v518_v47, %v520_v16  ;;  %v2418_v5 = vsel %vm521_vm3, %v520_v16, %v514_v48  ;;  %v569_v15 = vmul.f32 %v561_v6, %v2404_v14  ;;  %v570_v22 = vmul.f32 %v562_v10, %v2399_v13  ;;  %2987 = vst [vmem:[#allocation14_spill] sm:$0xff] %v2428_v30 }
  0xcf   : > { %v540_v24 = vmul.f32 %v532_v12, %v2408_v18  ;;  %v537_v31 = vmul.f32 %v529_v19, %v2418_v5  ;;  %v506_v39 = vmul.f32 %v498_v25, %v2428_v30 }
  0xd0   : > { %691 = vmatpush.msra.mxu0 %v569_v15  ;;  %711 = vmatpush.msra.mxu1 %v570_v22  ;;  %v2507_v22 = vld [vmem:[#allocation7 + $0x1] ss:$8 sm:$0xf] }
  0xd1   : > { %752 = vmatpush.msra.mxu3 %v540_v24  ;;  %v403_v24 = vperm.slane %v2507_v22, 2 }
  0xd2   : > { %768 = vrot.lane.b32.xlu1 %v2197_v1, %s2044_s12  ;;  %692 = vmatpush.msra.mxu0 %v537_v31 }
  0xd3   : > { %862 = vrot.lane.b32.xlu0 %v2209_v3, %s2041_s9  ;;  %712 = vmatpush.msra.mxu1 %v538_v32  ;;  %s341_s9 = scalar_select %p340_p1, %s2110_s30, 1 }
  0xd4   : > { %v488_v38 = vpop.permute.xlu1 %487  ;;  %v2441_v42 = vpop.permute.xlu2 %1009  ;;  %770 = vrot.lane.b32.xlu2 %v2203_v2, %s2044_s12 }
  0xd5   : > { %v2446_v43 = vsel %vm489_vm4, %v2291_v23, %v488_v38  ;;  %v2450_v44 = vsel %vm489_vm4, %v488_v38, %v482_v9  ;;  %v454_v45 = vpop.permute.xlu0 %453  ;;  %713 = vmatpush.msra.mxu1 %v506_v39  ;;  %v466_v38 = vperm.slane %v2424_v29, 1 }
  0xd6   : > { %v2457_v46 = vsel %vm457_vm5, %v2321_v36, %v454_v45  ;;  %v508_v47 = vmul.f32 %v500_v33, %v2446_v43  ;;  %v505_v23 = vmul.f32 %v497_v35, %v2450_v44  ;;  %v465_v35 = vperm.slane %v2424_v29, 0 }
  0xd7   : > { %2988 = vst [vmem:[#allocation15_spill] sm:$0xff] %v2457_v46  ;;  %v475_v48 = vmul.f32 %v467_v34, %v2457_v46 }
  0xd8   : > { %753 = vmatpush.msra.mxu3 %v508_v47  ;;  %693 = vmatpush.msra.mxu0 %v505_v23  ;;  %v434_v23 = vperm.slane %v431_v54, 1 }
  0xd9   : > { %734 = vmatpush.msra.mxu2 %v475_v48  ;;  %v433_v48 = vperm.slane %v431_v54, 0 }
  0xda   : > { %830 = vrot.lane.b32.xlu1 %v2209_v3, %s2042_s18  ;;  %s1765_s18 = sshll.u32 %s341_s9, 3  ;;  %s1647_s9 = sshll.u32 %s339_s8, 4  ;;  %s1648_s9 = int_to_ptr.vmem [resolvable:$true] %s1647_s9 }
  0xdb   : > { %804 = vrot.lane.b32.xlu0 %v2194_v0, %s2043_s11  ;;  %s343_s13 = scalar_lea.vmem %s2968_s3, %s1765_s18  ;;  %s347_s22 = scalar_lea.vmem %s2969_s4, %s1765_s18 }
  0xdc   : > { %v2467_v49 = vpop.permute.xlu1 %1015  ;;  %v424_v51 = vpop.permute.xlu2 %423  ;;  %772 = vrot.lane.b32.xlu2 %v2194_v0, %s2044_s12  ;;  %s1649_s18 = sshll.u32 %s1645_s23, 4  ;;  %s1650_s18 = int_to_ptr.hbm [resolvable:$true] %s1649_s18 }
  0xdd   : > { %v2473_v52 = vsel %vm1017_vm6, %v2467_v49, %v2441_v42  ;;  %v2475_v53 = vpop.permute.xlu0 %1013 }
  0xe2   : > { %766 = vrot.lane.b32.xlu1 %v2209_v3, %s2044_s12  ;;  %s1967_s12 = sshra.s32 %s1650_s18, 4  ;;  %s1968_s12 = int_to_ptr.hbm [resolvable:$true] %s1967_s12 }
  0xe3   : > { %798 = vrot.lane.b32.xlu0 %v2209_v3, %s2043_s11  ;;  %s1634_s11 = scalar_lea.sflag [#allocation6], %s2177_s20  ;;  %p1974_p8 = scmp.lt.s32.totalorder %s1968_s12, %s2972_s7 }
  0xe4   : > { %v456_v59 = vpop.permute.xlu1 %455  ;;  %v2485_v62 = vpop.permute.xlu2 %951 }
  0xe5   : > { %v2489_v4 = vsel %vm457_vm5, %v454_v45, %v456_v59  ;;  %v422_v6 = vpop.permute.xlu0 %421 }
  0xe6   : > { %v2493_v8 = vsel %vm425_vm7, %v422_v6, %v424_v51  ;;  %v2498_v9 = vsel %vm425_vm7, %v2368_v57, %v422_v6  ;;  %v476_v10 = vmul.f32 %v468_v55, %v2489_v4 }
  0xe7   : > { %2989 = vst [vmem:[#allocation16_spill] sm:$0xff] %v2498_v9  ;;  %v443_v12 = vmul.f32 %v435_v56, %v2498_v9  ;;  %v444_v16 = vmul.f32 %v436_v63, %v2493_v8 }
  0xe8   : > { %754 = vmatpush.msra.mxu3 %v476_v10  ;;  %v402_v10 = vperm.slane %v2507_v22, 1 }
  0xe9   : > { %735 = vmatpush.msra.mxu2 %v443_v12 }
  0xea   : > { %755 = vmatpush.msra.mxu3 %v444_v16 }
  0xec   : > { %v2503_v19 = vpop.permute.xlu1 %983  ;;  %v355_v20 = vpop.permute.xlu2 %354 }
  0xed   : > { %v2505_v15 = vpop.permute.xlu0 %981 }
  0xf4   : > { %v390_v25 = vpop.permute.xlu1 %389  ;;  %v418_v31 = vpop.permute.xlu2 %417 }
  0xf5   : > { %v388_v32 = vpop.permute.xlu0 %387  ;;  %v2525_v55 = vsel %vm425_vm7, %v418_v31, %v2368_v57  ;;  %v2529_v56 = vsel %vm425_vm7, %v424_v51, %v418_v31  ;;  %v2554_v31 = vld [vmem:[#allocation7] ss:$8 sm:$0xf] }
  0xf6   : > { %v2513_v33 = vsel %vm393_vm8, %v388_v32, %v390_v25  ;;  %2991 = vst [vmem:[#allocation18_spill] sm:$0xff] %v2525_v55  ;;  %v441_v57 = vmul.f32 %v433_v48, %v2529_v56  ;;  %v442_v51 = vmul.f32 %v434_v23, %v2525_v55  ;;  %v2562_v48 = vld [vmem:[#allocation7 + $0x40] ss:$8 sm:$0xf] }
  0xf7   : > { %2990 = vst [vmem:[#allocation17_spill] sm:$0xff] %v2513_v33  ;;  %v411_v34 = vmul.f32 %v403_v24, %v2513_v33  ;;  %v2593_v55 = vld [vmem:[#allocation7 + $0x27] ss:$8 sm:$0xf] }
  0xf9   : > { %736 = vmatpush.msra.mxu2 %v411_v34  ;;  %v2556_v34 = vld [vmem:[#allocation7 + $0x41] ss:$8 sm:$0xf] }
  0xfc   : > { %v2518_v39 = vpop.permute.xlu1 %949  ;;  %v2520_v45 = vpop.permute.xlu2 %945 }
  0xfd   : > { %v450_v47 = vpop.permute.xlu0 %449 }
  0xfe   : > { %v2534_v29 = vsel %vm457_vm5, %v450_v47, %v2321_v36  ;;  %v2538_v63 = vsel %vm457_vm5, %v456_v59, %v450_v47  ;;  %v404_v47 = vperm.slane %v2507_v22, 3 }
  0xff   : > { %2992 = vst [vmem:[#allocation19_spill] sm:$0xff] %v2534_v29  ;;  %v473_v54 = vmul.f32 %v465_v35, %v2538_v63  ;;  %v474_v6 = vmul.f32 %v466_v38, %v2534_v29  ;;  %v370_v35 = vperm.slane %v2554_v31, 1  ;;  %v371_v38 = vperm.slane %v2554_v31, 2  ;;  %v2604_v29 = vld [vmem:[#allocation7 + $0x26] ss:$8 sm:$0xf] }
 0x101   : > { %694 = vmatpush.msra.mxu0 %v473_v54  ;;  %714 = vmatpush.msra.mxu1 %v474_v6  ;;  %v1026_v54 = vperm.slane %v2556_v34, 1  ;;  %v1027_v6 = vperm.slane %v2556_v34, 2 }
 0x103   : > { %695 = vmatpush.msra.mxu0 %v441_v57  ;;  %715 = vmatpush.msra.mxu1 %v442_v51  ;;  %v401_v57 = vperm.slane %v2507_v22, 0  ;;  %v1018_v22 = vsel %vm1017_vm6, %v2475_v53, %v2467_v49  ;;  %v986_v49 = vsel %vm985_vm10, %v2505_v15, %v2503_v19 }
 0x104   : > { %v2545_v36 = vpop.permute.xlu1 %1011  ;;  %v386_v12 = vpop.permute.xlu2 %385  ;;  %v1035_v30 = vmul.f32 %v1027_v6, %v1018_v22 }
 0x105   : > { %v2547_v16 = vpop.permute.xlu0 %977  ;;  %v2551_v59 = vsel %vm393_vm8, %v386_v12, %v388_v32  ;;  %v1019_v51 = vsel %vm1017_vm6, %v2545_v36, %v2475_v53 }
 0x106   : > { %2993 = vst [vmem:[#allocation20_spill] sm:$0xff] %v2551_v59  ;;  %v410_v24 = vmul.f32 %v402_v10, %v2551_v59  ;;  %v1034_v53 = vmul.f32 %v1026_v54, %v1019_v51  ;;  %v931_v54 = vperm.slane %v2604_v29, 2 }
 0x108   : > { %716 = vmatpush.msra.mxu1 %v410_v24 }
 0x10c   : > { %v392_v32 = vpop.permute.xlu1 %391  ;;  %v353_v23 = vpop.permute.xlu2 %352 }
 0x10d   : > { %v2574_v10 = vsel %vm393_vm8, %v390_v25, %v392_v32  ;;  %v2578_v24 = vsel %vm393_vm8, %v392_v32, %v386_v12  ;;  %v357_v33 = vpop.permute.xlu0 %356  ;;  %v2582_v59 = vsel %vm362_vm9, %v353_v23, %v355_v20  ;;  %v995_v25 = vperm.slane %v2562_v48, 2 }
 0x10e   : > { %v2590_v9 = vsel %vm362_vm9, %v355_v20, %v357_v33  ;;  %v378_v12 = vmul.f32 %v370_v35, %v2582_v59  ;;  %v412_v46 = vmul.f32 %v404_v47, %v2574_v10  ;;  %v409_v20 = vmul.f32 %v401_v57, %v2578_v24 }
 0x10f   : > { %v379_v32 = vmul.f32 %v371_v38, %v2590_v9  ;;  %v963_v35 = vperm.slane %v2593_v55, 2  ;;  %v954_v38 = vsel %vm953_vm11, %v2518_v39, %v2485_v62  ;;  %v1003_v47 = vmul.f32 %v995_v25, %v986_v49 }
 0x110   : > { %717 = vmatpush.msra.mxu1 %v378_v12  ;;  %756 = vmatpush.msra.mxu3 %v412_v46  ;;  %v899_v57 = vperm.slane %v2606_v58, 2  ;;  %v372_v25 = vperm.slane %v2554_v31, 3  ;;  %v994_v49 = vperm.slane %v2562_v48, 1 }
 0x111   : > { %737 = vmatpush.msra.mxu2 %v379_v32  ;;  %696 = vmatpush.msra.mxu0 %v409_v20  ;;  %v971_v22 = vmul.f32 %v963_v35, %v954_v38  ;;  %v1025_v20 = vperm.slane %v2556_v34, 0  ;;  %v1020_v35 = vsel %vm1017_vm6, %v2441_v42, %v2545_v36 }
 0x112   : > { %1109 = vmatpush.msrb.mxu1 %v1034_v53  ;;  %v907_v46 = vmul.f32 %v899_v57, %v2203_v2  ;;  %v993_v57 = vperm.slane %v2562_v48, 0 }
 0x113   : > { %1129 = vmatpush.msrb.mxu2 %v1035_v30  ;;  %v369_v30 = vperm.slane %v2554_v31, 0 }
 0x114   : > { %v920_v51 = vpop.permute.xlu1 %919 }
 0x115   : > { %1130 = vmatpush.msrb.mxu2 %v1003_v47  ;;  %v918_v6 = vpop.permute.xlu0 %917  ;;  %v1028_v47 = vperm.slane %v2556_v34, 3  ;;  %v989_v34 = vsel %vm985_vm10, %v2503_v19, %v2547_v16  ;;  %v962_v19 = vperm.slane %v2593_v55, 1 }
 0x116   : > { %v922_v12 = vsel %vm921_vm12, %v918_v6, %v920_v51 }
 0x117   : > { %1131 = vmatpush.msrb.mxu2 %v971_v22  ;;  %v939_v32 = vmul.f32 %v931_v54, %v922_v12  ;;  %v996_v22 = vperm.slane %v2562_v48, 3  ;;  %v916_v12 = vpop.permute.xlu2 %915  ;;  %v1036_v48 = vmul.f32 %v1028_v47, %v2473_v52  ;;  %v930_v52 = vperm.slane %v2604_v29, 1 }
 0x118   : > { %v898_v47 = vperm.slane %v2606_v58, 1 }
 0x119   : > { %1132 = vmatpush.msrb.mxu2 %v939_v32  ;;  %v964_v32 = vperm.slane %v2593_v55, 3 }
 0x11b   : > { %1133 = vmatpush.msrb.mxu2 %v907_v46  ;;  %v957_v46 = vsel %vm953_vm11, %v2485_v62, %v2520_v45 }
 0x11c   : > { %v359_v53 = vpop.permute.xlu1 %358 }
 0x11d   : > { %v2629_v38 = vsel %vm362_vm9, %v357_v33, %v359_v53  ;;  %v2633_v2 = vsel %vm362_vm9, %v359_v53, %v353_v23  ;;  %v980_v31 = vpop.permute.xlu0 %979  ;;  %v900_v53 = vperm.slane %v2606_v58, 3 }
 0x11e   : > { %v987_v54 = vsel %vm985_vm10, %v980_v31, %v2505_v15  ;;  %v988_v42 = vsel %vm985_vm10, %v2547_v16, %v980_v31  ;;  %v377_v33 = vmul.f32 %v369_v30, %v2633_v2  ;;  %v380_v36 = vmul.f32 %v372_v25, %v2629_v38 }
 0x11f   : > { %v1002_v23 = vmul.f32 %v994_v49, %v987_v54  ;;  %v1033_v15 = vmul.f32 %v1025_v20, %v1020_v35  ;;  %v1001_v30 = vmul.f32 %v993_v57, %v988_v42  ;;  %v961_v25 = vperm.slane %v2593_v55, 0 }
 0x120   : > { %697 = vmatpush.msra.mxu0 %v377_v33  ;;  %757 = vmatpush.msra.mxu3 %v380_v36  ;;  %v1004_v16 = vmul.f32 %v996_v22, %v989_v34  ;;  %v932_v49 = vperm.slane %v2604_v29, 3  ;;  %v923_v20 = vsel %vm921_vm12, %v916_v12, %v918_v6  ;;  %v929_v35 = vperm.slane %v2604_v29, 0  ;;  %v869_v34 = vpop.permute.xlu2 %868 }
 0x121   : > { %1110 = vmatpush.msrb.mxu1 %v1002_v23  ;;  %v897_v31 = vperm.slane %v2606_v58, 0  ;;  %v972_v22 = vmul.f32 %v964_v32, %v957_v46  ;;  %v938_v36 = vmul.f32 %v930_v52, %v923_v20  ;;  %v908_v23 = vmul.f32 %v900_v53, %v2194_v0 }
 0x122   : > { %1089 = vmatpush.msrb.mxu0 %v1033_v15  ;;  %1149 = vmatpush.msrb.mxu3 %v1036_v48  ;;  %v641_v48 = vld [vmem:[%s2966_s1] sm:$0xff] }
 0x123   : > { %v905_v15 = vmul.f32 %v897_v31, %v2209_v3  ;;  %1769 = vmatmul.msk.f32.vlgmr.msra.gmra.mxu2 %vm678_vm13, %v641_v48  ;;  %1770 = vmatmul.msk.f32.vlgmr.msra.gmra.mxu3 %vm678_vm13, %v641_v48 }
 0x124   : > { %1090 = vmatpush.msrb.mxu0 %v1001_v30  ;;  %v948_v62 = vpop.permute.xlu1 %947  ;;  %1150 = vmatpush.msrb.mxu3 %v1004_v16 }
 0x125   : > { %v955_v55 = vsel %vm953_vm11, %v948_v62, %v2518_v39  ;;  %v956_v54 = vsel %vm953_vm11, %v2520_v45, %v948_v62  ;;  %v914_v57 = vpop.permute.xlu0 %913  ;;  %v2677_v45 = vld [vmem:[#allocation7 + $0x24] ss:$8 sm:$0xf]  ;;  %1767 = vmatmul.msk.f32.vlgmr.msra.gmra.mxu0 %vm678_vm13, %v641_v48  ;;  %1768 = vmatmul.msk.f32.vlgmr.msra.gmra.mxu1 %vm678_vm13, %v641_v48  ;;  %v2727_v48 = vld [vmem:[#allocation7 + $0x61] ss:$8 sm:$0xf] }
 0x126   : > { %v924_v6 = vsel %vm921_vm12, %v914_v57, %v916_v12  ;;  %v925_v29 = vsel %vm921_vm12, %v920_v51, %v914_v57  ;;  %v969_v42 = vmul.f32 %v961_v25, %v956_v54  ;;  %v970_v33 = vmul.f32 %v962_v19, %v955_v55  ;;  %1151 = vmatpush.msrb.mxu3 %v972_v22  ;;  %v2695_v19 = vld [vmem:[#allocation7 + $0x23] ss:$8 sm:$0xf]  ;;  %v2707_v55 = vld [vmem:[#allocation7 + $0x22] ss:$8 sm:$0xf] }
 0x127   : > { %v940_v58 = vmul.f32 %v932_v49, %v925_v29  ;;  %v937_v39 = vmul.f32 %v929_v35, %v924_v6  ;;  %v906_v12 = vmul.f32 %v898_v47, %v2197_v1  ;;  %v881_v51 = vperm.slane %v2677_v45, 3 }
 0x128   : > { %1091 = vmatpush.msrb.mxu0 %v969_v42  ;;  %1111 = vmatpush.msrb.mxu1 %v970_v33  ;;  %v880_v0 = vperm.slane %v2677_v45, 2  ;;  %v2697_v16 = vpop.permute.xlu2 %836  ;;  %v849_v49 = vperm.slane %v2695_v19, 3  ;;  %v848_v52 = vperm.slane %v2695_v19, 2  ;;  %v816_v54 = vperm.slane %v2707_v55, 2 }
 0x129   : > { %1152 = vmatpush.msrb.mxu3 %v940_v58  ;;  %v2716_v42 = vld [vmem:[#allocation7 + $0x21] ss:$8 sm:$0xf]  ;;  %v878_v58 = vperm.slane %v2677_v45, 0  ;;  %v1310_v7 = vperm.slane %v2727_v48, 0 }
 0x12a   : > { %1092 = vmatpush.msrb.mxu0 %v937_v39  ;;  %1112 = vmatpush.msrb.mxu1 %v938_v36  ;;  %v879_v36 = vperm.slane %v2677_v45, 1  ;;  %v2722_v39 = vld [vmem:[#allocation7 + $0x62] ss:$8 sm:$0xf] }
 0x12b   : > { %1153 = vmatpush.msrb.mxu3 %v908_v23  ;;  %v784_v23 = vperm.slane %v2716_v42, 2 }
 0x12c   : > { %v867_v3 = vpop.permute.xlu1 %866  ;;  %1093 = vmatpush.msrb.mxu0 %v905_v15  ;;  %1113 = vmatpush.msrb.mxu1 %v906_v12  ;;  %v1331_v15 = vperm.slane %v2722_v39, 2 }
 0x12d   : > { %v865_v1 = vpop.permute.xlu0 %864  ;;  %v871_v32 = vsel %vm870_vm14, %v867_v3, %v869_v34 }
 0x12e   : > { %v872_v46 = vsel %vm870_vm14, %v865_v1, %v867_v3  ;;  %v889_v30 = vmul.f32 %v881_v51, %v871_v32 }
 0x12f   : > { %v888_v25 = vmul.f32 %v880_v0, %v872_v46  ;;  %v2729_v0 = vld [vmem:[#allocation7 + $0x60] ss:$8 sm:$0xf]  ;;  %v1312_v46 = vperm.slane %v2727_v48, 2 }
 0x130   : > { %1154 = vmatpush.msrb.mxu3 %v889_v30  ;;  %v771_v33 = vpop.permute.xlu2 %770 }
 0x131   : > { %1134 = vmatpush.msrb.mxu2 %v888_v25 }
 0x134   : > { %v835_v53 = vpop.permute.xlu1 %834 }
 0x135   : > { %v833_v20 = vpop.permute.xlu0 %832  ;;  %v839_v62 = vsel %vm838_vm15, %v835_v53, %v2697_v16 }
 0x136   : > { %v840_v35 = vsel %vm838_vm15, %v833_v20, %v835_v53  ;;  %v857_v31 = vmul.f32 %v849_v49, %v839_v62  ;;  %v1339_v53 = vmul.f32 %v1331_v15, %v2305_v28  ;;  %v1293_v62 = vperm.slane %v2729_v0, 2 }
 0x137   : > { %v856_v47 = vmul.f32 %v848_v52, %v840_v35  ;;  %v2739_v52 = vld [vmem:[#allocation7 + $0x47] ss:$8 sm:$0xf]  ;;  %v1332_v35 = vperm.slane %v2722_v39, 3  ;;  %v847_v28 = vperm.slane %v2695_v19, 1 }
 0x138   : > { %1155 = vmatpush.msrb.mxu3 %v857_v31  ;;  %v1320_v31 = vmul.f32 %v1312_v46, %v2325_v37 }
 0x139   : > { %1135 = vmatpush.msrb.mxu2 %v856_v47  ;;  %v846_v47 = vperm.slane %v2695_v19, 0 }
 0x13c   : > { %v803_v57 = vpop.permute.xlu1 %802 }
 0x13d   : > { %v2711_v22 = vpop.permute.xlu0 %800 }
 0x13e   : > { %v808_v6 = vsel %vm806_vm0, %v2711_v22, %v803_v57 }
 0x13f   : > { %v824_v29 = vmul.f32 %v816_v54, %v808_v6  ;;  %v817_v54 = vperm.slane %v2707_v55, 3  ;;  %v2754_v6 = vld [vmem:[#allocation7 + $0x46] ss:$8 sm:$0xf] }
 0x140   : > { %v1255_v37 = vperm.slane %v2754_v6, 2 }
 0x141   : > { %1136 = vmatpush.msrb.mxu2 %v824_v29  ;;  %v2756_v29 = vld [vmem:[#allocation7 + $0x45] ss:$8 sm:$0xf] }
 0x142   : > { %v1236_v15 = vperm.slane %v2756_v29, 2 }
 0x144   : > { %v2725_v12 = vpop.permute.xlu1 %768 }
 0x145   : > { %v863_v51 = vpop.permute.xlu0 %862  ;;  %v776_v45 = vsel %vm774_vm1, %v2725_v12, %v771_v33 }
 0x146   : > { %v873_v3 = vsel %vm870_vm14, %v863_v51, %v865_v1  ;;  %v874_v32 = vsel %vm870_vm14, %v869_v34, %v863_v51  ;;  %v792_v49 = vmul.f32 %v784_v23, %v776_v45  ;;  %v1274_v1 = vperm.slane %v2739_v52, 2  ;;  %v2747_v34 = vld [vmem:[%s2966_s1 + $0x8] sm:$0xff] }
 0x147   : > { %v886_v30 = vmul.f32 %v878_v58, %v874_v32  ;;  %v887_v25 = vmul.f32 %v879_v36, %v873_v3  ;;  %v773_v58 = vpop.permute.xlu2 %772  ;;  %v1301_v36 = vmul.f32 %v1293_v62, %v2331_v40  ;;  %v2764_v3 = vld [vmem:[#allocation7 + $0x44] ss:$8 sm:$0xf]  ;;  %v2778_v62 = vld [vmem:[#allocation7 + $0x43] ss:$8 sm:$0xf] }
 0x148   : > { %1137 = vmatpush.msrb.mxu2 %v792_v49  ;;  %v1282_v23 = vmul.f32 %v1274_v1, %v2408_v18  ;;  %v785_v18 = vperm.slane %v2716_v42, 3  ;;  %v775_v46 = vsel %vm774_vm1, %v771_v33, %v773_v58  ;;  %v1217_v1 = vperm.slane %v2764_v3, 2  ;;  %v1482_v33 = vld [vmem:[%s2967_s2] sm:$0xff] }
 0x149   : > { %1094 = vmatpush.msrb.mxu0 %v886_v30  ;;  %1114 = vmatpush.msrb.mxu1 %v887_v25 }
 0x14a   : > { %1433 = vmatpush.msra.mxu2 %v1339_v53  ;;  %v1313_v53 = vperm.slane %v2727_v48, 3 }
 0x14b   : > { %1774 = vmatmul.msk.f32.vlgmr.msrb.gmra.mxu2 %vm678_vm13, %v2747_v34 }
 0x14c   : > { %1434 = vmatpush.msra.mxu2 %v1320_v31  ;;  %v831_v19 = vpop.permute.xlu1 %830  ;;  %v793_v31 = vmul.f32 %v785_v18, %v775_v46 }
 0x14d   : > { %v805_v51 = vpop.permute.xlu0 %804  ;;  %v841_v32 = vsel %vm838_vm15, %v831_v19, %v833_v20  ;;  %v842_v45 = vsel %vm838_vm15, %v2697_v16, %v831_v19  ;;  %v1294_v20 = vperm.slane %v2729_v0, 3  ;;  %v1263_v16 = vmul.f32 %v1255_v37, %v2446_v43 }
 0x14e   : > { %v807_v40 = vsel %vm806_vm0, %v803_v57, %v805_v51  ;;  %1435 = vmatpush.msra.mxu2 %v1301_v36  ;;  %v854_v30 = vmul.f32 %v846_v47, %v842_v45  ;;  %v855_v25 = vmul.f32 %v847_v28, %v841_v32  ;;  %v1198_v57 = vperm.slane %v2778_v62, 2  ;;  %v2793_v32 = vld [vmem:[#allocation7 + $0x42] ss:$8 sm:$0xf] }
 0x14f   : > { %v825_v49 = vmul.f32 %v817_v54, %v807_v40  ;;  %v1340_v47 = vmul.f32 %v1332_v35, %v2264_v11  ;;  %v1244_v28 = vmul.f32 %v1236_v15, %v2489_v4  ;;  %v814_v43 = vperm.slane %v2707_v55, 0 }
 0x150   : > { %1436 = vmatpush.msra.mxu2 %v1282_v23  ;;  %1095 = vmatpush.msrb.mxu0 %v854_v30  ;;  %v815_v54 = vperm.slane %v2707_v55, 1  ;;  %v2045_v36 = vmov 0   ;;  %v1321_v23 = vmul.f32 %v1313_v53, %v2382_v61  ;;  %v1302_v37 = vmul.f32 %v1294_v20, %v2404_v14 }
 0x151   : > { %1115 = vmatpush.msrb.mxu1 %v855_v25  ;;  %1156 = vmatpush.msrb.mxu3 %v825_v49  ;;  %v1275_v19 = vperm.slane %v2739_v52, 3  ;;  %v1225_v11 = vmul.f32 %v1217_v1, %v2493_v8  ;;  %v1206_v4 = vmul.f32 %v1198_v57, %v2574_v10  ;;  %v1179_v35 = vperm.slane %v2793_v32, 2  ;;  %v2821_v49 = vld [vmem:[%s2966_s1 + $0x10] sm:$0xff] }
 0x152   : > { %1437 = vmatpush.msra.mxu2 %v1263_v16  ;;  %1869 = vset.pattern.permute.xlu2 %v2045_v36  ;;  %v782_v61 = vperm.slane %v2716_v42, 0  ;;  %v783_v10 = vperm.slane %v2716_v42, 1  ;;  %v1291_v53 = vperm.slane %v2729_v0, 0  ;;  %v1292_v16 = vperm.slane %v2729_v0, 1 }
 0x153   : > { %1157 = vmatpush.msrb.mxu3 %v793_v31  ;;  %1485 = vperm.xlu2 %1869, %v1482_v33   ;;  %v1283_v30 = vmul.f32 %v1275_v19, %v2418_v5  ;;  %v1187_v25 = vmul.f32 %v1179_v35, %v2629_v38  ;;  %v1237_v5 = vperm.slane %v2756_v29, 3  ;;  %v1218_v57 = vperm.slane %v2764_v3, 3  ;;  %v2998_v35 = vld [vmem:[#allocation18_spill] sm:$0xff] }
 0x154   : > { %1438 = vmatpush.msra.mxu2 %v1244_v28  ;;  %v767_v55 = vpop.permute.xlu1 %766  ;;  %1775 = vmatmul.msk.f32.vlgmr.msrb.gmra.mxu3 %vm678_vm13, %v2747_v34  ;;  %v1199_v33 = vperm.slane %v2778_v62, 3  ;;  %v1299_v31 = vmul.f32 %v1291_v53, %v2399_v13 }
 0x155   : > { %1453 = vmatpush.msra.mxu3 %v1340_v47  ;;  %v799_v15 = vpop.permute.xlu0 %798  ;;  %v777_v14 = vsel %vm774_vm1, %v767_v55, %v2725_v12  ;;  %v778_v40 = vsel %vm774_vm1, %v773_v58, %v767_v55  ;;  %v1329_v12 = vperm.slane %v2722_v39, 0  ;;  %1870 = vset.pattern.permute.xlu0 %v2045_v36  ;;  %v1245_v0 = vmul.f32 %v1237_v5, %v2538_v63  ;;  %v2995_v36 = vld [vmem:[#allocation13_spill] sm:$0xff] }
 0x156   : > { %v809_v45 = vsel %vm806_vm0, %v799_v15, %v2711_v22  ;;  %v810_v8 = vsel %vm806_vm0, %v805_v51, %v799_v15  ;;  %1439 = vmatpush.msra.mxu2 %v1225_v11  ;;  %v1330_v22 = vperm.slane %v2722_v39, 1  ;;  %v1256_v51 = vperm.slane %v2754_v6, 3 }
 0x157   : > { %1454 = vmatpush.msra.mxu3 %v1321_v23  ;;  %v822_v18 = vmul.f32 %v814_v43, %v810_v8  ;;  %v823_v46 = vmul.f32 %v815_v54, %v809_v45  ;;  %v790_v42 = vmul.f32 %v782_v61, %v778_v40  ;;  %v791_v58 = vmul.f32 %v783_v10, %v777_v14  ;;  %v3000_v14 = vld [vmem:[#allocation20_spill] sm:$0xff]  ;;  %v3001_v8 = vld [vmem:[#allocation17_spill] sm:$0xff] }
 0x158   : > { %1440 = vmatpush.msra.mxu2 %v1206_v4  ;;  %v1311_v39 = vperm.slane %v2727_v48, 1  ;;  %v1337_v38 = vmul.f32 %v1329_v12, %v2279_v17  ;;  %v1338_v20 = vmul.f32 %v1330_v22, %v2301_v27  ;;  %v1264_v1 = vmul.f32 %v1256_v51, %v2450_v44 }
 0x159   : > { %1455 = vmatpush.msra.mxu3 %v1302_v37  ;;  %1096 = vmatpush.msrb.mxu0 %v822_v18  ;;  %v1272_v17 = vperm.slane %v2739_v52, 0  ;;  %v1318_v48 = vmul.f32 %v1310_v7, %v2378_v60  ;;  %v1273_v44 = vperm.slane %v2739_v52, 1  ;;  %v1253_v47 = vperm.slane %v2754_v6, 0 }
 0x15a   : > { %1116 = vmatpush.msrb.mxu1 %v823_v46  ;;  %1441 = vmatpush.msra.mxu2 %v1187_v25  ;;  %v1319_v27 = vmul.f32 %v1311_v39, %v2297_v26  ;;  %v1300_v60 = vmul.f32 %v1292_v16, %v2336_v41  ;;  %v1226_v28 = vmul.f32 %v1218_v57, %v2529_v56  ;;  %v1180_v26 = vperm.slane %v2793_v32, 3  ;;  %v2994_v41 = vld [vmem:[#allocation14_spill] sm:$0xff] }
 0x15b   : > { %1456 = vmatpush.msra.mxu3 %v1283_v30  ;;  %1097 = vmatpush.msrb.mxu0 %v790_v42  ;;  %v1280_v63 = vmul.f32 %v1272_v17, %v2414_v21  ;;  %v1234_v52 = vperm.slane %v2756_v29, 0  ;;  %v1281_v13 = vmul.f32 %v1273_v44, %v2353_v50  ;;  %v1235_v43 = vperm.slane %v2756_v29, 1  ;;  %v2996_v50 = vld [vmem:[#allocation19_spill] sm:$0xff] }
 0x15c   : > { %1117 = vmatpush.msrb.mxu1 %v791_v58  ;;  %1779 = vmatmul.msk.f32.vlgmr.msra.gmra.mxu2 %vm678_vm13, %v2821_v49  ;;  %v1207_v54 = vmul.f32 %v1199_v33, %v2578_v24  ;;  %v1215_v56 = vperm.slane %v2764_v3, 0  ;;  %v1216_v21 = vperm.slane %v2764_v3, 1  ;;  %v1188_v37 = vmul.f32 %v1180_v26, %v2633_v2  ;;  %v2997_v24 = vld [vmem:[#allocation15_spill] sm:$0xff]  ;;  %v2999_v2 = vld [vmem:[#allocation16_spill] sm:$0xff] }
 0x15d   : > { %1772 = vmatmul.msk.f32.vlgmr.msrb.gmra.mxu0 %vm678_vm13, %v2747_v34  ;;  %1773 = vmatmul.msk.f32.vlgmr.msrb.gmra.mxu1 %vm678_vm13, %v2747_v34  ;;  %v1254_v34 = vperm.slane %v2754_v6, 1  ;;  %v1261_v6 = vmul.f32 %v1253_v47, %v2994_v41  ;;  %v1242_v19 = vmul.f32 %v1234_v52, %v2996_v50  ;;  %v1196_v29 = vperm.slane %v2778_v62, 0 }
 0x15e   : > { %1393 = vmatpush.msra.mxu0 %v1337_v38  ;;  %1413 = vmatpush.msra.mxu1 %v1338_v20  ;;  %v1243_v11 = vmul.f32 %v1235_v43, %v2997_v24  ;;  %v1197_v4 = vperm.slane %v2778_v62, 1  ;;  %v1223_v55 = vmul.f32 %v1215_v56, %v2998_v35  ;;  %v1177_v15 = vperm.slane %v2793_v32, 0  ;;  %v1522_v24 = vld [vmem:[%s343_s13] sm:$0xff]  ;;  %s1969_s13 = scalar_lea.hbm %s1968_s12, 32 }
 0x15f   : > { %1457 = vmatpush.msra.mxu3 %v1264_v1  ;;  %v1262_v23 = vmul.f32 %v1254_v34, %v2995_v36  ;;  %v1224_v3 = vmul.f32 %v1216_v21, %v2999_v2  ;;  %v1178_v61 = vperm.slane %v2793_v32, 1  ;;  %v1204_v45 = vmul.f32 %v1196_v29, %v3000_v14  ;;  %p1970_p3 = scmp.ne.s32.totalorder %s1968_s12, %s1969_s13  ;;  %p1975_p7 = scmp.lt.s32.totalorder %s1973_s6, %s1969_s13 }
 0x160   : > { %1394 = vmatpush.msra.mxu0 %v1318_v48  ;;  %1414 = vmatpush.msra.mxu1 %v1319_v27  ;;  %v1205_v62 = vmul.f32 %v1197_v4, %v3001_v8  ;;  %v1185_v10 = vmul.f32 %v1177_v15, %v2582_v59 }
 0x161   : > { %1458 = vmatpush.msra.mxu3 %v1245_v0  ;;  %v1186_v40 = vmul.f32 %v1178_v61, %v2590_v9  ;;  %p1971_p5 = pnand %p1970_p3, %p2146_p13  ;;  %p1976_p9 = por %p1975_p7, %p1974_p8 }
 0x162   : > { %1395 = vmatpush.msra.mxu0 %v1299_v31  ;;  %1415 = vmatpush.msra.mxu1 %v1300_v60 }
 0x163   : > { %1459 = vmatpush.msra.mxu3 %v1226_v28  ;;  %p1972_p12 = pneg %p1971_p5 }
 0x164   : > { %1396 = vmatpush.msra.mxu0 %v1280_v63  ;;  %1416 = vmatpush.msra.mxu1 %v1281_v13 }
 0x165   : > { %1460 = vmatpush.msra.mxu3 %v1207_v54  ;;  %p1977_p10 = pnand %p1976_p9, %p1972_p12 }
 0x166   : > { %1397 = vmatpush.msra.mxu0 %v1261_v6  ;;  %1417 = vmatpush.msra.mxu1 %v1262_v23 }
 0x167   : > { %1461 = vmatpush.msra.mxu3 %v1188_v37 }
 0x168   : > { %1780 = vmatmul.msk.f32.vlgmr.msra.gmra.mxu3 %vm678_vm13, %v2821_v49  ;;  %1398 = vmatpush.msra.mxu0 %v1242_v19 }
 0x169   : > { %1418 = vmatpush.msra.mxu1 %v1243_v11 }
 0x16a   : > { %1399 = vmatpush.msra.mxu0 %v1223_v55  ;;  %v1524_v55 = vld [vmem:[%s347_s22] sm:$0xff] }
 0x16b   : > { %1419 = vmatpush.msra.mxu1 %v1224_v3 }
 0x16c   : > { %1400 = vmatpush.msra.mxu0 %v1204_v45 }
 0x16d   : > { %1420 = vmatpush.msra.mxu1 %v1205_v62 }
 0x16e   : > { %1401 = vmatpush.msra.mxu0 %v1185_v10 }
 0x16f   : > { %1421 = vmatpush.msra.mxu1 %v1186_v40  ;;  %1777 = vmatmul.msk.f32.vlgmr.msra.gmra.mxu0 %vm678_vm13, %v2821_v49 }
 0x170   : > { %1778 = vmatmul.msk.f32.vlgmr.msra.gmra.mxu1 %vm678_vm13, %v2821_v49 }
 0x1a2   : > { %v699_v46 = vpop.f32.mrf.mxu0  ;;  %v719_v12 = vpop.f32.mrf.mxu1 }
 0x1a6   : > { %v739_v32 = vpop.f32.mrf.mxu2  ;;  %v759_v18 = vpop.f32.mrf.mxu3 }
 0x1ad   : > { %v1486_v53 = vpop.permute.xlu2 %1485 }
 0x1ce   : > { %v1139_v22 = vpop.f32.mrf.mxu2 }
 0x1cf   : > { %v1168_v25 = vadd.f32 %v1139_v22, %v739_v32 }
 0x1d7   : > { %v1159_v30 = vpop.f32.mrf.mxu3 }
 0x1d8   : > { %v1169_v39 = vadd.f32 %v1159_v30, %v759_v18 }
 0x1da   : > { %v1099_v51 = vpop.f32.mrf.mxu0  ;;  %v1119_v59 = vpop.f32.mrf.mxu1 }
 0x1db   : > { %v1166_v9 = vadd.f32 %v1099_v51, %v699_v46  ;;  %v1167_v58 = vadd.f32 %v1119_v59, %v719_v12 }
 0x1df   : > { %v1443_v7 = vpop.f32.mrf.mxu2 }
 0x1e0   : > { %v1472_v5 = vadd.f32 %v1443_v7, %v1168_v25 }
 0x1e2   : > { %v1490_v17 = vadd.f32 %v1486_v53, %v1472_v5 }
 0x1e4   : > { %v1499_v47 = vmul.f32 %v1490_v17, %v1490_v17 }
 0x1eb   : > { %v1463_v42 = vpop.f32.mrf.mxu3 }
 0x1ec   : > { %v1403_v38 = vpop.f32.mrf.mxu0  ;;  %v1473_v49 = vadd.f32 %v1463_v42, %v1169_v39 }
 0x1ed   : > { %v1470_v20 = vadd.f32 %v1403_v38, %v1166_v9  ;;  %v1423_v16 = vpop.f32.mrf.mxu1 }
 0x1ee   : > { %v1471_v1 = vadd.f32 %v1423_v16, %v1167_v58  ;;  %v1491_v44 = vadd.f32 %v1486_v53, %v1473_v49 }
 0x1ef   : > { %v1488_v57 = vadd.f32 %v1486_v53, %v1470_v20 }
 0x1f0   : > { %v1489_v48 = vadd.f32 %v1486_v53, %v1471_v1  ;;  %v1500_v28 = vmul.f32 %v1491_v44, %v1491_v44 }
 0x1f1   : > { %v1497_v27 = vmul.f32 %v1488_v57, %v1488_v57 }
 0x1f2   : > { %v1498_v0 = vmul.f32 %v1489_v48, %v1489_v48  ;;  %v1492_v33 = vadd.f32 %v1489_v48, %v1488_v57 }
 0x1f4   : > { %v1493_v31 = vadd.f32 %v1492_v33, %v1490_v17  ;;  %v1501_v60 = vadd.f32 %v1498_v0, %v1497_v27 }
 0x1f6   : > { %v1494_v34 = vadd.f32 %v1493_v31, %v1491_v44  ;;  %v1502_v26 = vadd.f32 %v1501_v60, %v1499_v47 }
 0x1f8   : > { %1495 = vadd.xlane.f32.xlu0 %v1494_v34  ;;  %v1503_v63 = vadd.f32 %v1502_v26, %v1500_v28 }
 0x1fa   : > { %1504 = vadd.xlane.f32.xlu1 %v1503_v63 }
 0x26b   : > { %v1496_v52 = vpop.xlane.xlu0 %1495 }
 0x26c   : > { %v1506_v13 = vmul.f32 0.001953125, %v1496_v52 }
 0x26d   : > { %v1505_v43 = vpop.xlane.xlu1 %1504 }
 0x26e   : > { %v1508_v54 = vmul.f32 %v1506_v13, %v1506_v13  ;;  %v1507_v41 = vmul.f32 0.001953125, %v1505_v43 }
 0x270   : > { %v1509_v6 = vsub.f32 %v1507_v41, %v1508_v54 }
 0x272   : > { %v1510_v56 = vmax.f32 %v1509_v6, 0.0 }
 0x274   : > { %v1511_v36 = vadd.f32 1e-05, %v1510_v56 }
 0x276   : > { %1871 = vrsqrt.f32 %v1511_v36  ;;  %vm1518_vm3 = vweird.f32 %v1511_v36 }
 0x27c   : > { %v1872_v23 = vpop.eup %1871 }
 0x27d   : > { %v1513_v21 = vmul.f32 %v1872_v23, %v1511_v36  ;;  %vm1519_vm2 = vweird.f32 %v1872_v23 }
 0x27e   : > { %vm1520_vm4 = vmor %vm1518_vm3, %vm1519_vm2 }
 0x27f   : > { %v1514_v37 = vmul.f32 %v1872_v23, %v1513_v21 }
 0x281   : > { %v1515_v50 = vmul.f32 0.5, %v1514_v37 }
 0x283   : > { %v1516_v19 = vsub.f32 1.5, %v1515_v50 }
 0x285   : > { %v1517_v29 = vmul.f32 %v1872_v23, %v1516_v19 }
 0x287   : > { %v1521_v11 = vsel %vm1520_vm4, %v1872_v23, %v1517_v29 }
 0x288   : > { %v1523_v4 = vmul.f32 %v1522_v24, %v1521_v11 }
 0x28a   : > { %1529 = vperm.xlu2 %1869, %v1523_v4   ;;  %v1525_v35 = vmul.f32 %v1523_v4, %v1506_v13 }
 0x28c   : > { %v1526_v15 = vsub.f32 %v1524_v55, %v1525_v35 }
 0x292   : > { %1538 = vperm.xlu2 %1869, %v1526_v15  }
 0x2e4   : > { %v1530_v2 = vpop.permute.xlu2 %1529 }
 0x2e5   : > { %v1532_v3 = vmul.f32 %v1530_v2, %v1488_v57  ;;  %v1533_v61 = vmul.f32 %v1530_v2, %v1489_v48  ;;  %v1534_v14 = vmul.f32 %v1530_v2, %v1490_v17  ;;  %v1535_v45 = vmul.f32 %v1530_v2, %v1491_v44 }
 0x2ec   : > { %v1539_v8 = vpop.permute.xlu2 %1538 }
 0x2ed   : > { %v2885_v62 = vadd.f32 %v1539_v8, %v1532_v3  ;;  %v2887_v10 = vadd.f32 %v1539_v8, %v1533_v61  ;;  %v2889_v40 = vadd.f32 %v1539_v8, %v1534_v14  ;;  %v2891_v32 = vadd.f32 %v1539_v8, %v1535_v45  ;;  %v1889_v61 = vld [vmem:[%s2183_s15] sm:$0xff]  ;;  %v1890_v8 = vld [vmem:[%s2183_s15 + $0x8] sm:$0xff] }
 0x2ef   : > { %v1781_v18 = vmul.f32 -1.442695, %v2885_v62  ;;  %v1782_v46 = vmul.f32 -1.442695, %v2887_v10  ;;  %v1783_v12 = vmul.f32 -1.442695, %v2889_v40 }
 0x2f0   : > { %v1784_v22 = vmul.f32 -1.442695, %v2891_v32 }
 0x2f1   : > { %1873 = vpow2.f32 %v1781_v18 }
 0x2f2   : > { %1875 = vpow2.f32 %v1782_v46  ;;  %v1891_v46 = vld [vmem:[%s2183_s15 + $0x10] sm:$0xff] }
 0x2f3   : > { %1877 = vpow2.f32 %v1783_v12  ;;  %v1892_v12 = vld [vmem:[%s2183_s15 + $0x18] sm:$0xff] }
 0x2f4   : > { %1879 = vpow2.f32 %v1784_v22 }
 0x2f7   : > { %v1874_v30 = vpop.eup %1873 }
 0x2f8   : > { %v1876_v51 = vpop.eup %1875  ;;  %v1557_v59 = vadd.f32 1.0, %v1874_v30 }
 0x2f9   : > { %v1878_v25 = vpop.eup %1877  ;;  %v1558_v7 = vadd.f32 1.0, %v1876_v51 }
 0x2fa   : > { %v1880_v9 = vpop.eup %1879  ;;  %v1559_v42 = vadd.f32 1.0, %v1878_v25  ;;  %1881 = vrcp.f32 %v1557_v59  ;;  %v1570_v39 = vand.u32 2147483647, %v1557_v59  ;;  %v1572_v5 = vand.u32 2147483648, %v1557_v59 }
 0x2fb   : > { %v2897_v58 = vadd.f32 1.0, %v1880_v9  ;;  %1883 = vrcp.f32 %v1558_v7  ;;  %vm1566_vm5 = vweird.f32 %v1557_v59  ;;  %vm1581_vm6 = vweird.f32 %v1558_v7 }
 0x2fc   : > { %1885 = vrcp.f32 %v1559_v42  ;;  %v1585_v1 = vand.u32 2147483647, %v1558_v7  ;;  %v1587_v57 = vand.u32 2147483648, %v1558_v7  ;;  %vm2900_vm7 = vcmp.eq.f32.partialorder %v1570_v39, 8.507059e+37 }
 0x2fd   : > { %1887 = vrcp.f32 %v2897_v58  ;;  %v1573_v27 = vor.u32 1.1754944e-38, %v1572_v5  ;;  %vm1596_vm8 = vweird.f32 %v1559_v42  ;;  %v1600_v31 = vand.u32 2147483647, %v1559_v42 }
 0x2fe   : > { %v1602_v47 = vand.u32 2147483648, %v1559_v42  ;;  %vm2905_vm11 = vcmp.eq.f32.partialorder %v1585_v1, 8.507059e+37  ;;  %v1588_v52 = vor.u32 1.1754944e-38, %v1587_v57  ;;  %vm1611_vm14 = vweird.f32 %v2897_v58 }
 0x2ff   : > { %v1615_v6 = vand.u32 2147483647, %v2897_v58  ;;  %v1617_v56 = vand.u32 2147483648, %v2897_v58  ;;  %vm1601_vm2 = vcmp.eq.f32.partialorder %v1600_v31, 8.507059e+37 }
 0x300   : > { %v1882_v38 = vpop.eup %1881  ;;  %v1603_v19 = vor.u32 1.1754944e-38, %v1602_v47 }
 0x301   : > { %v1884_v53 = vpop.eup %1883  ;;  %v1562_v20 = vmul.f32 %v1882_v38, %v1557_v59  ;;  %vm1567_vm9 = vweird.f32 %v1882_v38  ;;  %v1618_v55 = vor.u32 1.1754944e-38, %v1617_v56  ;;  %vm1616_vm4 = vcmp.eq.f32.partialorder %v1615_v6, 8.507059e+37 }
 0x302   : > { %v1886_v16 = vpop.eup %1885  ;;  %v1577_v49 = vmul.f32 %v1884_v53, %v1558_v7  ;;  %vm1582_vm10 = vweird.f32 %v1884_v53  ;;  %vm1568_vm13 = vmor %vm1566_vm5, %vm1567_vm9 }
 0x303   : > { %v1563_v17 = vsub.f32 1.0, %v1562_v20  ;;  %v1592_v44 = vmul.f32 %v1886_v16, %v1559_v42  ;;  %v1888_v0 = vpop.eup %1887  ;;  %vm1597_vm12 = vweird.f32 %v1886_v16  ;;  %vm1583_vm15 = vmor %vm1581_vm6, %vm1582_vm10 }
 0x304   : > { %v1578_v33 = vsub.f32 1.0, %v1577_v49  ;;  %v1607_v28 = vmul.f32 %v1888_v0, %v2897_v58  ;;  %vm1612_vm0 = vweird.f32 %v1888_v0  ;;  %vm1598_vm1 = vmor %vm1596_vm8, %vm1597_vm12 }
 0x305   : > { %v1564_v60 = vmul.f32 %v1882_v38, %v1563_v17  ;;  %v1593_v34 = vsub.f32 1.0, %v1592_v44  ;;  %vm1613_vm3 = vmor %vm1611_vm14, %vm1612_vm0 }
 0x306   : > { %v1579_v26 = vmul.f32 %v1884_v53, %v1578_v33  ;;  %v1608_v54 = vsub.f32 1.0, %v1607_v28 }
 0x307   : > { %v1565_v13 = vadd.f32 %v1882_v38, %v1564_v60  ;;  %v1594_v43 = vmul.f32 %v1886_v16, %v1593_v34 }
 0x308   : > { %v1580_v41 = vadd.f32 %v1884_v53, %v1579_v26  ;;  %v1609_v21 = vmul.f32 %v1888_v0, %v1608_v54 }
 0x309   : > { %v1569_v36 = vsel %vm1568_vm13, %v1882_v38, %v1565_v13  ;;  %v1595_v23 = vadd.f32 %v1886_v16, %v1594_v43 }
 0x30a   : > { %v1574_v37 = vsel %vm2900_vm7, %v1573_v27, %v1569_v36  ;;  %v1584_v50 = vsel %vm1583_vm15, %v1884_v53, %v1580_v41  ;;  %v1610_v11 = vadd.f32 %v1888_v0, %v1609_v21 }
 0x30b   : > { %v1589_v29 = vsel %vm2905_vm11, %v1588_v52, %v1584_v50  ;;  %v1599_v24 = vsel %vm1598_vm1, %v1886_v16, %v1595_v23  ;;  %v1621_v4 = vmul.f32 %v1574_v37, %v2885_v62 }
 0x30c   : > { %v1604_v35 = vsel %vm1601_vm2, %v1603_v19, %v1599_v24  ;;  %v1622_v15 = vmul.f32 %v1589_v29, %v2887_v10  ;;  %v1614_v2 = vsel %vm1613_vm3, %v1888_v0, %v1610_v11 }
 0x30d   : > { %v1623_v3 = vmul.f32 %v1604_v35, %v2889_v40  ;;  %v1625_v14 = vadd.f32 %v1889_v61, %v1621_v4  ;;  %v1619_v45 = vsel %vm1616_vm4, %v1618_v55, %v1614_v2 }
 0x30e   : > { %v1626_v62 = vadd.f32 %v1890_v8, %v1622_v15  ;;  %v1624_v18 = vmul.f32 %v1619_v45, %v2891_v32 }
 0x30f   : > { %v1627_v10 = vadd.f32 %v1891_v46, %v1623_v3  ;;  %1629 = vst [vmem:[%s339_s8] sm:$0xff] %v1625_v14 }
 0x310   : > { %1630 = vst [vmem:[%s339_s8 + $0x8] sm:$0xff] %v1626_v62  ;;  %v1628_v22 = vadd.f32 %v1892_v12, %v1624_v18 }
 0x311   : > { %1631 = vst [vmem:[%s339_s8 + $0x10] sm:$0xff] %v1627_v10 }
 0x312   : > { %1632 = vst [vmem:[%s339_s8 + $0x18] sm:$0xff] %v1628_v22 }
 0x313   : > { %1980 = shalt.err (!%p1977_p10)
}
 0x314   : > { %1798 = dma.vmem_to_hbm [thread:$0]  (%p2146_p13), %s1648_s9, 512, %s1650_s18, %s1634_s11  }
 0x315 PF: > { %s1661_s20 = sand.u32 1, %s2011_s24   ;;  %p3006_p11 = scmp.ge.s32.totalorder %s2023_s27, 2 }
 0x316   : > { %s1662_s15 = scalar_lea.sflag [#allocation6], %s1661_s20 }
 0x317   : > { %p1809_p0 = pnand %p3006_p11, %p2151_p4 }
 0x319   : > { %p1810_p2 = pneg %p1809_p0 }
 0x31b   : > { %2006 = dma.done.wait (%p1810_p2), %s1662_s15, 512  }
 0x31c   : > { %2008 = vsyncadd (%p1810_p2), %s1662_s15, 4294966784  ;;  %p21_p6 = scmp.ge.s32.totalorder %s2126_s14, 4   ;;  %s3007_s24 = smov %s2015_s25 }
 0x31d   : > { %s3008_s25 = smov %s2019_s26  ;;  %s3009_s26 = smov %s2138_s17 }
 0x31e   : > { %s3010_s27 = smov %s2126_s14  ;;  %23 = sbr.rel (!%p21_p6) target bundleno = 6 (0x6), region = 131 }
 0x323   :  { %1668 = vsyncpa [#allocation5], 1 }
 0x324   :  { %1670 = vsyncpa [#allocation5 + $0x1], 1 }
 0x325   :  { %1671 = vsyncpa [#allocation8], 1 }
 0x326   :  { %1672 = vsyncpa [#allocation6], 1 }
 0x327   :  { %1674 = vsyncpa [#allocation6 + $0x1], 1 }

// kernel: tpu_custom_call.1
= control target key start
LH: loop header
LB: loop body
LE: loop exit
PB: predicated region body
PF: predicated region fallthrough
CT: control target
= control target key end

     0   :  { %12 = vsyncpa [#allocation5], 0  ;;  %s2965_s0 = inlined_call_operand.hbm [shape: f32[2,8,512], index: 0, kind: input, shape index: {}]   ;;  %s2966_s1 = inlined_call_operand.vmem [shape: f32[3,8,72], index: 1, kind: input, shape index: {}]   ;;  %s2967_s2 = inlined_call_operand.vmem [shape: f32[8,1], index: 2, kind: input, shape index: {}]   ;;  %s2968_s3 = inlined_call_operand.vmem [shape: f32[2,8,1], index: 3, kind: input, shape index: {}]   ;;  %s2969_s4 = inlined_call_operand.vmem [shape: f32[2,8,1], index: 4, kind: input, shape index: {}]   ;;  %s2970_s5 = inlined_call_operand.hbm [shape: f32[27,512], index: 5, kind: input, shape index: {}]   ;;  %s2971_s6 = inlined_call_operand.vmem [shape: f32[8,8], index: 6, kind: input, shape index: {}]   ;;  %s2972_s7 = inlined_call_operand.hbm [shape: f32[2,8,512], index: 7, kind: output, shape index: {}]  }
   0x1   :  { %14 = vsyncpa [#allocation5 + $0x1], 0 }
   0x2   :  { %15 = vsyncpa [#allocation8], 0 }
   0x3   :  { %16 = vsyncpa [#allocation6], 0 }
   0x4   :  { %18 = vsyncpa [#allocation6 + $0x1], 0  ;;  %s2086_s24 = smov 0   ;;  %s2088_s25 = smov 0  }
   0x5   :  { %s2090_s26 = smov 0   ;;  %s2092_s27 = smov 0  }
   0x6 LB: > { %s234_s29 = sshll.u32 %s2970_s5, 4  ;;  %s2110_s30 = sadd.s32 4294967295, %s2023_s27   ;;  %s2023_s27 = sphi %s2092_s27, %s3010_s27   ;;  %s2019_s26 = sphi %s2090_s26, %s3009_s26   ;;  %s2015_s25 = sphi %s2088_s25, %s3008_s25   ;;  %s2011_s24 = sphi %s2086_s24, %s3007_s24   ;;  %s235_s29 = int_to_ptr.hbm [resolvable:$true] %s234_s29 }
   0x7   : > { %p1755_p0 = scmp.ge.s32.totalorder %s2023_s27, 1  ;;  %p45_p1 = scmp.eq.s32.totalorder %s2110_s30, 0 }
   0x8   : > { %p217_p2 = scmp.lt.s32.totalorder %s2023_s27, 3  ;;  %s2025_s9 = smov [#allocation7]  }
   0x9   : > { %s236_s10 = sshll.u32 %s2025_s9, 4  ;;  %s2026_s11 = smov 512   ;;  %s237_s10 = int_to_ptr.vmem [resolvable:$true] %s236_s10 }
   0xa   : > { %p2115_p3 = pnand %p1755_p0, %p217_p2  ;;  %s2027_s12 = smov 32  }
   0xb   : > { %s1754_s13 = sadd.s32 4294967294, %s2023_s27   ;;  %s2126_s14 = sadd.s32 1, %s2023_s27  }
   0xc   : > { %p1800_p4 = pneg %p2115_p3  ;;  %s31_s15 = sadd.s32 1, %s2019_s26 }
   0xd   : > { %s28_s16 = ssub.s32 %s2023_s27, %s2126_s14  ;;  %p38_p7 = scmp.ne.s32.totalorder %s2019_s26, %s2015_s25 }
   0xe   : > { %p1801_p6 = pnand %p1800_p4, %p45_p1  ;;  %p29_p8 = scmp.eq.s32.totalorder %s28_s16, 0 }
   0xf   : > { %p39_p9 = scmp.eq.s32.totalorder %s2023_s27, 0  ;;  %p44_p10 = scmp.ne.s32.totalorder %s2015_s25, %s2011_s24 }
  0x10   : > { %1803 = dma.hbm_to_vmem [thread:$0]  (!%p1801_p6), %s235_s29, 2048, %s237_s10, [#allocation8], %s2026_s11, %s2026_s11, %s2027_s12  }
  0x11   : > { %p204_p11 = scmp.eq.s32.totalorder %s2110_s30, 1  ;;  %p2142_p12 = por %p45_p1, %p44_p10 }
  0x12   : > { %s2138_s17 = scalar_select %p29_p8, %s2019_s26, %s31_s15  }
  0x13   : > { %p2146_p13 = por %p204_p11, %p38_p7  ;;  %p210_p0 = scmp.eq.s32.totalorder %s1754_s13, 1 }
  0x14   : > { %p40_p2 = por %p39_p9, %p38_p7  ;;  %s253_s20 = sand.u32 1, %s2019_s26  }
  0x15   : > { %p2151_p4 = por %p210_p0, %p44_p10  ;;  %p1813_p6 = scmp.lt.s32.totalorder %s2023_s27, 2 }
  0x16   : > { %s1758_s22 = sshll.u32 %s253_s20, 5  ;;  %s1790_s23 = sshll.u32 %s2023_s27, 5 }
  0x17   : > { %s262_s29 = scalar_lea.hbm %s2965_s0, %s1790_s23  ;;  %s257_s10 = scalar_lea.vmem [#allocation4], %s1758_s22 }
  0x18   : > { %s264_s9 = sshll.u32 %s262_s29, 4  ;;  %s266_s11 = sshll.u32 %s257_s10, 4  ;;  %s265_s9 = int_to_ptr.hbm [resolvable:$true] %s264_s9  ;;  %s267_s11 = int_to_ptr.vmem [resolvable:$true] %s266_s11 }
  0x19   : > { %p2160_p8 = pnand %p1813_p6, %p40_p2  ;;  %s254_s13 = scalar_lea.sflag [#allocation5], %s253_s20 }
  0x1a   : > { %s1923_s15 = sshra.s32 %s265_s9, 4  ;;  %s1930_s22 = scalar_lea.hbm %s2965_s0, 64  ;;  %s1924_s15 = int_to_ptr.hbm [resolvable:$true] %s1923_s15 }
  0x1b   : > { %s1925_s16 = scalar_lea.hbm %s1924_s15, 32  ;;  %p1927_p9 = pneg %p2160_p8 }
  0x1c   : > { %p1926_p7 = scmp.ne.s32.totalorder %s1924_s15, %s1925_s16  ;;  %p1931_p0 = scmp.lt.s32.totalorder %s1924_s15, %s2965_s0 }
  0x1d   : > { %p1932_p2 = scmp.lt.s32.totalorder %s1930_s22, %s1925_s16 }
  0x1e   : > { %p1928_p10 = pnand %p1927_p9, %p1926_p7 }
  0x1f   : > { %p1933_p6 = por %p1932_p2, %p1931_p0 }
  0x20   : > { %p1929_p11 = pneg %p1928_p10 }
  0x22   : > { %p1934_p5 = pnand %p1933_p6, %p1929_p11 }
  0x24   : > { %1937 = shalt.err (!%p1934_p5)
}
  0x25   : > { %1807 = dma.hbm_to_vmem [thread:$0]  (!%p2160_p8), %s265_s9, 512, %s267_s11, %s254_s13  }
  0x26   : > { %289 = sbr.rel (%p2115_p3) target bundleno = 789 (0x315), region = 48 }
  0x2b   : > { %s2177_s20 = sand.u32 1, %s2015_s25  }
  0x2c   : > { %s1762_s10 = sshll.u32 %s2177_s20, 5  ;;  %s292_s23 = scalar_lea.sflag [#allocation5], %s2177_s20 }
  0x2d   : > { %s2183_s15 = scalar_lea.vmem [#allocation4], %s1762_s10 }
  0x2e   : > { %1998 = dma.done.wait (%p2142_p12), %s292_s23, 512  }
  0x2f   : > { %2000 = vsyncadd (%p2142_p12), %s292_s23, 4294966784 }
  0x30   : > { %2002 = dma.done.wait (%p45_p1), [#allocation8], 2048  }
  0x31   : > { %2004 = vsyncadd (%p45_p1), [#allocation8], 4294965248  ;;  %v2194_v0 = vld [vmem:[%s2183_s15 + $0x18] sm:$0xff]  ;;  %v2197_v1 = vld [vmem:[%s2183_s15 + $0x8] sm:$0xff]  ;;  %s2028_s8 = smov 55   ;;  %s2029_s9 = smov 56   ;;  %v360_v6 = vlaneseq }
  0x32   : > { %615 = vrot.lane.b32.xlu2 %v2194_v0, %s2028_s8  ;;  %579 = vrot.lane.b32.xlu1 %v2197_v1, %s2029_s9  ;;  %v2203_v2 = vld [vmem:[%s2183_s15 + $0x10] sm:$0xff]  ;;  %s2030_s18 = smov 57   ;;  %v2209_v3 = vld [vmem:[%s2183_s15] sm:$0xff]  ;;  %s2031_s11 = smov 63   ;;  %vm678_vm13 = vcmask 588800  }
  0x33   : > { %611 = vrot.lane.b32.xlu0 %v2197_v1, %s2028_s8  ;;  %s2032_s12 = smov 64   ;;  %s2033_s13 = smov 65   ;;  %v2254_v7 = vand.u32 127, %v360_v6  ;;  %v623_v8 = vld [vmem:[#allocation7 + $0x20] ss:$8 sm:$0xf] }
  0x34   : > { %s2034_s16 = smov 119   ;;  %s2035_s6 = smov 71   ;;  %v625_v9 = vperm.slane %v623_v8, 0  ;;  %v626_v13 = vperm.slane %v623_v8, 1  ;;  %v627_v20 = vperm.slane %v623_v8, 2  ;;  %v628_v21 = vperm.slane %v623_v8, 3 }
  0x35   : > { %s2036_s22 = smov 120   ;;  %s2037_s28 = smov 72   ;;  %vm617_vm0 = vcmp.lt.s32.totalorder %v2254_v7, 55  ;;  %v2286_v19 = vld [vmem:[#allocation7 + $0x7] ss:$8 sm:$0xf] }
  0x36   : > { %s2038_s29 = smov 121   ;;  %s2039_s23 = smov 73   ;;  %vm585_vm1 = vcmp.lt.s32.totalorder %v2254_v7, 56  ;;  %v595_v25 = vperm.slane %v2286_v19, 2  ;;  %v596_v33 = vperm.slane %v2286_v19, 3  ;;  %vm553_vm2 = vcmp.lt.s32.totalorder %v2254_v7, 57 }
  0x37   : > { %v2309_v31 = vld [vmem:[#allocation7 + $0x6] ss:$8 sm:$0xf]  ;;  %v2340_v44 = vld [vmem:[#allocation7 + $0x5] ss:$8 sm:$0xf] }
  0x38   : > { %v563_v34 = vperm.slane %v2309_v31, 2  ;;  %v564_v39 = vperm.slane %v2309_v31, 3  ;;  %vm521_vm3 = vcmp.lt.s32.totalorder %v2254_v7, 63  ;;  %v531_v46 = vperm.slane %v2340_v44, 2  ;;  %p340_p1 = scmp.lt.s32.totalorder %s2110_s30, 1 }
  0x39   : > { %v2356_v52 = vld [vmem:[#allocation7 + $0x4] ss:$8 sm:$0xf]  ;;  %vm489_vm4 = vcmp.lt.s32.totalorder %v2254_v7, 64  ;;  %v593_v54 = vperm.slane %v2286_v19, 0  ;;  %v594_v55 = vperm.slane %v2286_v19, 1 }
  0x3a   : > { %547 = vrot.lane.b32.xlu2 %v2197_v1, %s2030_s18  ;;  %581 = vrot.lane.b32.xlu1 %v2203_v2, %s2029_s9  ;;  %v499_v53 = vperm.slane %v2356_v52, 2  ;;  %v561_v6 = vperm.slane %v2309_v31, 0  ;;  %v529_v19 = vperm.slane %v2340_v44, 0  ;;  %vm457_vm5 = vcmp.lt.s32.totalorder %v2254_v7, 65 }
  0x3b   : > { %613 = vrot.lane.b32.xlu0 %v2203_v2, %s2028_s8  ;;  %vm1017_vm6 = vcmp.lt.s32.totalorder %v2254_v7, 119  ;;  %vm425_vm7 = vcmp.lt.s32.totalorder %v2254_v7, 71  ;;  %vm393_vm8 = vcmp.lt.s32.totalorder %v2254_v7, 72  ;;  %vm362_vm9 = vcmp.lt.s32.totalorder %v2254_v7, 73 }
  0x3c   : > { %vm985_vm10 = vcmp.lt.s32.totalorder %v2254_v7, 120  ;;  %vm953_vm11 = vcmp.lt.s32.totalorder %v2254_v7, 121  ;;  %vm921_vm12 = vcmp.lt.s32.totalorder %v2254_v7, 127  ;;  %vm870_vm14 = vcmp.lt.s32.totalorder %v2254_v7, 1 }
  0x3d   : > { %vm838_vm15 = vcmp.lt.s32.totalorder %v2254_v7, 7 }
  0x42   : > { %583 = vrot.lane.b32.xlu1 %v2194_v0, %s2029_s9  ;;  %609 = vrot.lane.b32.xlu2 %v2209_v3, %s2028_s8  ;;  %s2040_s8 = smov 127  }
  0x43   : > { %549 = vrot.lane.b32.xlu0 %v2203_v2, %s2030_s18 }
  0x4a   : > { %517 = vrot.lane.b32.xlu1 %v2203_v2, %s2031_s11  ;;  %551 = vrot.lane.b32.xlu2 %v2194_v0, %s2030_s18 }
  0x4b   : > { %515 = vrot.lane.b32.xlu0 %v2197_v1, %s2031_s11 }
  0x52   : > { %483 = vrot.lane.b32.xlu1 %v2197_v1, %s2032_s12  ;;  %485 = vrot.lane.b32.xlu2 %v2203_v2, %s2032_s12 }
  0x53   : > { %577 = vrot.lane.b32.xlu0 %v2209_v3, %s2029_s9  ;;  %s2041_s9 = smov 1  }
  0x5a   : > { %545 = vrot.lane.b32.xlu1 %v2209_v3, %s2030_s18  ;;  %451 = vrot.lane.b32.xlu2 %v2197_v1, %s2033_s13  ;;  %s2042_s18 = smov 7  }
  0x5b   : > { %519 = vrot.lane.b32.xlu0 %v2194_v0, %s2031_s11 }
  0x62   : > { %487 = vrot.lane.b32.xlu1 %v2194_v0, %s2032_s12  ;;  %513 = vrot.lane.b32.xlu2 %v2209_v3, %s2031_s11  ;;  %s2043_s11 = smov 8  }
  0x63   : > { %453 = vrot.lane.b32.xlu0 %v2203_v2, %s2033_s13 }
  0x6a   : > { %1015 = vrot.lane.b32.xlu1 %v2194_v0, %s2034_s16  ;;  %419 = vrot.lane.b32.xlu2 %v2197_v1, %s2035_s6 }
  0x6b   : > { %1013 = vrot.lane.b32.xlu0 %v2203_v2, %s2034_s16 }
  0x72   : > { %455 = vrot.lane.b32.xlu1 %v2194_v0, %s2033_s13  ;;  %481 = vrot.lane.b32.xlu2 %v2209_v3, %s2032_s12  ;;  %s2044_s12 = smov 9  }
  0x73   : > { %421 = vrot.lane.b32.xlu0 %v2203_v2, %s2035_s6 }
  0x7a   : > { %983 = vrot.lane.b32.xlu1 %v2194_v0, %s2036_s22  ;;  %1009 = vrot.lane.b32.xlu2 %v2209_v3, %s2034_s16 }
  0x7b   : > { %981 = vrot.lane.b32.xlu0 %v2203_v2, %s2036_s22 }
  0x82   : > { %389 = vrot.lane.b32.xlu1 %v2203_v2, %s2037_s28  ;;  %423 = vrot.lane.b32.xlu2 %v2194_v0, %s2035_s6 }
  0x83   : > { %387 = vrot.lane.b32.xlu0 %v2197_v1, %s2037_s28 }
  0x8a   : > { %949 = vrot.lane.b32.xlu1 %v2203_v2, %s2038_s29  ;;  %951 = vrot.lane.b32.xlu2 %v2194_v0, %s2038_s29 }
  0x8b   : > { %449 = vrot.lane.b32.xlu0 %v2209_v3, %s2033_s13 }
  0x8c   : > { %v616_v4 = vpop.permute.xlu2 %615 }
  0x92   : > { %1011 = vrot.lane.b32.xlu1 %v2197_v1, %s2034_s16  ;;  %354 = vrot.lane.b32.xlu2 %v2197_v1, %s2039_s23 }
  0x93   : > { %977 = vrot.lane.b32.xlu0 %v2209_v3, %s2036_s22 }
  0x94   : > { %v2252_v5 = vpop.permute.xlu2 %547 }
  0x9a   : > { %391 = vrot.lane.b32.xlu1 %v2194_v0, %s2037_s28  ;;  %417 = vrot.lane.b32.xlu2 %v2209_v3, %s2035_s6  ;;  %s1973_s6 = scalar_lea.hbm %s2972_s7, 64 }
  0x9b   : > { %356 = vrot.lane.b32.xlu0 %v2203_v2, %s2039_s23 }
  0x9c   : > { %v610_v10 = vpop.permute.xlu2 %609 }
  0x9d   : > { %v2264_v11 = vsel %vm617_vm0, %v616_v4, %v610_v10 }
  0x9e   : > { %v633_v12 = vmul.f32 %v625_v9, %v2264_v11 }
  0xa0   : > { %689 = vmatpush.msra.mxu0 %v633_v12  ;;  %v532_v12 = vperm.slane %v2340_v44, 3 }
  0xa2   : > { %919 = vrot.lane.b32.xlu1 %v2194_v0, %s2040_s8  ;;  %945 = vrot.lane.b32.xlu2 %v2209_v3, %s2038_s29 }
  0xa3   : > { %917 = vrot.lane.b32.xlu0 %v2203_v2, %s2040_s8 }
  0xa4   : > { %v2273_v14 = vpop.permute.xlu1 %579  ;;  %v2275_v15 = vpop.permute.xlu2 %551 }
  0xa5   : > { %v612_v16 = vpop.permute.xlu0 %611 }
  0xa6   : > { %v2279_v17 = vsel %vm617_vm0, %v610_v10, %v612_v16  ;;  %v562_v10 = vperm.slane %v2309_v31, 1 }
  0xa7   : > { %v634_v18 = vmul.f32 %v626_v13, %v2279_v17 }
  0xa9   : > { %709 = vmatpush.msra.mxu1 %v634_v18 }
  0xaa   : > { %358 = vrot.lane.b32.xlu1 %v2194_v0, %s2039_s23  ;;  %385 = vrot.lane.b32.xlu2 %v2209_v3, %s2037_s28  ;;  %s1791_s28 = sshll.u32 %s2110_s30, 5 }
  0xab   : > { %979 = vrot.lane.b32.xlu0 %v2197_v1, %s2036_s22 }
  0xac   : > { %v582_v22 = vpop.permute.xlu1 %581  ;;  %v2291_v23 = vpop.permute.xlu2 %485 }
  0xad   : > { %v614_v24 = vpop.permute.xlu0 %613  ;;  %v2297_v26 = vsel %vm585_vm1, %v2273_v14, %v582_v22 }
  0xae   : > { %v2301_v27 = vsel %vm617_vm0, %v612_v16, %v614_v24  ;;  %v2305_v28 = vsel %vm617_vm0, %v614_v24, %v616_v4  ;;  %v603_v32 = vmul.f32 %v595_v25, %v2297_v26  ;;  %v498_v25 = vperm.slane %v2356_v52, 1 }
  0xaf   : > { %v635_v29 = vmul.f32 %v627_v20, %v2301_v27  ;;  %v636_v30 = vmul.f32 %v628_v21, %v2305_v28  ;;  %v530_v20 = vperm.slane %v2340_v44, 1  ;;  %vm806_vm0 = vcmp.lt.s32.totalorder %v2254_v7, 8 }
  0xb1   : > { %729 = vmatpush.msra.mxu2 %v635_v29  ;;  %749 = vmatpush.msra.mxu3 %v636_v30  ;;  %v2424_v29 = vld [vmem:[#allocation7 + $0x3] ss:$8 sm:$0xf] }
  0xb2   : > { %947 = vrot.lane.b32.xlu1 %v2197_v1, %s2038_s29  ;;  %352 = vrot.lane.b32.xlu2 %v2209_v3, %s2039_s23  ;;  %s1645_s23 = scalar_lea.hbm %s2972_s7, %s1791_s28 }
  0xb3   : > { %730 = vmatpush.msra.mxu2 %v603_v32  ;;  %913 = vrot.lane.b32.xlu0 %v2209_v3, %s2040_s8 }
  0xb4   : > { %v584_v35 = vpop.permute.xlu1 %583  ;;  %v2321_v36 = vpop.permute.xlu2 %451 }
  0xb5   : > { %v2325_v37 = vsel %vm585_vm1, %v582_v22, %v584_v35  ;;  %v550_v38 = vpop.permute.xlu0 %549 }
  0xb6   : > { %v2331_v40 = vsel %vm553_vm2, %v550_v38, %v2275_v15  ;;  %v2336_v41 = vsel %vm553_vm2, %v2252_v5, %v550_v38  ;;  %v604_v42 = vmul.f32 %v596_v33, %v2325_v37  ;;  %v500_v33 = vperm.slane %v2356_v52, 3 }
  0xb7   : > { %v571_v43 = vmul.f32 %v563_v34, %v2336_v41  ;;  %v572_v45 = vmul.f32 %v564_v39, %v2331_v40  ;;  %v467_v34 = vperm.slane %v2424_v29, 2 }
  0xb8   : > { %750 = vmatpush.msra.mxu3 %v604_v42 }
  0xb9   : > { %731 = vmatpush.msra.mxu2 %v571_v43 }
  0xba   : > { %866 = vrot.lane.b32.xlu1 %v2203_v2, %s2041_s9  ;;  %915 = vrot.lane.b32.xlu2 %v2197_v1, %s2040_s8  ;;  %s339_s8 = scalar_lea.vmem [#allocation9], %s1762_s10 }
  0xbb   : > { %864 = vrot.lane.b32.xlu0 %v2197_v1, %s2041_s9  ;;  %751 = vmatpush.msra.mxu3 %v572_v45 }
  0xbc   : > { %v518_v47 = vpop.permute.xlu1 %517  ;;  %v514_v48 = vpop.permute.xlu2 %513 }
  0xbd   : > { %v516_v49 = vpop.permute.xlu0 %515 }
  0xbe   : > { %v2353_v50 = vsel %vm521_vm3, %v516_v49, %v518_v47  ;;  %v2414_v21 = vsel %vm521_vm3, %v514_v48, %v516_v49 }
  0xbf   : > { %v539_v51 = vmul.f32 %v531_v46, %v2353_v50  ;;  %v538_v32 = vmul.f32 %v530_v20, %v2414_v21 }
  0xc1   : > { %732 = vmatpush.msra.mxu2 %v539_v51 }
  0xc2   : > { %834 = vrot.lane.b32.xlu1 %v2203_v2, %s2042_s18  ;;  %868 = vrot.lane.b32.xlu2 %v2194_v0, %s2041_s9 }
  0xc3   : > { %832 = vrot.lane.b32.xlu0 %v2197_v1, %s2042_s18 }
  0xc4   : > { %v484_v56 = vpop.permute.xlu1 %483  ;;  %v2368_v57 = vpop.permute.xlu2 %419 }
  0xc5   : > { %v2373_v58 = vsel %vm489_vm4, %v484_v56, %v2291_v23  ;;  %v578_v59 = vpop.permute.xlu0 %577 }
  0xc6   : > { %2986 = vst [vmem:[#allocation13_spill] sm:$0xff] %v2373_v58  ;;  %v2378_v60 = vsel %vm585_vm1, %v578_v59, %v2273_v14  ;;  %v2382_v61 = vsel %vm585_vm1, %v584_v35, %v578_v59  ;;  %v507_v62 = vmul.f32 %v499_v53, %v2373_v58  ;;  %v497_v35 = vperm.slane %v2356_v52, 0  ;;  %v2606_v58 = vld [vmem:[#allocation7 + $0x25] ss:$8 sm:$0xf] }
  0xc7   : > { %v601_v63 = vmul.f32 %v593_v54, %v2382_v61  ;;  %v602_v4 = vmul.f32 %v594_v55, %v2378_v60  ;;  %v431_v54 = vld [vmem:[#allocation7 + $0x2] ss:$8 sm:$0xf]  ;;  %v468_v55 = vperm.slane %v2424_v29, 3  ;;  %vm774_vm1 = vcmp.lt.s32.totalorder %v2254_v7, 9 }
  0xc8   : > { %733 = vmatpush.msra.mxu2 %v507_v62 }
  0xc9   : > { %690 = vmatpush.msra.mxu0 %v601_v63  ;;  %710 = vmatpush.msra.mxu1 %v602_v4  ;;  %v436_v63 = vperm.slane %v431_v54, 3 }
  0xca   : > { %802 = vrot.lane.b32.xlu1 %v2203_v2, %s2043_s11  ;;  %836 = vrot.lane.b32.xlu2 %v2194_v0, %s2042_s18 }
  0xcb   : > { %800 = vrot.lane.b32.xlu0 %v2197_v1, %s2043_s11 }
  0xcc   : > { %v546_v8 = vpop.permute.xlu1 %545  ;;  %v482_v9 = vpop.permute.xlu2 %481 }
  0xcd   : > { %v2399_v13 = vsel %vm553_vm2, %v546_v8, %v2252_v5  ;;  %v2404_v14 = vsel %vm553_vm2, %v2275_v15, %v546_v8  ;;  %v520_v16 = vpop.permute.xlu0 %519  ;;  %v2428_v30 = vsel %vm489_vm4, %v482_v9, %v484_v56  ;;  %v435_v56 = vperm.slane %v431_v54, 2 }
  0xce   : > { %v2408_v18 = vsel %vm521_vm3, %v518_v47, %v520_v16  ;;  %v2418_v5 = vsel %vm521_vm3, %v520_v16, %v514_v48  ;;  %v569_v15 = vmul.f32 %v561_v6, %v2404_v14  ;;  %v570_v22 = vmul.f32 %v562_v10, %v2399_v13  ;;  %2987 = vst [vmem:[#allocation14_spill] sm:$0xff] %v2428_v30 }
  0xcf   : > { %v540_v24 = vmul.f32 %v532_v12, %v2408_v18  ;;  %v537_v31 = vmul.f32 %v529_v19, %v2418_v5  ;;  %v506_v39 = vmul.f32 %v498_v25, %v2428_v30 }
  0xd0   : > { %691 = vmatpush.msra.mxu0 %v569_v15  ;;  %711 = vmatpush.msra.mxu1 %v570_v22  ;;  %v2507_v22 = vld [vmem:[#allocation7 + $0x1] ss:$8 sm:$0xf] }
  0xd1   : > { %752 = vmatpush.msra.mxu3 %v540_v24  ;;  %v403_v24 = vperm.slane %v2507_v22, 2 }
  0xd2   : > { %768 = vrot.lane.b32.xlu1 %v2197_v1, %s2044_s12  ;;  %692 = vmatpush.msra.mxu0 %v537_v31 }
  0xd3   : > { %862 = vrot.lane.b32.xlu0 %v2209_v3, %s2041_s9  ;;  %712 = vmatpush.msra.mxu1 %v538_v32  ;;  %s341_s9 = scalar_select %p340_p1, %s2110_s30, 1 }
  0xd4   : > { %v488_v38 = vpop.permute.xlu1 %487  ;;  %v2441_v42 = vpop.permute.xlu2 %1009  ;;  %770 = vrot.lane.b32.xlu2 %v2203_v2, %s2044_s12 }
  0xd5   : > { %v2446_v43 = vsel %vm489_vm4, %v2291_v23, %v488_v38  ;;  %v2450_v44 = vsel %vm489_vm4, %v488_v38, %v482_v9  ;;  %v454_v45 = vpop.permute.xlu0 %453  ;;  %713 = vmatpush.msra.mxu1 %v506_v39  ;;  %v466_v38 = vperm.slane %v2424_v29, 1 }
  0xd6   : > { %v2457_v46 = vsel %vm457_vm5, %v2321_v36, %v454_v45  ;;  %v508_v47 = vmul.f32 %v500_v33, %v2446_v43  ;;  %v505_v23 = vmul.f32 %v497_v35, %v2450_v44  ;;  %v465_v35 = vperm.slane %v2424_v29, 0 }
  0xd7   : > { %2988 = vst [vmem:[#allocation15_spill] sm:$0xff] %v2457_v46  ;;  %v475_v48 = vmul.f32 %v467_v34, %v2457_v46 }
  0xd8   : > { %753 = vmatpush.msra.mxu3 %v508_v47  ;;  %693 = vmatpush.msra.mxu0 %v505_v23  ;;  %v434_v23 = vperm.slane %v431_v54, 1 }
  0xd9   : > { %734 = vmatpush.msra.mxu2 %v475_v48  ;;  %v433_v48 = vperm.slane %v431_v54, 0 }
  0xda   : > { %830 = vrot.lane.b32.xlu1 %v2209_v3, %s2042_s18  ;;  %s1765_s18 = sshll.u32 %s341_s9, 3  ;;  %s1647_s9 = sshll.u32 %s339_s8, 4  ;;  %s1648_s9 = int_to_ptr.vmem [resolvable:$true] %s1647_s9 }
  0xdb   : > { %804 = vrot.lane.b32.xlu0 %v2194_v0, %s2043_s11  ;;  %s343_s13 = scalar_lea.vmem %s2968_s3, %s1765_s18  ;;  %s347_s22 = scalar_lea.vmem %s2969_s4, %s1765_s18 }
  0xdc   : > { %v2467_v49 = vpop.permute.xlu1 %1015  ;;  %v424_v51 = vpop.permute.xlu2 %423  ;;  %772 = vrot.lane.b32.xlu2 %v2194_v0, %s2044_s12  ;;  %s1649_s18 = sshll.u32 %s1645_s23, 4  ;;  %s1650_s18 = int_to_ptr.hbm [resolvable:$true] %s1649_s18 }
  0xdd   : > { %v2473_v52 = vsel %vm1017_vm6, %v2467_v49, %v2441_v42  ;;  %v2475_v53 = vpop.permute.xlu0 %1013 }
  0xe2   : > { %766 = vrot.lane.b32.xlu1 %v2209_v3, %s2044_s12  ;;  %s1967_s12 = sshra.s32 %s1650_s18, 4  ;;  %s1968_s12 = int_to_ptr.hbm [resolvable:$true] %s1967_s12 }
  0xe3   : > { %798 = vrot.lane.b32.xlu0 %v2209_v3, %s2043_s11  ;;  %s1634_s11 = scalar_lea.sflag [#allocation6], %s2177_s20  ;;  %p1974_p8 = scmp.lt.s32.totalorder %s1968_s12, %s2972_s7 }
  0xe4   : > { %v456_v59 = vpop.permute.xlu1 %455  ;;  %v2485_v62 = vpop.permute.xlu2 %951 }
  0xe5   : > { %v2489_v4 = vsel %vm457_vm5, %v454_v45, %v456_v59  ;;  %v422_v6 = vpop.permute.xlu0 %421 }
  0xe6   : > { %v2493_v8 = vsel %vm425_vm7, %v422_v6, %v424_v51  ;;  %v2498_v9 = vsel %vm425_vm7, %v2368_v57, %v422_v6  ;;  %v476_v10 = vmul.f32 %v468_v55, %v2489_v4 }
  0xe7   : > { %2989 = vst [vmem:[#allocation16_spill] sm:$0xff] %v2498_v9  ;;  %v443_v12 = vmul.f32 %v435_v56, %v2498_v9  ;;  %v444_v16 = vmul.f32 %v436_v63, %v2493_v8 }
  0xe8   : > { %754 = vmatpush.msra.mxu3 %v476_v10  ;;  %v402_v10 = vperm.slane %v2507_v22, 1 }
  0xe9   : > { %735 = vmatpush.msra.mxu2 %v443_v12 }
  0xea   : > { %755 = vmatpush.msra.mxu3 %v444_v16 }
  0xec   : > { %v2503_v19 = vpop.permute.xlu1 %983  ;;  %v355_v20 = vpop.permute.xlu2 %354 }
  0xed   : > { %v2505_v15 = vpop.permute.xlu0 %981 }
  0xf4   : > { %v390_v25 = vpop.permute.xlu1 %389  ;;  %v418_v31 = vpop.permute.xlu2 %417 }
  0xf5   : > { %v388_v32 = vpop.permute.xlu0 %387  ;;  %v2525_v55 = vsel %vm425_vm7, %v418_v31, %v2368_v57  ;;  %v2529_v56 = vsel %vm425_vm7, %v424_v51, %v418_v31  ;;  %v2554_v31 = vld [vmem:[#allocation7] ss:$8 sm:$0xf] }
  0xf6   : > { %v2513_v33 = vsel %vm393_vm8, %v388_v32, %v390_v25  ;;  %2991 = vst [vmem:[#allocation18_spill] sm:$0xff] %v2525_v55  ;;  %v441_v57 = vmul.f32 %v433_v48, %v2529_v56  ;;  %v442_v51 = vmul.f32 %v434_v23, %v2525_v55  ;;  %v2562_v48 = vld [vmem:[#allocation7 + $0x40] ss:$8 sm:$0xf] }
  0xf7   : > { %2990 = vst [vmem:[#allocation17_spill] sm:$0xff] %v2513_v33  ;;  %v411_v34 = vmul.f32 %v403_v24, %v2513_v33  ;;  %v2593_v55 = vld [vmem:[#allocation7 + $0x27] ss:$8 sm:$0xf] }
  0xf9   : > { %736 = vmatpush.msra.mxu2 %v411_v34  ;;  %v2556_v34 = vld [vmem:[#allocation7 + $0x41] ss:$8 sm:$0xf] }
  0xfc   : > { %v2518_v39 = vpop.permute.xlu1 %949  ;;  %v2520_v45 = vpop.permute.xlu2 %945 }
  0xfd   : > { %v450_v47 = vpop.permute.xlu0 %449 }
  0xfe   : > { %v2534_v29 = vsel %vm457_vm5, %v450_v47, %v2321_v36  ;;  %v2538_v63 = vsel %vm457_vm5, %v456_v59, %v450_v47  ;;  %v404_v47 = vperm.slane %v2507_v22, 3 }
  0xff   : > { %2992 = vst [vmem:[#allocation19_spill] sm:$0xff] %v2534_v29  ;;  %v473_v54 = vmul.f32 %v465_v35, %v2538_v63  ;;  %v474_v6 = vmul.f32 %v466_v38, %v2534_v29  ;;  %v370_v35 = vperm.slane %v2554_v31, 1  ;;  %v371_v38 = vperm.slane %v2554_v31, 2  ;;  %v2604_v29 = vld [vmem:[#allocation7 + $0x26] ss:$8 sm:$0xf] }
 0x101   : > { %694 = vmatpush.msra.mxu0 %v473_v54  ;;  %714 = vmatpush.msra.mxu1 %v474_v6  ;;  %v1026_v54 = vperm.slane %v2556_v34, 1  ;;  %v1027_v6 = vperm.slane %v2556_v34, 2 }
 0x103   : > { %695 = vmatpush.msra.mxu0 %v441_v57  ;;  %715 = vmatpush.msra.mxu1 %v442_v51  ;;  %v401_v57 = vperm.slane %v2507_v22, 0  ;;  %v1018_v22 = vsel %vm1017_vm6, %v2475_v53, %v2467_v49  ;;  %v986_v49 = vsel %vm985_vm10, %v2505_v15, %v2503_v19 }
 0x104   : > { %v2545_v36 = vpop.permute.xlu1 %1011  ;;  %v386_v12 = vpop.permute.xlu2 %385  ;;  %v1035_v30 = vmul.f32 %v1027_v6, %v1018_v22 }
 0x105   : > { %v2547_v16 = vpop.permute.xlu0 %977  ;;  %v2551_v59 = vsel %vm393_vm8, %v386_v12, %v388_v32  ;;  %v1019_v51 = vsel %vm1017_vm6, %v2545_v36, %v2475_v53 }
 0x106   : > { %2993 = vst [vmem:[#allocation20_spill] sm:$0xff] %v2551_v59  ;;  %v410_v24 = vmul.f32 %v402_v10, %v2551_v59  ;;  %v1034_v53 = vmul.f32 %v1026_v54, %v1019_v51  ;;  %v931_v54 = vperm.slane %v2604_v29, 2 }
 0x108   : > { %716 = vmatpush.msra.mxu1 %v410_v24 }
 0x10c   : > { %v392_v32 = vpop.permute.xlu1 %391  ;;  %v353_v23 = vpop.permute.xlu2 %352 }
 0x10d   : > { %v2574_v10 = vsel %vm393_vm8, %v390_v25, %v392_v32  ;;  %v2578_v24 = vsel %vm393_vm8, %v392_v32, %v386_v12  ;;  %v357_v33 = vpop.permute.xlu0 %356  ;;  %v2582_v59 = vsel %vm362_vm9, %v353_v23, %v355_v20  ;;  %v995_v25 = vperm.slane %v2562_v48, 2 }
 0x10e   : > { %v2590_v9 = vsel %vm362_vm9, %v355_v20, %v357_v33  ;;  %v378_v12 = vmul.f32 %v370_v35, %v2582_v59  ;;  %v412_v46 = vmul.f32 %v404_v47, %v2574_v10  ;;  %v409_v20 = vmul.f32 %v401_v57, %v2578_v24 }
 0x10f   : > { %v379_v32 = vmul.f32 %v371_v38, %v2590_v9  ;;  %v963_v35 = vperm.slane %v2593_v55, 2  ;;  %v954_v38 = vsel %vm953_vm11, %v2518_v39, %v2485_v62  ;;  %v1003_v47 = vmul.f32 %v995_v25, %v986_v49 }
 0x110   : > { %717 = vmatpush.msra.mxu1 %v378_v12  ;;  %756 = vmatpush.msra.mxu3 %v412_v46  ;;  %v899_v57 = vperm.slane %v2606_v58, 2  ;;  %v372_v25 = vperm.slane %v2554_v31, 3  ;;  %v994_v49 = vperm.slane %v2562_v48, 1 }
 0x111   : > { %737 = vmatpush.msra.mxu2 %v379_v32  ;;  %696 = vmatpush.msra.mxu0 %v409_v20  ;;  %v971_v22 = vmul.f32 %v963_v35, %v954_v38  ;;  %v1025_v20 = vperm.slane %v2556_v34, 0  ;;  %v1020_v35 = vsel %vm1017_vm6, %v2441_v42, %v2545_v36 }
 0x112   : > { %1109 = vmatpush.msrb.mxu1 %v1034_v53  ;;  %v907_v46 = vmul.f32 %v899_v57, %v2203_v2  ;;  %v993_v57 = vperm.slane %v2562_v48, 0 }
 0x113   : > { %1129 = vmatpush.msrb.mxu2 %v1035_v30  ;;  %v369_v30 = vperm.slane %v2554_v31, 0 }
 0x114   : > { %v920_v51 = vpop.permute.xlu1 %919 }
 0x115   : > { %1130 = vmatpush.msrb.mxu2 %v1003_v47  ;;  %v918_v6 = vpop.permute.xlu0 %917  ;;  %v1028_v47 = vperm.slane %v2556_v34, 3  ;;  %v989_v34 = vsel %vm985_vm10, %v2503_v19, %v2547_v16  ;;  %v962_v19 = vperm.slane %v2593_v55, 1 }
 0x116   : > { %v922_v12 = vsel %vm921_vm12, %v918_v6, %v920_v51 }
 0x117   : > { %1131 = vmatpush.msrb.mxu2 %v971_v22  ;;  %v939_v32 = vmul.f32 %v931_v54, %v922_v12  ;;  %v996_v22 = vperm.slane %v2562_v48, 3  ;;  %v916_v12 = vpop.permute.xlu2 %915  ;;  %v1036_v48 = vmul.f32 %v1028_v47, %v2473_v52  ;;  %v930_v52 = vperm.slane %v2604_v29, 1 }
 0x118   : > { %v898_v47 = vperm.slane %v2606_v58, 1 }
 0x119   : > { %1132 = vmatpush.msrb.mxu2 %v939_v32  ;;  %v964_v32 = vperm.slane %v2593_v55, 3 }
 0x11b   : > { %1133 = vmatpush.msrb.mxu2 %v907_v46  ;;  %v957_v46 = vsel %vm953_vm11, %v2485_v62, %v2520_v45 }
 0x11c   : > { %v359_v53 = vpop.permute.xlu1 %358 }
 0x11d   : > { %v2629_v38 = vsel %vm362_vm9, %v357_v33, %v359_v53  ;;  %v2633_v2 = vsel %vm362_vm9, %v359_v53, %v353_v23  ;;  %v980_v31 = vpop.permute.xlu0 %979  ;;  %v900_v53 = vperm.slane %v2606_v58, 3 }
 0x11e   : > { %v987_v54 = vsel %vm985_vm10, %v980_v31, %v2505_v15  ;;  %v988_v42 = vsel %vm985_vm10, %v2547_v16, %v980_v31  ;;  %v377_v33 = vmul.f32 %v369_v30, %v2633_v2  ;;  %v380_v36 = vmul.f32 %v372_v25, %v2629_v38 }
 0x11f   : > { %v1002_v23 = vmul.f32 %v994_v49, %v987_v54  ;;  %v1033_v15 = vmul.f32 %v1025_v20, %v1020_v35  ;;  %v1001_v30 = vmul.f32 %v993_v57, %v988_v42  ;;  %v961_v25 = vperm.slane %v2593_v55, 0 }
 0x120   : > { %697 = vmatpush.msra.mxu0 %v377_v33  ;;  %757 = vmatpush.msra.mxu3 %v380_v36  ;;  %v1004_v16 = vmul.f32 %v996_v22, %v989_v34  ;;  %v932_v49 = vperm.slane %v2604_v29, 3  ;;  %v923_v20 = vsel %vm921_vm12, %v916_v12, %v918_v6  ;;  %v929_v35 = vperm.slane %v2604_v29, 0  ;;  %v869_v34 = vpop.permute.xlu2 %868 }
 0x121   : > { %1110 = vmatpush.msrb.mxu1 %v1002_v23  ;;  %v897_v31 = vperm.slane %v2606_v58, 0  ;;  %v972_v22 = vmul.f32 %v964_v32, %v957_v46  ;;  %v938_v36 = vmul.f32 %v930_v52, %v923_v20  ;;  %v908_v23 = vmul.f32 %v900_v53, %v2194_v0 }
 0x122   : > { %1089 = vmatpush.msrb.mxu0 %v1033_v15  ;;  %1149 = vmatpush.msrb.mxu3 %v1036_v48  ;;  %v641_v48 = vld [vmem:[%s2966_s1] sm:$0xff] }
 0x123   : > { %v905_v15 = vmul.f32 %v897_v31, %v2209_v3  ;;  %1769 = vmatmul.msk.f32.vlgmr.msra.gmra.mxu2 %vm678_vm13, %v641_v48  ;;  %1770 = vmatmul.msk.f32.vlgmr.msra.gmra.mxu3 %vm678_vm13, %v641_v48 }
 0x124   : > { %1090 = vmatpush.msrb.mxu0 %v1001_v30  ;;  %v948_v62 = vpop.permute.xlu1 %947  ;;  %1150 = vmatpush.msrb.mxu3 %v1004_v16 }
 0x125   : > { %v955_v55 = vsel %vm953_vm11, %v948_v62, %v2518_v39  ;;  %v956_v54 = vsel %vm953_vm11, %v2520_v45, %v948_v62  ;;  %v914_v57 = vpop.permute.xlu0 %913  ;;  %v2677_v45 = vld [vmem:[#allocation7 + $0x24] ss:$8 sm:$0xf]  ;;  %1767 = vmatmul.msk.f32.vlgmr.msra.gmra.mxu0 %vm678_vm13, %v641_v48  ;;  %1768 = vmatmul.msk.f32.vlgmr.msra.gmra.mxu1 %vm678_vm13, %v641_v48  ;;  %v2727_v48 = vld [vmem:[#allocation7 + $0x61] ss:$8 sm:$0xf] }
 0x126   : > { %v924_v6 = vsel %vm921_vm12, %v914_v57, %v916_v12  ;;  %v925_v29 = vsel %vm921_vm12, %v920_v51, %v914_v57  ;;  %v969_v42 = vmul.f32 %v961_v25, %v956_v54  ;;  %v970_v33 = vmul.f32 %v962_v19, %v955_v55  ;;  %1151 = vmatpush.msrb.mxu3 %v972_v22  ;;  %v2695_v19 = vld [vmem:[#allocation7 + $0x23] ss:$8 sm:$0xf]  ;;  %v2707_v55 = vld [vmem:[#allocation7 + $0x22] ss:$8 sm:$0xf] }
 0x127   : > { %v940_v58 = vmul.f32 %v932_v49, %v925_v29  ;;  %v937_v39 = vmul.f32 %v929_v35, %v924_v6  ;;  %v906_v12 = vmul.f32 %v898_v47, %v2197_v1  ;;  %v881_v51 = vperm.slane %v2677_v45, 3 }
 0x128   : > { %1091 = vmatpush.msrb.mxu0 %v969_v42  ;;  %1111 = vmatpush.msrb.mxu1 %v970_v33  ;;  %v880_v0 = vperm.slane %v2677_v45, 2  ;;  %v2697_v16 = vpop.permute.xlu2 %836  ;;  %v849_v49 = vperm.slane %v2695_v19, 3  ;;  %v848_v52 = vperm.slane %v2695_v19, 2  ;;  %v816_v54 = vperm.slane %v2707_v55, 2 }
 0x129   : > { %1152 = vmatpush.msrb.mxu3 %v940_v58  ;;  %v2716_v42 = vld [vmem:[#allocation7 + $0x21] ss:$8 sm:$0xf]  ;;  %v878_v58 = vperm.slane %v2677_v45, 0  ;;  %v1310_v7 = vperm.slane %v2727_v48, 0 }
 0x12a   : > { %1092 = vmatpush.msrb.mxu0 %v937_v39  ;;  %1112 = vmatpush.msrb.mxu1 %v938_v36  ;;  %v879_v36 = vperm.slane %v2677_v45, 1  ;;  %v2722_v39 = vld [vmem:[#allocation7 + $0x62] ss:$8 sm:$0xf] }
 0x12b   : > { %1153 = vmatpush.msrb.mxu3 %v908_v23  ;;  %v784_v23 = vperm.slane %v2716_v42, 2 }
 0x12c   : > { %v867_v3 = vpop.permute.xlu1 %866  ;;  %1093 = vmatpush.msrb.mxu0 %v905_v15  ;;  %1113 = vmatpush.msrb.mxu1 %v906_v12  ;;  %v1331_v15 = vperm.slane %v2722_v39, 2 }
 0x12d   : > { %v865_v1 = vpop.permute.xlu0 %864  ;;  %v871_v32 = vsel %vm870_vm14, %v867_v3, %v869_v34 }
 0x12e   : > { %v872_v46 = vsel %vm870_vm14, %v865_v1, %v867_v3  ;;  %v889_v30 = vmul.f32 %v881_v51, %v871_v32 }
 0x12f   : > { %v888_v25 = vmul.f32 %v880_v0, %v872_v46  ;;  %v2729_v0 = vld [vmem:[#allocation7 + $0x60] ss:$8 sm:$0xf]  ;;  %v1312_v46 = vperm.slane %v2727_v48, 2 }
 0x130   : > { %1154 = vmatpush.msrb.mxu3 %v889_v30  ;;  %v771_v33 = vpop.permute.xlu2 %770 }
 0x131   : > { %1134 = vmatpush.msrb.mxu2 %v888_v25 }
 0x134   : > { %v835_v53 = vpop.permute.xlu1 %834 }
 0x135   : > { %v833_v20 = vpop.permute.xlu0 %832  ;;  %v839_v62 = vsel %vm838_vm15, %v835_v53, %v2697_v16 }
 0x136   : > { %v840_v35 = vsel %vm838_vm15, %v833_v20, %v835_v53  ;;  %v857_v31 = vmul.f32 %v849_v49, %v839_v62  ;;  %v1339_v53 = vmul.f32 %v1331_v15, %v2305_v28  ;;  %v1293_v62 = vperm.slane %v2729_v0, 2 }
 0x137   : > { %v856_v47 = vmul.f32 %v848_v52, %v840_v35  ;;  %v2739_v52 = vld [vmem:[#allocation7 + $0x47] ss:$8 sm:$0xf]  ;;  %v1332_v35 = vperm.slane %v2722_v39, 3  ;;  %v847_v28 = vperm.slane %v2695_v19, 1 }
 0x138   : > { %1155 = vmatpush.msrb.mxu3 %v857_v31  ;;  %v1320_v31 = vmul.f32 %v1312_v46, %v2325_v37 }
 0x139   : > { %1135 = vmatpush.msrb.mxu2 %v856_v47  ;;  %v846_v47 = vperm.slane %v2695_v19, 0 }
 0x13c   : > { %v803_v57 = vpop.permute.xlu1 %802 }
 0x13d   : > { %v2711_v22 = vpop.permute.xlu0 %800 }
 0x13e   : > { %v808_v6 = vsel %vm806_vm0, %v2711_v22, %v803_v57 }
 0x13f   : > { %v824_v29 = vmul.f32 %v816_v54, %v808_v6  ;;  %v817_v54 = vperm.slane %v2707_v55, 3  ;;  %v2754_v6 = vld [vmem:[#allocation7 + $0x46] ss:$8 sm:$0xf] }
 0x140   : > { %v1255_v37 = vperm.slane %v2754_v6, 2 }
 0x141   : > { %1136 = vmatpush.msrb.mxu2 %v824_v29  ;;  %v2756_v29 = vld [vmem:[#allocation7 + $0x45] ss:$8 sm:$0xf] }
 0x142   : > { %v1236_v15 = vperm.slane %v2756_v29, 2 }
 0x144   : > { %v2725_v12 = vpop.permute.xlu1 %768 }
 0x145   : > { %v863_v51 = vpop.permute.xlu0 %862  ;;  %v776_v45 = vsel %vm774_vm1, %v2725_v12, %v771_v33 }
 0x146   : > { %v873_v3 = vsel %vm870_vm14, %v863_v51, %v865_v1  ;;  %v874_v32 = vsel %vm870_vm14, %v869_v34, %v863_v51  ;;  %v792_v49 = vmul.f32 %v784_v23, %v776_v45  ;;  %v1274_v1 = vperm.slane %v2739_v52, 2  ;;  %v2747_v34 = vld [vmem:[%s2966_s1 + $0x8] sm:$0xff] }
 0x147   : > { %v886_v30 = vmul.f32 %v878_v58, %v874_v32  ;;  %v887_v25 = vmul.f32 %v879_v36, %v873_v3  ;;  %v773_v58 = vpop.permute.xlu2 %772  ;;  %v1301_v36 = vmul.f32 %v1293_v62, %v2331_v40  ;;  %v2764_v3 = vld [vmem:[#allocation7 + $0x44] ss:$8 sm:$0xf]  ;;  %v2778_v62 = vld [vmem:[#allocation7 + $0x43] ss:$8 sm:$0xf] }
 0x148   : > { %1137 = vmatpush.msrb.mxu2 %v792_v49  ;;  %v1282_v23 = vmul.f32 %v1274_v1, %v2408_v18  ;;  %v785_v18 = vperm.slane %v2716_v42, 3  ;;  %v775_v46 = vsel %vm774_vm1, %v771_v33, %v773_v58  ;;  %v1217_v1 = vperm.slane %v2764_v3, 2  ;;  %v1482_v33 = vld [vmem:[%s2967_s2] sm:$0xff] }
 0x149   : > { %1094 = vmatpush.msrb.mxu0 %v886_v30  ;;  %1114 = vmatpush.msrb.mxu1 %v887_v25 }
 0x14a   : > { %1433 = vmatpush.msra.mxu2 %v1339_v53  ;;  %v1313_v53 = vperm.slane %v2727_v48, 3 }
 0x14b   : > { %1774 = vmatmul.msk.f32.vlgmr.msrb.gmra.mxu2 %vm678_vm13, %v2747_v34 }
 0x14c   : > { %1434 = vmatpush.msra.mxu2 %v1320_v31  ;;  %v831_v19 = vpop.permute.xlu1 %830  ;;  %v793_v31 = vmul.f32 %v785_v18, %v775_v46 }
 0x14d   : > { %v805_v51 = vpop.permute.xlu0 %804  ;;  %v841_v32 = vsel %vm838_vm15, %v831_v19, %v833_v20  ;;  %v842_v45 = vsel %vm838_vm15, %v2697_v16, %v831_v19  ;;  %v1294_v20 = vperm.slane %v2729_v0, 3  ;;  %v1263_v16 = vmul.f32 %v1255_v37, %v2446_v43 }
 0x14e   : > { %v807_v40 = vsel %vm806_vm0, %v803_v57, %v805_v51  ;;  %1435 = vmatpush.msra.mxu2 %v1301_v36  ;;  %v854_v30 = vmul.f32 %v846_v47, %v842_v45  ;;  %v855_v25 = vmul.f32 %v847_v28, %v841_v32  ;;  %v1198_v57 = vperm.slane %v2778_v62, 2  ;;  %v2793_v32 = vld [vmem:[#allocation7 + $0x42] ss:$8 sm:$0xf] }
 0x14f   : > { %v825_v49 = vmul.f32 %v817_v54, %v807_v40  ;;  %v1340_v47 = vmul.f32 %v1332_v35, %v2264_v11  ;;  %v1244_v28 = vmul.f32 %v1236_v15, %v2489_v4  ;;  %v814_v43 = vperm.slane %v2707_v55, 0 }
 0x150   : > { %1436 = vmatpush.msra.mxu2 %v1282_v23  ;;  %1095 = vmatpush.msrb.mxu0 %v854_v30  ;;  %v815_v54 = vperm.slane %v2707_v55, 1  ;;  %v2045_v36 = vmov 0   ;;  %v1321_v23 = vmul.f32 %v1313_v53, %v2382_v61  ;;  %v1302_v37 = vmul.f32 %v1294_v20, %v2404_v14 }
 0x151   : > { %1115 = vmatpush.msrb.mxu1 %v855_v25  ;;  %1156 = vmatpush.msrb.mxu3 %v825_v49  ;;  %v1275_v19 = vperm.slane %v2739_v52, 3  ;;  %v1225_v11 = vmul.f32 %v1217_v1, %v2493_v8  ;;  %v1206_v4 = vmul.f32 %v1198_v57, %v2574_v10  ;;  %v1179_v35 = vperm.slane %v2793_v32, 2  ;;  %v2821_v49 = vld [vmem:[%s2966_s1 + $0x10] sm:$0xff] }
 0x152   : > { %1437 = vmatpush.msra.mxu2 %v1263_v16  ;;  %1869 = vset.pattern.permute.xlu2 %v2045_v36  ;;  %v782_v61 = vperm.slane %v2716_v42, 0  ;;  %v783_v10 = vperm.slane %v2716_v42, 1  ;;  %v1291_v53 = vperm.slane %v2729_v0, 0  ;;  %v1292_v16 = vperm.slane %v2729_v0, 1 }
 0x153   : > { %1157 = vmatpush.msrb.mxu3 %v793_v31  ;;  %1485 = vperm.xlu2 %1869, %v1482_v33   ;;  %v1283_v30 = vmul.f32 %v1275_v19, %v2418_v5  ;;  %v1187_v25 = vmul.f32 %v1179_v35, %v2629_v38  ;;  %v1237_v5 = vperm.slane %v2756_v29, 3  ;;  %v1218_v57 = vperm.slane %v2764_v3, 3  ;;  %v2998_v35 = vld [vmem:[#allocation18_spill] sm:$0xff] }
 0x154   : > { %1438 = vmatpush.msra.mxu2 %v1244_v28  ;;  %v767_v55 = vpop.permute.xlu1 %766  ;;  %1775 = vmatmul.msk.f32.vlgmr.msrb.gmra.mxu3 %vm678_vm13, %v2747_v34  ;;  %v1199_v33 = vperm.slane %v2778_v62, 3  ;;  %v1299_v31 = vmul.f32 %v1291_v53, %v2399_v13 }
 0x155   : > { %1453 = vmatpush.msra.mxu3 %v1340_v47  ;;  %v799_v15 = vpop.permute.xlu0 %798  ;;  %v777_v14 = vsel %vm774_vm1, %v767_v55, %v2725_v12  ;;  %v778_v40 = vsel %vm774_vm1, %v773_v58, %v767_v55  ;;  %v1329_v12 = vperm.slane %v2722_v39, 0  ;;  %1870 = vset.pattern.permute.xlu0 %v2045_v36  ;;  %v1245_v0 = vmul.f32 %v1237_v5, %v2538_v63  ;;  %v2995_v36 = vld [vmem:[#allocation13_spill] sm:$0xff] }
 0x156   : > { %v809_v45 = vsel %vm806_vm0, %v799_v15, %v2711_v22  ;;  %v810_v8 = vsel %vm806_vm0, %v805_v51, %v799_v15  ;;  %1439 = vmatpush.msra.mxu2 %v1225_v11  ;;  %v1330_v22 = vperm.slane %v2722_v39, 1  ;;  %v1256_v51 = vperm.slane %v2754_v6, 3 }
 0x157   : > { %1454 = vmatpush.msra.mxu3 %v1321_v23  ;;  %v822_v18 = vmul.f32 %v814_v43, %v810_v8  ;;  %v823_v46 = vmul.f32 %v815_v54, %v809_v45  ;;  %v790_v42 = vmul.f32 %v782_v61, %v778_v40  ;;  %v791_v58 = vmul.f32 %v783_v10, %v777_v14  ;;  %v3000_v14 = vld [vmem:[#allocation20_spill] sm:$0xff]  ;;  %v3001_v8 = vld [vmem:[#allocation17_spill] sm:$0xff] }
 0x158   : > { %1440 = vmatpush.msra.mxu2 %v1206_v4  ;;  %v1311_v39 = vperm.slane %v2727_v48, 1  ;;  %v1337_v38 = vmul.f32 %v1329_v12, %v2279_v17  ;;  %v1338_v20 = vmul.f32 %v1330_v22, %v2301_v27  ;;  %v1264_v1 = vmul.f32 %v1256_v51, %v2450_v44 }
 0x159   : > { %1455 = vmatpush.msra.mxu3 %v1302_v37  ;;  %1096 = vmatpush.msrb.mxu0 %v822_v18  ;;  %v1272_v17 = vperm.slane %v2739_v52, 0  ;;  %v1318_v48 = vmul.f32 %v1310_v7, %v2378_v60  ;;  %v1273_v44 = vperm.slane %v2739_v52, 1  ;;  %v1253_v47 = vperm.slane %v2754_v6, 0 }
 0x15a   : > { %1116 = vmatpush.msrb.mxu1 %v823_v46  ;;  %1441 = vmatpush.msra.mxu2 %v1187_v25  ;;  %v1319_v27 = vmul.f32 %v1311_v39, %v2297_v26  ;;  %v1300_v60 = vmul.f32 %v1292_v16, %v2336_v41  ;;  %v1226_v28 = vmul.f32 %v1218_v57, %v2529_v56  ;;  %v1180_v26 = vperm.slane %v2793_v32, 3  ;;  %v2994_v41 = vld [vmem:[#allocation14_spill] sm:$0xff] }
 0x15b   : > { %1456 = vmatpush.msra.mxu3 %v1283_v30  ;;  %1097 = vmatpush.msrb.mxu0 %v790_v42  ;;  %v1280_v63 = vmul.f32 %v1272_v17, %v2414_v21  ;;  %v1234_v52 = vperm.slane %v2756_v29, 0  ;;  %v1281_v13 = vmul.f32 %v1273_v44, %v2353_v50  ;;  %v1235_v43 = vperm.slane %v2756_v29, 1  ;;  %v2996_v50 = vld [vmem:[#allocation19_spill] sm:$0xff] }
 0x15c   : > { %1117 = vmatpush.msrb.mxu1 %v791_v58  ;;  %1779 = vmatmul.msk.f32.vlgmr.msra.gmra.mxu2 %vm678_vm13, %v2821_v49  ;;  %v1207_v54 = vmul.f32 %v1199_v33, %v2578_v24  ;;  %v1215_v56 = vperm.slane %v2764_v3, 0  ;;  %v1216_v21 = vperm.slane %v2764_v3, 1  ;;  %v1188_v37 = vmul.f32 %v1180_v26, %v2633_v2  ;;  %v2997_v24 = vld [vmem:[#allocation15_spill] sm:$0xff]  ;;  %v2999_v2 = vld [vmem:[#allocation16_spill] sm:$0xff] }
 0x15d   : > { %1772 = vmatmul.msk.f32.vlgmr.msrb.gmra.mxu0 %vm678_vm13, %v2747_v34  ;;  %1773 = vmatmul.msk.f32.vlgmr.msrb.gmra.mxu1 %vm678_vm13, %v2747_v34  ;;  %v1254_v34 = vperm.slane %v2754_v6, 1  ;;  %v1261_v6 = vmul.f32 %v1253_v47, %v2994_v41  ;;  %v1242_v19 = vmul.f32 %v1234_v52, %v2996_v50  ;;  %v1196_v29 = vperm.slane %v2778_v62, 0 }
 0x15e   : > { %1393 = vmatpush.msra.mxu0 %v1337_v38  ;;  %1413 = vmatpush.msra.mxu1 %v1338_v20  ;;  %v1243_v11 = vmul.f32 %v1235_v43, %v2997_v24  ;;  %v1197_v4 = vperm.slane %v2778_v62, 1  ;;  %v1223_v55 = vmul.f32 %v1215_v56, %v2998_v35  ;;  %v1177_v15 = vperm.slane %v2793_v32, 0  ;;  %v1522_v24 = vld [vmem:[%s343_s13] sm:$0xff]  ;;  %s1969_s13 = scalar_lea.hbm %s1968_s12, 32 }
 0x15f   : > { %1457 = vmatpush.msra.mxu3 %v1264_v1  ;;  %v1262_v23 = vmul.f32 %v1254_v34, %v2995_v36  ;;  %v1224_v3 = vmul.f32 %v1216_v21, %v2999_v2  ;;  %v1178_v61 = vperm.slane %v2793_v32, 1  ;;  %v1204_v45 = vmul.f32 %v1196_v29, %v3000_v14  ;;  %p1970_p3 = scmp.ne.s32.totalorder %s1968_s12, %s1969_s13  ;;  %p1975_p7 = scmp.lt.s32.totalorder %s1973_s6, %s1969_s13 }
 0x160   : > { %1394 = vmatpush.msra.mxu0 %v1318_v48  ;;  %1414 = vmatpush.msra.mxu1 %v1319_v27  ;;  %v1205_v62 = vmul.f32 %v1197_v4, %v3001_v8  ;;  %v1185_v10 = vmul.f32 %v1177_v15, %v2582_v59 }
 0x161   : > { %1458 = vmatpush.msra.mxu3 %v1245_v0  ;;  %v1186_v40 = vmul.f32 %v1178_v61, %v2590_v9  ;;  %p1971_p5 = pnand %p1970_p3, %p2146_p13  ;;  %p1976_p9 = por %p1975_p7, %p1974_p8 }
 0x162   : > { %1395 = vmatpush.msra.mxu0 %v1299_v31  ;;  %1415 = vmatpush.msra.mxu1 %v1300_v60 }
 0x163   : > { %1459 = vmatpush.msra.mxu3 %v1226_v28  ;;  %p1972_p12 = pneg %p1971_p5 }
 0x164   : > { %1396 = vmatpush.msra.mxu0 %v1280_v63  ;;  %1416 = vmatpush.msra.mxu1 %v1281_v13 }
 0x165   : > { %1460 = vmatpush.msra.mxu3 %v1207_v54  ;;  %p1977_p10 = pnand %p1976_p9, %p1972_p12 }
 0x166   : > { %1397 = vmatpush.msra.mxu0 %v1261_v6  ;;  %1417 = vmatpush.msra.mxu1 %v1262_v23 }
 0x167   : > { %1461 = vmatpush.msra.mxu3 %v1188_v37 }
 0x168   : > { %1780 = vmatmul.msk.f32.vlgmr.msra.gmra.mxu3 %vm678_vm13, %v2821_v49  ;;  %1398 = vmatpush.msra.mxu0 %v1242_v19 }
 0x169   : > { %1418 = vmatpush.msra.mxu1 %v1243_v11 }
 0x16a   : > { %1399 = vmatpush.msra.mxu0 %v1223_v55  ;;  %v1524_v55 = vld [vmem:[%s347_s22] sm:$0xff] }
 0x16b   : > { %1419 = vmatpush.msra.mxu1 %v1224_v3 }
 0x16c   : > { %1400 = vmatpush.msra.mxu0 %v1204_v45 }
 0x16d   : > { %1420 = vmatpush.msra.mxu1 %v1205_v62 }
 0x16e   : > { %1401 = vmatpush.msra.mxu0 %v1185_v10 }
 0x16f   : > { %1421 = vmatpush.msra.mxu1 %v1186_v40  ;;  %1777 = vmatmul.msk.f32.vlgmr.msra.gmra.mxu0 %vm678_vm13, %v2821_v49 }
 0x170   : > { %1778 = vmatmul.msk.f32.vlgmr.msra.gmra.mxu1 %vm678_vm13, %v2821_v49 }
 0x1a2   : > { %v699_v46 = vpop.f32.mrf.mxu0  ;;  %v719_v12 = vpop.f32.mrf.mxu1 }
 0x1a6   : > { %v739_v32 = vpop.f32.mrf.mxu2  ;;  %v759_v18 = vpop.f32.mrf.mxu3 }
 0x1ad   : > { %v1486_v53 = vpop.permute.xlu2 %1485 }
 0x1ce   : > { %v1139_v22 = vpop.f32.mrf.mxu2 }
 0x1cf   : > { %v1168_v25 = vadd.f32 %v1139_v22, %v739_v32 }
 0x1d7   : > { %v1159_v30 = vpop.f32.mrf.mxu3 }
 0x1d8   : > { %v1169_v39 = vadd.f32 %v1159_v30, %v759_v18 }
 0x1da   : > { %v1099_v51 = vpop.f32.mrf.mxu0  ;;  %v1119_v59 = vpop.f32.mrf.mxu1 }
 0x1db   : > { %v1166_v9 = vadd.f32 %v1099_v51, %v699_v46  ;;  %v1167_v58 = vadd.f32 %v1119_v59, %v719_v12 }
 0x1df   : > { %v1443_v7 = vpop.f32.mrf.mxu2 }
 0x1e0   : > { %v1472_v5 = vadd.f32 %v1443_v7, %v1168_v25 }
 0x1e2   : > { %v1490_v17 = vadd.f32 %v1486_v53, %v1472_v5 }
 0x1e4   : > { %v1499_v47 = vmul.f32 %v1490_v17, %v1490_v17 }
 0x1eb   : > { %v1463_v42 = vpop.f32.mrf.mxu3 }
 0x1ec   : > { %v1403_v38 = vpop.f32.mrf.mxu0  ;;  %v1473_v49 = vadd.f32 %v1463_v42, %v1169_v39 }
 0x1ed   : > { %v1470_v20 = vadd.f32 %v1403_v38, %v1166_v9  ;;  %v1423_v16 = vpop.f32.mrf.mxu1 }
 0x1ee   : > { %v1471_v1 = vadd.f32 %v1423_v16, %v1167_v58  ;;  %v1491_v44 = vadd.f32 %v1486_v53, %v1473_v49 }
 0x1ef   : > { %v1488_v57 = vadd.f32 %v1486_v53, %v1470_v20 }
 0x1f0   : > { %v1489_v48 = vadd.f32 %v1486_v53, %v1471_v1  ;;  %v1500_v28 = vmul.f32 %v1491_v44, %v1491_v44 }
 0x1f1   : > { %v1497_v27 = vmul.f32 %v1488_v57, %v1488_v57 }
 0x1f2   : > { %v1498_v0 = vmul.f32 %v1489_v48, %v1489_v48  ;;  %v1492_v33 = vadd.f32 %v1489_v48, %v1488_v57 }
 0x1f4   : > { %v1493_v31 = vadd.f32 %v1492_v33, %v1490_v17  ;;  %v1501_v60 = vadd.f32 %v1498_v0, %v1497_v27 }
 0x1f6   : > { %v1494_v34 = vadd.f32 %v1493_v31, %v1491_v44  ;;  %v1502_v26 = vadd.f32 %v1501_v60, %v1499_v47 }
 0x1f8   : > { %1495 = vadd.xlane.f32.xlu0 %v1494_v34  ;;  %v1503_v63 = vadd.f32 %v1502_v26, %v1500_v28 }
 0x1fa   : > { %1504 = vadd.xlane.f32.xlu1 %v1503_v63 }
 0x26b   : > { %v1496_v52 = vpop.xlane.xlu0 %1495 }
 0x26c   : > { %v1506_v13 = vmul.f32 0.001953125, %v1496_v52 }
 0x26d   : > { %v1505_v43 = vpop.xlane.xlu1 %1504 }
 0x26e   : > { %v1508_v54 = vmul.f32 %v1506_v13, %v1506_v13  ;;  %v1507_v41 = vmul.f32 0.001953125, %v1505_v43 }
 0x270   : > { %v1509_v6 = vsub.f32 %v1507_v41, %v1508_v54 }
 0x272   : > { %v1510_v56 = vmax.f32 %v1509_v6, 0.0 }
 0x274   : > { %v1511_v36 = vadd.f32 1e-05, %v1510_v56 }
 0x276   : > { %1871 = vrsqrt.f32 %v1511_v36  ;;  %vm1518_vm3 = vweird.f32 %v1511_v36 }
 0x27c   : > { %v1872_v23 = vpop.eup %1871 }
 0x27d   : > { %v1513_v21 = vmul.f32 %v1872_v23, %v1511_v36  ;;  %vm1519_vm2 = vweird.f32 %v1872_v23 }
 0x27e   : > { %vm1520_vm4 = vmor %vm1518_vm3, %vm1519_vm2 }
 0x27f   : > { %v1514_v37 = vmul.f32 %v1872_v23, %v1513_v21 }
 0x281   : > { %v1515_v50 = vmul.f32 0.5, %v1514_v37 }
 0x283   : > { %v1516_v19 = vsub.f32 1.5, %v1515_v50 }
 0x285   : > { %v1517_v29 = vmul.f32 %v1872_v23, %v1516_v19 }
 0x287   : > { %v1521_v11 = vsel %vm1520_vm4, %v1872_v23, %v1517_v29 }
 0x288   : > { %v1523_v4 = vmul.f32 %v1522_v24, %v1521_v11 }
 0x28a   : > { %1529 = vperm.xlu2 %1869, %v1523_v4   ;;  %v1525_v35 = vmul.f32 %v1523_v4, %v1506_v13 }
 0x28c   : > { %v1526_v15 = vsub.f32 %v1524_v55, %v1525_v35 }
 0x292   : > { %1538 = vperm.xlu2 %1869, %v1526_v15  }
 0x2e4   : > { %v1530_v2 = vpop.permute.xlu2 %1529 }
 0x2e5   : > { %v1532_v3 = vmul.f32 %v1530_v2, %v1488_v57  ;;  %v1533_v61 = vmul.f32 %v1530_v2, %v1489_v48  ;;  %v1534_v14 = vmul.f32 %v1530_v2, %v1490_v17  ;;  %v1535_v45 = vmul.f32 %v1530_v2, %v1491_v44 }
 0x2ec   : > { %v1539_v8 = vpop.permute.xlu2 %1538 }
 0x2ed   : > { %v2885_v62 = vadd.f32 %v1539_v8, %v1532_v3  ;;  %v2887_v10 = vadd.f32 %v1539_v8, %v1533_v61  ;;  %v2889_v40 = vadd.f32 %v1539_v8, %v1534_v14  ;;  %v2891_v32 = vadd.f32 %v1539_v8, %v1535_v45  ;;  %v1889_v61 = vld [vmem:[%s2183_s15] sm:$0xff]  ;;  %v1890_v8 = vld [vmem:[%s2183_s15 + $0x8] sm:$0xff] }
 0x2ef   : > { %v1781_v18 = vmul.f32 -1.442695, %v2885_v62  ;;  %v1782_v46 = vmul.f32 -1.442695, %v2887_v10  ;;  %v1783_v12 = vmul.f32 -1.442695, %v2889_v40 }
 0x2f0   : > { %v1784_v22 = vmul.f32 -1.442695, %v2891_v32 }
 0x2f1   : > { %1873 = vpow2.f32 %v1781_v18 }
 0x2f2   : > { %1875 = vpow2.f32 %v1782_v46  ;;  %v1891_v46 = vld [vmem:[%s2183_s15 + $0x10] sm:$0xff] }
 0x2f3   : > { %1877 = vpow2.f32 %v1783_v12  ;;  %v1892_v12 = vld [vmem:[%s2183_s15 + $0x18] sm:$0xff] }
 0x2f4   : > { %1879 = vpow2.f32 %v1784_v22 }
 0x2f7   : > { %v1874_v30 = vpop.eup %1873 }
 0x2f8   : > { %v1876_v51 = vpop.eup %1875  ;;  %v1557_v59 = vadd.f32 1.0, %v1874_v30 }
 0x2f9   : > { %v1878_v25 = vpop.eup %1877  ;;  %v1558_v7 = vadd.f32 1.0, %v1876_v51 }
 0x2fa   : > { %v1880_v9 = vpop.eup %1879  ;;  %v1559_v42 = vadd.f32 1.0, %v1878_v25  ;;  %1881 = vrcp.f32 %v1557_v59  ;;  %v1570_v39 = vand.u32 2147483647, %v1557_v59  ;;  %v1572_v5 = vand.u32 2147483648, %v1557_v59 }
 0x2fb   : > { %v2897_v58 = vadd.f32 1.0, %v1880_v9  ;;  %1883 = vrcp.f32 %v1558_v7  ;;  %vm1566_vm5 = vweird.f32 %v1557_v59  ;;  %vm1581_vm6 = vweird.f32 %v1558_v7 }
 0x2fc   : > { %1885 = vrcp.f32 %v1559_v42  ;;  %v1585_v1 = vand.u32 2147483647, %v1558_v7  ;;  %v1587_v57 = vand.u32 2147483648, %v1558_v7  ;;  %vm2900_vm7 = vcmp.eq.f32.partialorder %v1570_v39, 8.507059e+37 }
 0x2fd   : > { %1887 = vrcp.f32 %v2897_v58  ;;  %v1573_v27 = vor.u32 1.1754944e-38, %v1572_v5  ;;  %vm1596_vm8 = vweird.f32 %v1559_v42  ;;  %v1600_v31 = vand.u32 2147483647, %v1559_v42 }
 0x2fe   : > { %v1602_v47 = vand.u32 2147483648, %v1559_v42  ;;  %vm2905_vm11 = vcmp.eq.f32.partialorder %v1585_v1, 8.507059e+37  ;;  %v1588_v52 = vor.u32 1.1754944e-38, %v1587_v57  ;;  %vm1611_vm14 = vweird.f32 %v2897_v58 }
 0x2ff   : > { %v1615_v6 = vand.u32 2147483647, %v2897_v58  ;;  %v1617_v56 = vand.u32 2147483648, %v2897_v58  ;;  %vm1601_vm2 = vcmp.eq.f32.partialorder %v1600_v31, 8.507059e+37 }
 0x300   : > { %v1882_v38 = vpop.eup %1881  ;;  %v1603_v19 = vor.u32 1.1754944e-38, %v1602_v47 }
 0x301   : > { %v1884_v53 = vpop.eup %1883  ;;  %v1562_v20 = vmul.f32 %v1882_v38, %v1557_v59  ;;  %vm1567_vm9 = vweird.f32 %v1882_v38  ;;  %v1618_v55 = vor.u32 1.1754944e-38, %v1617_v56  ;;  %vm1616_vm4 = vcmp.eq.f32.partialorder %v1615_v6, 8.507059e+37 }
 0x302   : > { %v1886_v16 = vpop.eup %1885  ;;  %v1577_v49 = vmul.f32 %v1884_v53, %v1558_v7  ;;  %vm1582_vm10 = vweird.f32 %v1884_v53  ;;  %vm1568_vm13 = vmor %vm1566_vm5, %vm1567_vm9 }
 0x303   : > { %v1563_v17 = vsub.f32 1.0, %v1562_v20  ;;  %v1592_v44 = vmul.f32 %v1886_v16, %v1559_v42  ;;  %v1888_v0 = vpop.eup %1887  ;;  %vm1597_vm12 = vweird.f32 %v1886_v16  ;;  %vm1583_vm15 = vmor %vm1581_vm6, %vm1582_vm10 }
 0x304   : > { %v1578_v33 = vsub.f32 1.0, %v1577_v49  ;;  %v1607_v28 = vmul.f32 %v1888_v0, %v2897_v58  ;;  %vm1612_vm0 = vweird.f32 %v1888_v0  ;;  %vm1598_vm1 = vmor %vm1596_vm8, %vm1597_vm12 }
 0x305   : > { %v1564_v60 = vmul.f32 %v1882_v38, %v1563_v17  ;;  %v1593_v34 = vsub.f32 1.0, %v1592_v44  ;;  %vm1613_vm3 = vmor %vm1611_vm14, %vm1612_vm0 }
 0x306   : > { %v1579_v26 = vmul.f32 %v1884_v53, %v1578_v33  ;;  %v1608_v54 = vsub.f32 1.0, %v1607_v28 }
 0x307   : > { %v1565_v13 = vadd.f32 %v1882_v38, %v1564_v60  ;;  %v1594_v43 = vmul.f32 %v1886_v16, %v1593_v34 }
 0x308   : > { %v1580_v41 = vadd.f32 %v1884_v53, %v1579_v26  ;;  %v1609_v21 = vmul.f32 %v1888_v0, %v1608_v54 }
 0x309   : > { %v1569_v36 = vsel %vm1568_vm13, %v1882_v38, %v1565_v13  ;;  %v1595_v23 = vadd.f32 %v1886_v16, %v1594_v43 }
 0x30a   : > { %v1574_v37 = vsel %vm2900_vm7, %v1573_v27, %v1569_v36  ;;  %v1584_v50 = vsel %vm1583_vm15, %v1884_v53, %v1580_v41  ;;  %v1610_v11 = vadd.f32 %v1888_v0, %v1609_v21 }
 0x30b   : > { %v1589_v29 = vsel %vm2905_vm11, %v1588_v52, %v1584_v50  ;;  %v1599_v24 = vsel %vm1598_vm1, %v1886_v16, %v1595_v23  ;;  %v1621_v4 = vmul.f32 %v1574_v37, %v2885_v62 }
 0x30c   : > { %v1604_v35 = vsel %vm1601_vm2, %v1603_v19, %v1599_v24  ;;  %v1622_v15 = vmul.f32 %v1589_v29, %v2887_v10  ;;  %v1614_v2 = vsel %vm1613_vm3, %v1888_v0, %v1610_v11 }
 0x30d   : > { %v1623_v3 = vmul.f32 %v1604_v35, %v2889_v40  ;;  %v1625_v14 = vadd.f32 %v1889_v61, %v1621_v4  ;;  %v1619_v45 = vsel %vm1616_vm4, %v1618_v55, %v1614_v2 }
 0x30e   : > { %v1626_v62 = vadd.f32 %v1890_v8, %v1622_v15  ;;  %v1624_v18 = vmul.f32 %v1619_v45, %v2891_v32 }
 0x30f   : > { %v1627_v10 = vadd.f32 %v1891_v46, %v1623_v3  ;;  %1629 = vst [vmem:[%s339_s8] sm:$0xff] %v1625_v14 }
 0x310   : > { %1630 = vst [vmem:[%s339_s8 + $0x8] sm:$0xff] %v1626_v62  ;;  %v1628_v22 = vadd.f32 %v1892_v12, %v1624_v18 }
 0x311   : > { %1631 = vst [vmem:[%s339_s8 + $0x10] sm:$0xff] %v1627_v10 }
 0x312   : > { %1632 = vst [vmem:[%s339_s8 + $0x18] sm:$0xff] %v1628_v22 }
 0x313   : > { %1980 = shalt.err (!%p1977_p10)
}
 0x314   : > { %1798 = dma.vmem_to_hbm [thread:$0]  (%p2146_p13), %s1648_s9, 512, %s1650_s18, %s1634_s11  }
 0x315 PF: > { %s1661_s20 = sand.u32 1, %s2011_s24   ;;  %p3006_p11 = scmp.ge.s32.totalorder %s2023_s27, 2 }
 0x316   : > { %s1662_s15 = scalar_lea.sflag [#allocation6], %s1661_s20 }
 0x317   : > { %p1809_p0 = pnand %p3006_p11, %p2151_p4 }
 0x319   : > { %p1810_p2 = pneg %p1809_p0 }
 0x31b   : > { %2006 = dma.done.wait (%p1810_p2), %s1662_s15, 512  }
 0x31c   : > { %2008 = vsyncadd (%p1810_p2), %s1662_s15, 4294966784  ;;  %p21_p6 = scmp.ge.s32.totalorder %s2126_s14, 4   ;;  %s3007_s24 = smov %s2015_s25 }
 0x31d   : > { %s3008_s25 = smov %s2019_s26  ;;  %s3009_s26 = smov %s2138_s17 }
 0x31e   : > { %s3010_s27 = smov %s2126_s14  ;;  %23 = sbr.rel (!%p21_p6) target bundleno = 6 (0x6), region = 131 }
 0x323   :  { %1668 = vsyncpa [#allocation5], 1 }
 0x324   :  { %1670 = vsyncpa [#allocation5 + $0x1], 1 }
 0x325   :  { %1671 = vsyncpa [#allocation8], 1 }
 0x326   :  { %1672 = vsyncpa [#allocation6], 1 }
 0x327   :  { %1674 = vsyncpa [#allocation6 + $0x1], 1 }

</bundles_post_ra>
